<compile_context>
chip_gen: v7x
topology: tpu7x:2x2x1
jax: 0.10.0
libtpu: 0.0.40
codegen_flags: <defaults>
</compile_context>

<pallas_src>
import jax
import jax.numpy as jnp
from jax.experimental import pallas as pl
from jax.experimental.pallas import tpu as pltpu

IN_DIM = 32            # FCEncoder.fc1 input features
BOTTLENECK = 1024      # FCAutoEncoder default bottleneck
EPS = 1e-12            # F.normalize default eps
PACK = 4               # samples packed per 128-lane row (4 * 32 = 128)
ROW_ALIGN = 8 * PACK   # batch-tile granularity: packed rows multiple of 8 sublanes


# --------------------------------------------------------------------------
# Kernel: one (TB/4, 128) packed batch tile -> full 6-layer MLP -> packed out.
# --------------------------------------------------------------------------
def fc_autoencoder_kernel(x_ref,
                          w1_ref, b1_ref, w2_ref, b2_ref, w3_ref, b3_ref,
                          seg_ref, exp_ref,
                          wd1_ref, bd1_ref, wd2_ref, bd2_ref, wd3_ref, bd3_ref,
                          out_ref):
    f32 = jnp.float32
    x = x_ref[...]                                                  # (P, 128): 4 samples/row

    # ---------------- encoder (block-diagonal packed weights) ----------------
    h = jnp.maximum(
        jnp.dot(x, w1_ref[...], preferred_element_type=f32) + b1_ref[...], 0.0)   # (P, 64)
    h = jnp.maximum(
        jnp.dot(h, w2_ref[...], preferred_element_type=f32) + b2_ref[...], 0.0)   # (P, 32)
    code = jnp.dot(h, w3_ref[...], preferred_element_type=f32) + b3_ref[...]      # (P, 4*BN)

    # F.normalize(p=2, dim=1) per packed sample segment:
    #   x / max(||x||, eps) == x * rsqrt(max(||x||^2, eps^2))   (sqrt is monotone)
    norm_sq = jnp.dot(code * code, seg_ref[...], preferred_element_type=f32)       # (P, 4)
    inv = jax.lax.rsqrt(jnp.maximum(norm_sq, EPS * EPS))                           # (P, 4) EUP

    # ---------------- decoder ----------------
    # Fold the per-sample scale into the output of the block-diagonal first
    # decoder matmul: (code_j * inv_j) @ Wd1 == inv_j * (code_j @ Wd1).
    d = jnp.dot(code, wd1_ref[...], preferred_element_type=f32)                    # (P, 32)
    scale = jnp.dot(inv, exp_ref[...], preferred_element_type=f32)                 # (P, 32)
    h = jnp.maximum(d * scale + bd1_ref[...], 0.0)                                 # (P, 32)
    h = jnp.maximum(
        jnp.dot(h, wd2_ref[...], preferred_element_type=f32) + bd2_ref[...], 0.0)  # (P, 64)
    out = jnp.dot(h, wd3_ref[...], preferred_element_type=f32) + bd3_ref[...]      # (P, 128)
    out_ref[...] = out.astype(out_ref.dtype)


# --------------------------------------------------------------------------
# Wrapper-side glue (plain JAX): packing, weight prep, tiling, pallas_call.
# --------------------------------------------------------------------------
def _round_up(n, m):
    return ((n + m - 1) // m) * m


def _choose_tile(B, tb):
    """Pick (TB, Bp): low padding waste, >=2 (even) tiles when batch allows."""
    tb = max(int(tb), ROW_ALIGN)
    n_tiles = pl.cdiv(B, tb)
    if n_tiles == 1 and B >= 2 * ROW_ALIGN:
        n_tiles = 2                     # let v7x megacore split the parallel axis
    if n_tiles > 1 and n_tiles % 2 == 1:
        n_tiles += 1                    # even tile count -> balanced across 2 TCs
    TB = _round_up(pl.cdiv(B, n_tiles), ROW_ALIGN)
    Bp = _round_up(B, TB)
    return TB, Bp


def _pack_params(params, dtype=jnp.float32):
    """Block-diagonal (x4) weights + tiled biases + normalize helper matrices."""
    (w1, b1, w2, b2, w3, b3, wd1, bd1, wd2, bd2, wd3, bd3) = params
    bn = w3.shape[0]          # bottleneck
    dec_in = wd1.shape[0]     # 8
    eye = jnp.eye(PACK, dtype=dtype)

    def bd4(w):               # torch (out,in) -> packed (4*in, 4*out), block diagonal
        return jnp.kron(eye, w.T.astype(dtype))

    def t4(b):                # (out,) -> lane-dense (1, 4*out)
        return jnp.tile(b.astype(dtype), PACK).reshape(1, -1)

    seg = jnp.kron(eye, jnp.ones((bn, 1), dtype))        # (4*bn, 4): segment-sum matrix
    exp = jnp.kron(eye, jnp.ones((1, dec_in), dtype))    # (4, 4*dec_in): scale expander

    return (bd4(w1), t4(b1), bd4(w2), t4(b2), bd4(w3), t4(b3),
            seg, exp,
            bd4(wd1), t4(bd1), bd4(wd2), t4(bd2), bd4(wd3), t4(bd3))


def fc_autoencoder(x, params, tb=1024):
    """x: (B, 32) float32 -> (B, 32) float32 reconstruction."""
    B, D = x.shape
    assert D == IN_DIM, D

    TB, Bp = _choose_tile(B, tb)
    P = TB // PACK                                   # packed rows per tile (mult of 8)
    LANES = PACK * IN_DIM                            # 128

    xp = x if Bp == B else jnp.pad(x, ((0, Bp - B), (0, 0)))
    xpk = xp.reshape(Bp // PACK, LANES)              # free row-major repack -> lane-dense

    consts = _pack_params(params)

    in_specs = [pl.BlockSpec((P, LANES), lambda i: (i, 0))]
    in_specs += [pl.BlockSpec(c.shape, lambda i: (0, 0)) for c in consts]
    out_specs = pl.BlockSpec((P, LANES), lambda i: (i, 0))

    out = pl.pallas_call(
        fc_autoencoder_kernel,
        out_shape=jax.ShapeDtypeStruct((Bp // PACK, LANES), jnp.float32),
        grid_spec=pltpu.PrefetchScalarGridSpec(
            num_scalar_prefetch=0,
            grid=(Bp // TB,),
            in_specs=in_specs,
            out_specs=out_specs,
        ),
        compiler_params=pltpu.CompilerParams(
            dimension_semantics=("parallel",),
            vmem_limit_bytes=28 * 1024 * 1024),
    )(xpk, *consts)

    return out.reshape(Bp, IN_DIM)[:B]


# --------------------------------------------------------------------------
# Pure-JAX reference matching the PyTorch forward semantics.
# --------------------------------------------------------------------------
def reference(x, params):
    (w1, b1, w2, b2, w3, b3, wd1, bd1, wd2, bd2, wd3, bd3) = params
    h = jax.nn.relu(x @ w1.T + b1)
    h = jax.nn.relu(h @ w2.T + b2)
    code = h @ w3.T + b3
    norm = jnp.sqrt(jnp.sum(code * code, axis=1, keepdims=True))
    code = code / jnp.maximum(norm, EPS)
    h = jax.nn.relu(code @ wd1.T + bd1)
    h = jax.nn.relu(h @ wd2.T + bd2)
    return h @ wd3.T + bd3


def _make_params(key, bottleneck=BOTTLENECK):
    ks = jax.random.split(key, 12)
    w1 = 0.1 * jax.random.normal(ks[0], (16, IN_DIM), jnp.float32)
    b1 = 0.1 * jax.random.normal(ks[1], (16,), jnp.float32)
    w2 = 0.1 * jax.random.normal(ks[2], (8, 16), jnp.float32)
    b2 = 0.1 * jax.random.normal(ks[3], (8,), jnp.float32)
    w3 = 0.1 * jax.random.normal(ks[4], (bottleneck, 8), jnp.float32)
    b3 = 0.1 * jax.random.normal(ks[5], (bottleneck,), jnp.float32)
    wd1 = 0.05 * jax.random.normal(ks[6], (8, bottleneck), jnp.float32)
    bd1 = 0.05 * jax.random.normal(ks[7], (8,), jnp.float32)
    wd2 = 0.1 * jax.random.normal(ks[8], (16, 8), jnp.float32)
    bd2 = 0.1 * jax.random.normal(ks[9], (16,), jnp.float32)
    wd3 = 0.1 * jax.random.normal(ks[10], (IN_DIM, 16), jnp.float32)
    bd3 = 0.1 * jax.random.normal(ks[11], (IN_DIM,), jnp.float32)
    return (w1, b1, w2, b2, w3, b3, wd1, bd1, wd2, bd2, wd3, bd3)


if __name__ == "__main__":
    key = jax.random.PRNGKey(0)
    kp, kx1, kx2 = jax.random.split(key, 3)
    params = _make_params(kp)

    # Small case from the module spec: batch=2, 32 input features (grid = 1).
    x_small = jax.random.normal(kx1, (2, IN_DIM), jnp.float32)
    out_small = jax.block_until_ready(fc_autoencoder(x_small, params))
    ref_small = jax.block_until_ready(reference(x_small, params))
    assert out_small.shape == (2, IN_DIM), out_small.shape
    err = float(jnp.max(jnp.abs(out_small - ref_small)))
    if err > 1e-3:
        raise AssertionError(f"small-batch mismatch: max abs err = {err}")

    # Non-multiple batch, default tile selection (2 even tiles, low padding).
    x_big = jax.random.normal(kx2, (300, IN_DIM), jnp.float32)
    out_big = jax.block_until_ready(fc_autoencoder(x_big, params))
    ref_big = jax.block_until_ready(reference(x_big, params))
    assert out_big.shape == (300, IN_DIM), out_big.shape
    err = float(jnp.max(jnp.abs(out_big - ref_big)))
    if err > 1e-3:
        raise AssertionError(f"tiled-batch mismatch: max abs err = {err}")

    # Force a larger grid (>2 tiles) to exercise the adaptive tiling path.
    out_grid = jax.block_until_ready(fc_autoencoder(x_big, params, tb=96))
    err = float(jnp.max(jnp.abs(out_grid - ref_big)))
    if err > 1e-3:
        raise AssertionError(f"multi-tile mismatch: max abs err = {err}")

    # TODO(synk): NormalReg / cov regularizer is a training-loss term, not part of forward(); not implemented.
    print("KERNEL_OK")
</pallas_src>

<mosaic_0001>
module attributes {stable_mosaic.version = 11 : i64} {
  func.func @fc_autoencoder_kernel(%arg0: i32, %arg1: memref<8x128xf32, #tpu.memory_space<vmem>>, %arg2: memref<128x64xf32, #tpu.memory_space<vmem>>, %arg3: memref<1x64xf32, #tpu.memory_space<vmem>>, %arg4: memref<64x32xf32, #tpu.memory_space<vmem>>, %arg5: memref<1x32xf32, #tpu.memory_space<vmem>>, %arg6: memref<32x4096xf32, #tpu.memory_space<vmem>>, %arg7: memref<1x4096xf32, #tpu.memory_space<vmem>>, %arg8: memref<4096x4xf32, #tpu.memory_space<vmem>>, %arg9: memref<4x32xf32, #tpu.memory_space<vmem>>, %arg10: memref<4096x32xf32, #tpu.memory_space<vmem>>, %arg11: memref<1x32xf32, #tpu.memory_space<vmem>>, %arg12: memref<32x64xf32, #tpu.memory_space<vmem>>, %arg13: memref<1x64xf32, #tpu.memory_space<vmem>>, %arg14: memref<64x128xf32, #tpu.memory_space<vmem>>, %arg15: memref<1x128xf32, #tpu.memory_space<vmem>>, %arg16: memref<8x128xf32, #tpu.memory_space<vmem>>) attributes {dimension_semantics = [#tpu.dimension_semantics<parallel>], iteration_bounds = array<i64: 1>, scalar_prefetch = 0 : i64, scratch_operands = 0 : i64, tpu.core_type = #tpu.core_type<tc>, window_params = [{transform_indices = @transform_0, window_bounds = array<i64: 8, 128>}, {pipeline_mode = #tpu.pipeline_mode<synchronous>, transform_indices = @transform_1, window_bounds = array<i64: 128, 64>}, {pipeline_mode = #tpu.pipeline_mode<synchronous>, transform_indices = @transform_2, window_bounds = array<i64: 1, 64>}, {pipeline_mode = #tpu.pipeline_mode<synchronous>, transform_indices = @transform_3, window_bounds = array<i64: 64, 32>}, {pipeline_mode = #tpu.pipeline_mode<synchronous>, transform_indices = @transform_4, window_bounds = array<i64: 1, 32>}, {pipeline_mode = #tpu.pipeline_mode<synchronous>, transform_indices = @transform_5, window_bounds = array<i64: 32, 4096>}, {pipeline_mode = #tpu.pipeline_mode<synchronous>, transform_indices = @transform_6, window_bounds = array<i64: 1, 4096>}, {pipeline_mode = #tpu.pipeline_mode<synchronous>, transform_indices = @transform_7, window_bounds = array<i64: 4096, 4>}, {pipeline_mode = #tpu.pipeline_mode<synchronous>, transform_indices = @transform_8, window_bounds = array<i64: 4, 32>}, {pipeline_mode = #tpu.pipeline_mode<synchronous>, transform_indices = @transform_9, window_bounds = array<i64: 4096, 32>}, {pipeline_mode = #tpu.pipeline_mode<synchronous>, transform_indices = @transform_10, window_bounds = array<i64: 1, 32>}, {pipeline_mode = #tpu.pipeline_mode<synchronous>, transform_indices = @transform_11, window_bounds = array<i64: 32, 64>}, {pipeline_mode = #tpu.pipeline_mode<synchronous>, transform_indices = @transform_12, window_bounds = array<i64: 1, 64>}, {pipeline_mode = #tpu.pipeline_mode<synchronous>, transform_indices = @transform_13, window_bounds = array<i64: 64, 128>}, {pipeline_mode = #tpu.pipeline_mode<synchronous>, transform_indices = @transform_14, window_bounds = array<i64: 1, 128>}, {transform_indices = @transform_15, window_bounds = array<i64: 8, 128>}]} {
    %c0 = arith.constant 0 : index
    %c0_0 = arith.constant 0 : index
    %0 = vector.load %arg1[%c0, %c0_0] : memref<8x128xf32, #tpu.memory_space<vmem>>, vector<8x128xf32>
    %c0_1 = arith.constant 0 : index
    %c0_2 = arith.constant 0 : index
    %1 = vector.load %arg2[%c0_1, %c0_2] : memref<128x64xf32, #tpu.memory_space<vmem>>, vector<128x64xf32>
    %cst = arith.constant dense<0.000000e+00> : vector<8x64xf32>
    %2 = tpu.matmul %0, %1, %cst {dimension_numbers = #tpu.dot_dimension_numbers<[1], [0], [0], [1], [0, 0, 1, 1], [], []>} : vector<8x128xf32>, vector<128x64xf32>, vector<8x64xf32> -> vector<8x64xf32>
    %c0_3 = arith.constant 0 : index
    %c0_4 = arith.constant 0 : index
    %3 = vector.load %arg3[%c0_3, %c0_4] : memref<1x64xf32, #tpu.memory_space<vmem>>, vector<1x64xf32>
    %4 = vector.broadcast %3 : vector<1x64xf32> to vector<8x64xf32>
    %5 = arith.addf %2, %4 : vector<8x64xf32>
    %cst_5 = arith.constant 0.000000e+00 : f32
    %6 = vector.broadcast %cst_5 : f32 to vector<8x64xf32>
    %7 = arith.maximumf %5, %6 : vector<8x64xf32>
    %c0_6 = arith.constant 0 : index
    %c0_7 = arith.constant 0 : index
    %8 = vector.load %arg4[%c0_6, %c0_7] : memref<64x32xf32, #tpu.memory_space<vmem>>, vector<64x32xf32>
    %cst_8 = arith.constant dense<0.000000e+00> : vector<8x32xf32>
    %9 = tpu.matmul %7, %8, %cst_8 {dimension_numbers = #tpu.dot_dimension_numbers<[1], [0], [0], [1], [0, 0, 1, 1], [], []>} : vector<8x64xf32>, vector<64x32xf32>, vector<8x32xf32> -> vector<8x32xf32>
    %c0_9 = arith.constant 0 : index
    %c0_10 = arith.constant 0 : index
    %10 = vector.load %arg5[%c0_9, %c0_10] : memref<1x32xf32, #tpu.memory_space<vmem>>, vector<1x32xf32>
    %11 = vector.broadcast %10 : vector<1x32xf32> to vector<8x32xf32>
    %12 = arith.addf %9, %11 : vector<8x32xf32>
    %cst_11 = arith.constant 0.000000e+00 : f32
    %13 = vector.broadcast %cst_11 : f32 to vector<8x32xf32>
    %14 = arith.maximumf %12, %13 : vector<8x32xf32>
    %c0_12 = arith.constant 0 : index
    %c0_13 = arith.constant 0 : index
    %15 = vector.load %arg6[%c0_12, %c0_13] : memref<32x4096xf32, #tpu.memory_space<vmem>>, vector<32x4096xf32>
    %cst_14 = arith.constant dense<0.000000e+00> : vector<8x4096xf32>
    %16 = tpu.matmul %14, %15, %cst_14 {dimension_numbers = #tpu.dot_dimension_numbers<[1], [0], [0], [1], [0, 0, 1, 1], [], []>} : vector<8x32xf32>, vector<32x4096xf32>, vector<8x4096xf32> -> vector<8x4096xf32>
    %c0_15 = arith.constant 0 : index
    %c0_16 = arith.constant 0 : index
    %17 = vector.load %arg7[%c0_15, %c0_16] : memref<1x4096xf32, #tpu.memory_space<vmem>>, vector<1x4096xf32>
    %18 = vector.broadcast %17 : vector<1x4096xf32> to vector<8x4096xf32>
    %19 = arith.addf %16, %18 : vector<8x4096xf32>
    %20 = arith.mulf %19, %19 : vector<8x4096xf32>
    %c0_17 = arith.constant 0 : index
    %c0_18 = arith.constant 0 : index
    %21 = vector.load %arg8[%c0_17, %c0_18] : memref<4096x4xf32, #tpu.memory_space<vmem>>, vector<4096x4xf32>
    %cst_19 = arith.constant dense<0.000000e+00> : vector<8x4xf32>
    %22 = tpu.matmul %20, %21, %cst_19 {dimension_numbers = #tpu.dot_dimension_numbers<[1], [0], [0], [1], [0, 0, 1, 1], [], []>} : vector<8x4096xf32>, vector<4096x4xf32>, vector<8x4xf32> -> vector<8x4xf32>
    %cst_20 = arith.constant 1.000000e-24 : f32
    %23 = vector.broadcast %cst_20 : f32 to vector<8x4xf32>
    %24 = arith.maximumf %22, %23 : vector<8x4xf32>
    %25 = math.rsqrt %24 : vector<8x4xf32>
    %c0_21 = arith.constant 0 : index
    %c0_22 = arith.constant 0 : index
    %26 = vector.load %arg10[%c0_21, %c0_22] : memref<4096x32xf32, #tpu.memory_space<vmem>>, vector<4096x32xf32>
    %cst_23 = arith.constant dense<0.000000e+00> : vector<8x32xf32>
    %27 = tpu.matmul %19, %26, %cst_23 {dimension_numbers = #tpu.dot_dimension_numbers<[1], [0], [0], [1], [0, 0, 1, 1], [], []>} : vector<8x4096xf32>, vector<4096x32xf32>, vector<8x32xf32> -> vector<8x32xf32>
    %c0_24 = arith.constant 0 : index
    %c0_25 = arith.constant 0 : index
    %28 = vector.load %arg9[%c0_24, %c0_25] : memref<4x32xf32, #tpu.memory_space<vmem>>, vector<4x32xf32>
    %cst_26 = arith.constant dense<0.000000e+00> : vector<8x32xf32>
    %29 = tpu.matmul %25, %28, %cst_26 {dimension_numbers = #tpu.dot_dimension_numbers<[1], [0], [0], [1], [0, 0, 1, 1], [], []>} : vector<8x4xf32>, vector<4x32xf32>, vector<8x32xf32> -> vector<8x32xf32>
    %30 = arith.mulf %27, %29 : vector<8x32xf32>
    %c0_27 = arith.constant 0 : index
    %c0_28 = arith.constant 0 : index
    %31 = vector.load %arg11[%c0_27, %c0_28] : memref<1x32xf32, #tpu.memory_space<vmem>>, vector<1x32xf32>
    %32 = vector.broadcast %31 : vector<1x32xf32> to vector<8x32xf32>
    %33 = arith.addf %30, %32 : vector<8x32xf32>
    %cst_29 = arith.constant 0.000000e+00 : f32
    %34 = vector.broadcast %cst_29 : f32 to vector<8x32xf32>
    %35 = arith.maximumf %33, %34 : vector<8x32xf32>
    %c0_30 = arith.constant 0 : index
    %c0_31 = arith.constant 0 : index
    %36 = vector.load %arg12[%c0_30, %c0_31] : memref<32x64xf32, #tpu.memory_space<vmem>>, vector<32x64xf32>
    %cst_32 = arith.constant dense<0.000000e+00> : vector<8x64xf32>
    %37 = tpu.matmul %35, %36, %cst_32 {dimension_numbers = #tpu.dot_dimension_numbers<[1], [0], [0], [1], [0, 0, 1, 1], [], []>} : vector<8x32xf32>, vector<32x64xf32>, vector<8x64xf32> -> vector<8x64xf32>
    %c0_33 = arith.constant 0 : index
    %c0_34 = arith.constant 0 : index
    %38 = vector.load %arg13[%c0_33, %c0_34] : memref<1x64xf32, #tpu.memory_space<vmem>>, vector<1x64xf32>
    %39 = vector.broadcast %38 : vector<1x64xf32> to vector<8x64xf32>
    %40 = arith.addf %37, %39 : vector<8x64xf32>
    %cst_35 = arith.constant 0.000000e+00 : f32
    %41 = vector.broadcast %cst_35 : f32 to vector<8x64xf32>
    %42 = arith.maximumf %40, %41 : vector<8x64xf32>
    %c0_36 = arith.constant 0 : index
    %c0_37 = arith.constant 0 : index
    %43 = vector.load %arg14[%c0_36, %c0_37] : memref<64x128xf32, #tpu.memory_space<vmem>>, vector<64x128xf32>
    %cst_38 = arith.constant dense<0.000000e+00> : vector<8x128xf32>
    %44 = tpu.matmul %42, %43, %cst_38 {dimension_numbers = #tpu.dot_dimension_numbers<[1], [0], [0], [1], [0, 0, 1, 1], [], []>} : vector<8x64xf32>, vector<64x128xf32>, vector<8x128xf32> -> vector<8x128xf32>
    %c0_39 = arith.constant 0 : index
    %c0_40 = arith.constant 0 : index
    %45 = vector.load %arg15[%c0_39, %c0_40] : memref<1x128xf32, #tpu.memory_space<vmem>>, vector<1x128xf32>
    %46 = vector.broadcast %45 : vector<1x128xf32> to vector<8x128xf32>
    %47 = arith.addf %44, %46 : vector<8x128xf32>
    %c0_41 = arith.constant 0 : index
    %c0_42 = arith.constant 0 : index
    %48 = vector.load %arg16[%c0_41, %c0_42] : memref<8x128xf32, #tpu.memory_space<vmem>>, vector<8x128xf32>
    tpu.vector_store %arg16[%c0_41, %c0_42], %47 {strides = array<i32>} : memref<8x128xf32, #tpu.memory_space<vmem>>, vector<8x128xf32>,
    return
  }
  func.func @transform_0(%arg0: i32) -> (i32, i32) {
    %c0_i32 = arith.constant 0 : i32
    %c0_i32_0 = arith.constant 0 : i32
    return %arg0, %c0_i32 : i32, i32
  }
  func.func @transform_1(%arg0: i32) -> (i32, i32) {
    %c0_i32 = arith.constant 0 : i32
    %c0_i32_0 = arith.constant 0 : i32
    %c0_i32_1 = arith.constant 0 : i32
    return %c0_i32, %c0_i32_0 : i32, i32
  }
  func.func @transform_2(%arg0: i32) -> (i32, i32) {
    %c0_i32 = arith.constant 0 : i32
    %c0_i32_0 = arith.constant 0 : i32
    %c0_i32_1 = arith.constant 0 : i32
    return %c0_i32, %c0_i32_0 : i32, i32
  }
  func.func @transform_3(%arg0: i32) -> (i32, i32) {
    %c0_i32 = arith.constant 0 : i32
    %c0_i32_0 = arith.constant 0 : i32
    %c0_i32_1 = arith.constant 0 : i32
    return %c0_i32, %c0_i32_0 : i32, i32
  }
  func.func @transform_4(%arg0: i32) -> (i32, i32) {
    %c0_i32 = arith.constant 0 : i32
    %c0_i32_0 = arith.constant 0 : i32
    %c0_i32_1 = arith.constant 0 : i32
    return %c0_i32, %c0_i32_0 : i32, i32
  }
  func.func @transform_5(%arg0: i32) -> (i32, i32) {
    %c0_i32 = arith.constant 0 : i32
    %c0_i32_0 = arith.constant 0 : i32
    %c0_i32_1 = arith.constant 0 : i32
    return %c0_i32, %c0_i32_0 : i32, i32
  }
  func.func @transform_6(%arg0: i32) -> (i32, i32) {
    %c0_i32 = arith.constant 0 : i32
    %c0_i32_0 = arith.constant 0 : i32
    %c0_i32_1 = arith.constant 0 : i32
    return %c0_i32, %c0_i32_0 : i32, i32
  }
  func.func @transform_7(%arg0: i32) -> (i32, i32) {
    %c0_i32 = arith.constant 0 : i32
    %c0_i32_0 = arith.constant 0 : i32
    %c0_i32_1 = arith.constant 0 : i32
    return %c0_i32, %c0_i32_0 : i32, i32
  }
  func.func @transform_8(%arg0: i32) -> (i32, i32) {
    %c0_i32 = arith.constant 0 : i32
    %c0_i32_0 = arith.constant 0 : i32
    %c0_i32_1 = arith.constant 0 : i32
    return %c0_i32, %c0_i32_0 : i32, i32
  }
  func.func @transform_9(%arg0: i32) -> (i32, i32) {
    %c0_i32 = arith.constant 0 : i32
    %c0_i32_0 = arith.constant 0 : i32
    %c0_i32_1 = arith.constant 0 : i32
    return %c0_i32, %c0_i32_0 : i32, i32
  }
  func.func @transform_10(%arg0: i32) -> (i32, i32) {
    %c0_i32 = arith.constant 0 : i32
    %c0_i32_0 = arith.constant 0 : i32
    %c0_i32_1 = arith.constant 0 : i32
    return %c0_i32, %c0_i32_0 : i32, i32
  }
  func.func @transform_11(%arg0: i32) -> (i32, i32) {
    %c0_i32 = arith.constant 0 : i32
    %c0_i32_0 = arith.constant 0 : i32
    %c0_i32_1 = arith.constant 0 : i32
    return %c0_i32, %c0_i32_0 : i32, i32
  }
  func.func @transform_12(%arg0: i32) -> (i32, i32) {
    %c0_i32 = arith.constant 0 : i32
    %c0_i32_0 = arith.constant 0 : i32
    %c0_i32_1 = arith.constant 0 : i32
    return %c0_i32, %c0_i32_0 : i32, i32
  }
  func.func @transform_13(%arg0: i32) -> (i32, i32) {
    %c0_i32 = arith.constant 0 : i32
    %c0_i32_0 = arith.constant 0 : i32
    %c0_i32_1 = arith.constant 0 : i32
    return %c0_i32, %c0_i32_0 : i32, i32
  }
  func.func @transform_14(%arg0: i32) -> (i32, i32) {
    %c0_i32 = arith.constant 0 : i32
    %c0_i32_0 = arith.constant 0 : i32
    %c0_i32_1 = arith.constant 0 : i32
    return %c0_i32, %c0_i32_0 : i32, i32
  }
  func.func @transform_15(%arg0: i32) -> (i32, i32) {
    %c0_i32 = arith.constant 0 : i32
    %c0_i32_0 = arith.constant 0 : i32
    return %arg0, %c0_i32 : i32, i32
  }
}

</mosaic_0001>

<bundles_post_ra>
// kernel: tpu_custom_call.1
= control target key start
LH: loop header
LB: loop body
LE: loop exit
PB: predicated region body
PF: predicated region fallthrough
CT: control target
= control target key end

     0   :  { %v7762_v3 = vmov 0.0|0.0   ;;  %vm7763_vm0 = vmmov 0   ;;  %v7764_v6 = vmov 0.0   ;;  %s11856_s0 = inlined_call_operand.vmem [shape: f32[8,128], index: 0, kind: input, shape index: {}]   ;;  %s11857_s1 = inlined_call_operand.vmem [shape: f32[128,64], index: 1, kind: input, shape index: {}]   ;;  %s11858_s2 = inlined_call_operand.vmem [shape: f32[1,64], index: 2, kind: input, shape index: {}]   ;;  %s11859_s3 = inlined_call_operand.vmem [shape: f32[64,32], index: 3, kind: input, shape index: {}]   ;;  %s11860_s4 = inlined_call_operand.vmem [shape: f32[1,32], index: 4, kind: input, shape index: {}]   ;;  %s11861_s5 = inlined_call_operand.vmem [shape: f32[32,4096], index: 5, kind: input, shape index: {}]   ;;  %s11862_s6 = inlined_call_operand.vmem [shape: f32[1,4096], index: 6, kind: input, shape index: {}]   ;;  %s11863_s7 = inlined_call_operand.vmem [shape: f32[4096,4], index: 7, kind: input, shape index: {}]   ;;  %s11864_s8 = inlined_call_operand.vmem [shape: f32[4,32], index: 8, kind: input, shape index: {}]   ;;  %s11865_s9 = inlined_call_operand.vmem [shape: f32[4096,32], index: 9, kind: input, shape index: {}]   ;;  %s11866_s10 = inlined_call_operand.vmem [shape: f32[1,32], index: 10, kind: input, shape index: {}]   ;;  %s11867_s11 = inlined_call_operand.vmem [shape: f32[32,64], index: 11, kind: input, shape index: {}]   ;;  %s11868_s12 = inlined_call_operand.vmem [shape: f32[1,64], index: 12, kind: input, shape index: {}]   ;;  %s11869_s13 = inlined_call_operand.vmem [shape: f32[64,128], index: 13, kind: input, shape index: {}]   ;;  %s11870_s14 = inlined_call_operand.vmem [shape: f32[1,128], index: 14, kind: input, shape index: {}]   ;;  %s11871_s15 = inlined_call_operand.hbm [shape: f32[8,128], index: 15, kind: output, shape index: {}]  }
   0x1   :  { %v52_v0 = vld [vmem:[%s11857_s1] sm:$0xff]  ;;  %v53_v1 = vld [vmem:[%s11857_s1 + $0x8] sm:$0xff]  ;;  %v54_v2 = vld [vmem:[%s11857_s1 + $0x10] sm:$0xff]  ;;  %6524 = vmatprep.subr.bf16.mxu0 %v7762_v3  ;;  %6467 = vmatprep.mubr.msk.f32.mxu0 %vm7763_vm0, %v7764_v6 }
   0x2   :  { %v6525_v4 = vpack.c.bf16 %v53_v1, %v52_v0  ;;  %v55_v5 = vld [vmem:[%s11857_s1 + $0x18] sm:$0xff]  ;;  %6548 = vmatprep.subr.bf16.mxu1 %v7762_v3  ;;  %6486 = vmatprep.mubr.msk.f32.mxu1 %vm7763_vm0, %v7764_v6  ;;  %v56_v8 = vld [vmem:[%s11857_s1 + $0x20] sm:$0xff]  ;;  %v57_v9 = vld [vmem:[%s11857_s1 + $0x28] sm:$0xff] }
   0x3   :  { %v6528_v7 = vpack.c.bf16 %v55_v5, %v54_v2  ;;  %v146_v10 = vld [vmem:[%s11859_s3] sm:$0xff]  ;;  %v147_v11 = vld [vmem:[%s11859_s3 + $0x8] sm:$0xff]  ;;  %v148_v12 = vld [vmem:[%s11859_s3 + $0x10] sm:$0xff]  ;;  %v6531_v14 = vpack.c.bf16 %v57_v9, %v56_v8 }
   0x4   :  { %6526 = vmatpush3.bf16.msra.mxu0 %v6525_v4  ;;  %v149_v13 = vld [vmem:[%s11859_s3 + $0x18] sm:$0xff]  ;;  %v6549_v15 = vpack.c.bf16 %v147_v11, %v146_v10  ;;  %v58_v16 = vld [vmem:[%s11857_s1 + $0x30] sm:$0xff] }
   0x5   :  { %6527 = vmatprep.subr.bf16.mxu0 %v7762_v3  ;;  %v59_v17 = vld [vmem:[%s11857_s1 + $0x38] sm:$0xff] }
   0x8   :  { %6529 = vmatpush3.bf16.msra.mxu0 %v6528_v7 }
   0x9   :  { %6530 = vmatprep.subr.bf16.mxu0 %v7762_v3 }
   0xa   :  { %20 = vsyncpa [#allocation3], 0  ;;  %6550 = vmatpush3.bf16.msra.mxu1 %v6549_v15  ;;  %v6552_v18 = vpack.c.bf16 %v149_v13, %v148_v12  ;;  %v150_v19 = vld [vmem:[%s11859_s3 + $0x20] sm:$0xff]  ;;  %v151_v20 = vld [vmem:[%s11859_s3 + $0x28] sm:$0xff]  ;;  %v6534_v21 = vpack.c.bf16 %v59_v17, %v58_v16  ;;  %vm161_vm1 = vcmask 523264   ;;  %vm532_vm2 = vcmask 261120  }
   0xb   :  { %6551 = vmatprep.subr.bf16.mxu1 %v7762_v3  ;;  %v60_v22 = vld [vmem:[%s11857_s1 + $0x40] sm:$0xff]  ;;  %v61_v23 = vld [vmem:[%s11857_s1 + $0x48] sm:$0xff]  ;;  %v6555_v24 = vpack.c.bf16 %v151_v20, %v150_v19  ;;  %v62_v26 = vld [vmem:[%s11857_s1 + $0x50] sm:$0xff]  ;;  %vm4975_vm3 = vcmask 1043456   ;;  %vm4971_vm4 = vcmask 31744  }
   0xc   :  { %6532 = vmatpush3.bf16.msra.mxu0 %v6531_v14  ;;  %v6537_v25 = vpack.c.bf16 %v61_v23, %v60_v22  ;;  %v63_v27 = vld [vmem:[%s11857_s1 + $0x58] sm:$0xff]  ;;  %v64_v29 = vld [vmem:[%s11857_s1 + $0x60] sm:$0xff]  ;;  %v65_v30 = vld [vmem:[%s11857_s1 + $0x68] sm:$0xff] }
   0xd   :  { %6533 = vmatprep.subr.bf16.mxu0 %v7762_v3  ;;  %v6540_v28 = vpack.c.bf16 %v63_v27, %v62_v26  ;;  %v6543_v31 = vpack.c.bf16 %v65_v30, %v64_v29  ;;  %v66_v32 = vld [vmem:[%s11857_s1 + $0x70] sm:$0xff]  ;;  %v67_v33 = vld [vmem:[%s11857_s1 + $0x78] sm:$0xff]  ;;  %v51_v35 = vld [vmem:[%s11856_s0] sm:$0xff] }
   0xe   :  { %6553 = vmatpush3.bf16.msra.mxu1 %v6552_v18  ;;  %v6546_v34 = vpack.c.bf16 %v67_v33, %v66_v32  ;;  %v152_v36 = vld [vmem:[%s11859_s3 + $0x30] sm:$0xff]  ;;  %v153_v37 = vld [vmem:[%s11859_s3 + $0x38] sm:$0xff]  ;;  %v237_v39 = vld [vmem:[%s11861_s5 + $0x8] sm:$0xff] }
   0xf   :  { %6554 = vmatprep.subr.bf16.mxu1 %v7762_v3  ;;  %v6558_v38 = vpack.c.bf16 %v153_v37, %v152_v36  ;;  %v269_v40 = vld [vmem:[%s11861_s5 + $0x108] sm:$0xff]  ;;  %v244_v45 = vld [vmem:[%s11861_s5 + $0x40] sm:$0xff]  ;;  %v239_v5 = vld [vmem:[%s11861_s5 + $0x18] sm:$0xff] }
  0x10   :  { %6535 = vmatpush3.bf16.msra.mxu0 %v6534_v21  ;;  %v245_v41 = vld [vmem:[%s11861_s5 + $0x48] sm:$0xff]  ;;  %v6560_v42 = vpack.c.bf16 %v269_v40, %v237_v39  ;;  %v276_v46 = vld [vmem:[%s11861_s5 + $0x140] sm:$0xff]  ;;  %v271_v7 = vld [vmem:[%s11861_s5 + $0x118] sm:$0xff] }
  0x11   :  { %6536 = vmatprep.subr.bf16.mxu0 %v7762_v3  ;;  %v277_v43 = vld [vmem:[%s11861_s5 + $0x148] sm:$0xff]  ;;  %v6594_v47 = vpack.c.bf16 %v276_v46, %v244_v45  ;;  %v5247_v48 = vld [vmem:[%s11858_s2] ss:$0 sm:$0xff]  ;;  %v6568_v9 = vpack.c.bf16 %v271_v7, %v239_v5  ;;  %v238_v13 = vld [vmem:[%s11861_s5 + $0x10] sm:$0xff]  ;;  %s7765_s2 = smov [#allocation2]  }
  0x12   :  { %6556 = vmatpush3.bf16.msra.mxu1 %v6555_v24  ;;  %v6592_v44 = vpack.c.bf16 %v277_v43, %v245_v41  ;;  %v236_v49 = vld [vmem:[%s11861_s5] sm:$0xff]  ;;  %v301_v56 = vld [vmem:[%s11861_s5 + $0x208] sm:$0xff]  ;;  %v270_v14 = vld [vmem:[%s11861_s5 + $0x110] sm:$0xff] }
  0x13   :  { %6557 = vmatprep.subr.bf16.mxu1 %v7762_v3  ;;  %v268_v50 = vld [vmem:[%s11861_s5 + $0x100] sm:$0xff]  ;;  %v333_v57 = vld [vmem:[%s11861_s5 + $0x308] sm:$0xff]  ;;  %v303_v17 = vld [vmem:[%s11861_s5 + $0x218] sm:$0xff]  ;;  %v6570_v24 = vpack.c.bf16 %v270_v14, %v238_v13 }
  0x14   :  { %6538 = vmatpush3.bf16.msra.mxu0 %v6537_v25  ;;  %v6562_v54 = vpack.c.bf16 %v268_v50, %v236_v49  ;;  %v309_v58 = vld [vmem:[%s11861_s5 + $0x248] sm:$0xff]  ;;  %v6564_v59 = vpack.c.bf16 %v333_v57, %v301_v56  ;;  %v300_v61 = vld [vmem:[%s11861_s5 + $0x200] sm:$0xff]  ;;  %v335_v19 = vld [vmem:[%s11861_s5 + $0x318] sm:$0xff] }
  0x15   :  { %6539 = vmatprep.subr.bf16.mxu0 %v7762_v3  ;;  %v341_v60 = vld [vmem:[%s11861_s5 + $0x348] sm:$0xff]  ;;  %v332_v62 = vld [vmem:[%s11861_s5 + $0x300] sm:$0xff]  ;;  %v302_v26 = vld [vmem:[%s11861_s5 + $0x210] sm:$0xff]  ;;  %v6572_v29 = vpack.c.bf16 %v335_v19, %v303_v17 }
  0x16   :  { %6559 = vmatpush3.bf16.msra.mxu1 %v6558_v38  ;;  %v6596_v63 = vpack.c.bf16 %v341_v60, %v309_v58  ;;  %v6566_v0 = vpack.c.bf16 %v332_v62, %v300_v61  ;;  %v308_v1 = vld [vmem:[%s11861_s5 + $0x240] sm:$0xff]  ;;  %v249_v8 = vld [vmem:[%s11861_s5 + $0x68] sm:$0xff]  ;;  %v334_v27 = vld [vmem:[%s11861_s5 + $0x310] sm:$0xff] }
  0x17   :  { %6561 = vmatprep.subr.bf16.mxu1 %v6560_v42  ;;  %v340_v2 = vld [vmem:[%s11861_s5 + $0x340] sm:$0xff]  ;;  %v281_v10 = vld [vmem:[%s11861_s5 + $0x168] sm:$0xff]  ;;  %v6574_v37 = vpack.c.bf16 %v334_v27, %v302_v26  ;;  %v243_v57 = vld [vmem:[%s11861_s5 + $0x38] sm:$0xff] }
  0x18   :  { %6541 = vmatpush3.bf16.msra.mxu0 %v6540_v28  ;;  %v6598_v4 = vpack.c.bf16 %v340_v2, %v308_v1  ;;  %v6608_v11 = vpack.c.bf16 %v281_v10, %v249_v8  ;;  %v5248_v12 = vld [vmem:[%s11860_s4] ss:$0 sm:$0xff]  ;;  %v313_v20 = vld [vmem:[%s11861_s5 + $0x268] sm:$0xff]  ;;  %v275_v58 = vld [vmem:[%s11861_s5 + $0x138] sm:$0xff] }
  0x19   :  { %6542 = vmatprep.subr.bf16.mxu0 %v7762_v3  ;;  %v248_v15 = vld [vmem:[%s11861_s5 + $0x60] sm:$0xff]  ;;  %v345_v21 = vld [vmem:[%s11861_s5 + $0x368] sm:$0xff]  ;;  %v6584_v1 = vpack.c.bf16 %v275_v58, %v243_v57  ;;  %v307_v7 = vld [vmem:[%s11861_s5 + $0x238] sm:$0xff] }
  0x1a   :  { %v280_v16 = vld [vmem:[%s11861_s5 + $0x160] sm:$0xff]  ;;  %v6612_v30 = vpack.c.bf16 %v345_v21, %v313_v20  ;;  %v241_v33 = vld [vmem:[%s11861_s5 + $0x28] sm:$0xff]  ;;  %v339_v8 = vld [vmem:[%s11861_s5 + $0x338] sm:$0xff] }
  0x1b   :  { %v6610_v25 = vpack.c.bf16 %v280_v16, %v248_v15  ;;  %v344_v32 = vld [vmem:[%s11861_s5 + $0x360] sm:$0xff]  ;;  %v285_v36 = vld [vmem:[%s11861_s5 + $0x188] sm:$0xff]  ;;  %v306_v13 = vld [vmem:[%s11861_s5 + $0x230] sm:$0xff]  ;;  %v6588_v15 = vpack.c.bf16 %v339_v8, %v307_v7 }
  0x1c   :  { %6544 = vmatpush3.bf16.msra.mxu0 %v6543_v31  ;;  %v312_v31 = vld [vmem:[%s11861_s5 + $0x260] sm:$0xff]  ;;  %v305_v45 = vld [vmem:[%s11861_s5 + $0x228] sm:$0xff]  ;;  %v338_v14 = vld [vmem:[%s11861_s5 + $0x330] sm:$0xff] }
  0x1d   :  { %6545 = vmatprep.subr.bf16.mxu0 %v7762_v3  ;;  %v6614_v38 = vpack.c.bf16 %v344_v32, %v312_v31  ;;  %v240_v39 = vld [vmem:[%s11861_s5 + $0x20] sm:$0xff]  ;;  %v337_v46 = vld [vmem:[%s11861_s5 + $0x328] sm:$0xff]  ;;  %v247_v19 = vld [vmem:[%s11861_s5 + $0x58] sm:$0xff] }
  0x1e   :  { %v272_v40 = vld [vmem:[%s11861_s5 + $0x120] sm:$0xff]  ;;  %v289_v60 = vld [vmem:[%s11861_s5 + $0x1a8] sm:$0xff]  ;;  %v279_v20 = vld [vmem:[%s11861_s5 + $0x158] sm:$0xff] }
  0x1f   :  { %v252_v43 = vld [vmem:[%s11861_s5 + $0x80] sm:$0xff]  ;;  %v6578_v49 = vpack.c.bf16 %v272_v40, %v240_v39  ;;  %v353_v10 = vld [vmem:[%s11861_s5 + $0x3a8] sm:$0xff]  ;;  %v278_v26 = vld [vmem:[%s11861_s5 + $0x150] sm:$0xff]  ;;  %v6600_v27 = vpack.c.bf16 %v279_v20, %v247_v19 }
  0x20   :  { %6547 = vmatpush3.bf16.msra.mxu0 %v6546_v34  ;;  %v273_v34 = vld [vmem:[%s11861_s5 + $0x128] sm:$0xff]  ;;  %v348_v56 = vld [vmem:[%s11861_s5 + $0x380] sm:$0xff]  ;;  %v311_v32 = vld [vmem:[%s11861_s5 + $0x258] sm:$0xff] }
  0x21   :  { %6593 = vmatprep.subr.bf16.mxu0 %v6592_v44  ;;  %v6576_v41 = vpack.c.bf16 %v273_v34, %v241_v33  ;;  %v284_v44 = vld [vmem:[%s11861_s5 + $0x180] sm:$0xff]  ;;  %v261_v21 = vld [vmem:[%s11861_s5 + $0xc8] sm:$0xff]  ;;  %v343_v33 = vld [vmem:[%s11861_s5 + $0x358] sm:$0xff] }
  0x22   :  { %v6626_v50 = vpack.c.bf16 %v284_v44, %v252_v43  ;;  %v288_v5 = vld [vmem:[%s11861_s5 + $0x1a0] sm:$0xff]  ;;  %v325_v34 = vld [vmem:[%s11861_s5 + $0x2c8] sm:$0xff]  ;;  %v342_v39 = vld [vmem:[%s11861_s5 + $0x350] sm:$0xff]  ;;  %v6604_v40 = vpack.c.bf16 %v343_v33, %v311_v32 }
  0x23   :  { %6468 = vmatmul.mubr.f32.vlgmr.msra.gmra.mrb[0].mxu0 %v51_v35  ;;  %v253_v35 = vld [vmem:[%s11861_s5 + $0x88] sm:$0xff]  ;;  %v320_v17 = vld [vmem:[%s11861_s5 + $0x2a0] sm:$0xff]  ;;  %v251_v44 = vld [vmem:[%s11861_s5 + $0x78] sm:$0xff] }
  0x24   :  { %884 = vmatprep.mubr.f32.mxu0 %v7764_v6  ;;  %6595 = vmatpush1.bf16.msra.mxu0 %v6594_v47  ;;  %v6624_v42 = vpack.c.bf16 %v285_v36, %v253_v35  ;;  %v317_v47 = vld [vmem:[%s11861_s5 + $0x288] sm:$0xff]  ;;  %v292_v31 = vld [vmem:[%s11861_s5 + $0x1c0] sm:$0xff]  ;;  %v347_v57 = vld [vmem:[%s11861_s5 + $0x378] sm:$0xff] }
  0x25   :  { %6597 = vmatprep.subr.bf16.mxu0 %v6596_v63  ;;  %v242_v63 = vld [vmem:[%s11861_s5 + $0x30] sm:$0xff]  ;;  %v357_v35 = vld [vmem:[%s11861_s5 + $0x3c8] sm:$0xff]  ;;  %v356_v43 = vld [vmem:[%s11861_s5 + $0x3c0] sm:$0xff] }
  0x26   :  { %v329_v58 = vld [vmem:[%s11861_s5 + $0x2e8] sm:$0xff]  ;;  %v287_v7 = vld [vmem:[%s11861_s5 + $0x198] sm:$0xff]  ;;  %v1720_v8 = vld [vmem:[%s11863_s7 + $0x80] sm:$0xff] }
  0x27   :  { %v1705_v19 = vld [vmem:[%s11863_s7 + $0x8] sm:$0xff]  ;;  %v1722_v20 = vld [vmem:[%s11863_s7 + $0x90] sm:$0xff]  ;;  %v1707_v32 = vld [vmem:[%s11863_s7 + $0x18] sm:$0xff] }
  0x28   :  { %6599 = vmatpush1.bf16.msra.mxu0 %v6598_v4  ;;  %v256_v4 = vld [vmem:[%s11861_s5 + $0xa0] sm:$0xff] }
  0x29   :  { %6609 = vmatprep.subr.bf16.mxu0 %v6608_v11  ;;  %v1724_v33 = vld [vmem:[%s11863_s7 + $0xa0] sm:$0xff] }
  0xf6   :  { %v141_v51 = vpop.f32.mrb[0].mxu0 }
  0xf7   :  { %v142_v52 = vadd.f32 %v5247_v48, %v141_v51  ;;  %v6469_v53 = vpop.f32.mrb[1].mxu0  ;;  %v349_v48 = vld [vmem:[%s11861_s5 + $0x388] sm:$0xff]  ;;  %v304_v51 = vld [vmem:[%s11861_s5 + $0x220] sm:$0xff] }
  0xf8   :  { %v6580_v53 = vpack.c.bf16 %v337_v46, %v305_v45  ;;  %v283_v45 = vld [vmem:[%s11861_s5 + $0x178] sm:$0xff]  ;;  %v265_v46 = vld [vmem:[%s11861_s5 + $0xe8] sm:$0xff] }
  0xf9   :  { %v145_v55 = vmax.f32 %v142_v52, 0.0  ;;  %v336_v52 = vld [vmem:[%s11861_s5 + $0x320] sm:$0xff] }
  0xfa   :  { %v6582_v61 = vpack.c.bf16 %v336_v52, %v304_v51  ;;  %v282_v51 = vld [vmem:[%s11861_s5 + $0x170] sm:$0xff]  ;;  %v6616_v52 = vpack.c.bf16 %v283_v45, %v251_v44  ;;  %v1709_v44 = vld [vmem:[%s11863_s7 + $0x28] sm:$0xff] }
  0xfb   :  { %6487 = vmatmul.mubr.msk.f32.vlgmr.msra.gmra.mrb[0].mxu1 %vm161_vm1, %v145_v55  ;;  %v316_v55 = vld [vmem:[%s11861_s5 + $0x280] sm:$0xff]  ;;  %v1726_v45 = vld [vmem:[%s11863_s7 + $0xb0] sm:$0xff] }
  0xfc   :  { %6563 = vmatpush1.bf16.msra.mxu1 %v6562_v54  ;;  %600 = vmatprep.mubr.f32.mxu1 %v7764_v6  ;;  %v6628_v54 = vpack.c.bf16 %v349_v48, %v317_v47  ;;  %v6630_v62 = vpack.c.bf16 %v348_v56, %v316_v55  ;;  %v297_v47 = vld [vmem:[%s11861_s5 + $0x1e8] sm:$0xff]  ;;  %v296_v55 = vld [vmem:[%s11861_s5 + $0x1e0] sm:$0xff]  ;;  %v315_v56 = vld [vmem:[%s11861_s5 + $0x278] sm:$0xff] }
  0xfd   :  { %6565 = vmatprep.subr.bf16.mxu1 %v6564_v59  ;;  %v257_v59 = vld [vmem:[%s11861_s5 + $0xa8] sm:$0xff] }
  0xfe   :  { %v6640_v2 = vpack.c.bf16 %v289_v60, %v257_v59  ;;  %v361_v59 = vld [vmem:[%s11861_s5 + $0x3e8] sm:$0xff] }
 0x100   :  { %6567 = vmatpush1.bf16.msra.mxu1 %v6566_v0  ;;  %v274_v0 = vld [vmem:[%s11861_s5 + $0x130] sm:$0xff] }
 0x101   :  { %6569 = vmatprep.subr.bf16.mxu1 %v6568_v9  ;;  %v321_v9 = vld [vmem:[%s11861_s5 + $0x2a8] sm:$0xff]  ;;  %v6586_v11 = vpack.c.bf16 %v274_v0, %v242_v63  ;;  %v346_v63 = vld [vmem:[%s11861_s5 + $0x370] sm:$0xff]  ;;  %v6620_v0 = vpack.c.bf16 %v347_v57, %v315_v56  ;;  %v1711_v56 = vld [vmem:[%s11863_s7 + $0x38] sm:$0xff] }
 0x102   :  { %v6644_v16 = vpack.c.bf16 %v353_v10, %v321_v9  ;;  %v1721_v9 = vld [vmem:[%s11863_s7 + $0x88] sm:$0xff]  ;;  %v1728_v57 = vld [vmem:[%s11863_s7 + $0xc0] sm:$0xff] }
 0x1ce   :  { %v231_v18 = vpop.f32.mrb[0].mxu1 }
 0x1cf   :  { %v232_v22 = vadd.f32 %v5248_v12, %v231_v18  ;;  %v6488_v23 = vpop.f32.mrb[1].mxu1  ;;  %v6642_v12 = vpack.c.bf16 %v288_v5, %v256_v4  ;;  %v352_v18 = vld [vmem:[%s11861_s5 + $0x3a0] sm:$0xff]  ;;  %v255_v5 = vld [vmem:[%s11861_s5 + $0x98] sm:$0xff] }
 0x1d0   :  { %v6590_v23 = vpack.c.bf16 %v338_v14, %v306_v13  ;;  %v360_v4 = vld [vmem:[%s11861_s5 + $0x3e0] sm:$0xff]  ;;  %v254_v13 = vld [vmem:[%s11861_s5 + $0x90] sm:$0xff] }
 0x1d1   :  { %v8036_v28 = vmax.f32 %v232_v22, 0.0  ;;  %v293_v22 = vld [vmem:[%s11861_s5 + $0x1c8] sm:$0xff]  ;;  %v286_v14 = vld [vmem:[%s11861_s5 + $0x190] sm:$0xff] }
 0x1d3   :  { %5250 = vmatmul.mubr.msk.f32.vlgmr.msra.gmra.mrb[2].mxu1 %vm532_vm2, %v8036_v28  ;;  %5254 = vmatmul.mubr.msk.f32.vlgmr.msra.gmra.mrb[2].mxu0 %vm532_vm2, %v8036_v28 }
 0x1d4   :  { %6571 = vmatpush1.bf16.msra.mxu1 %v6570_v24  ;;  %6611 = vmatpush1.bf16.msra.mxu0 %v6610_v25  ;;  %v6646_v24 = vpack.c.bf16 %v352_v18, %v320_v17  ;;  %v246_v25 = vld [vmem:[%s11861_s5 + $0x50] sm:$0xff]  ;;  %v351_v17 = vld [vmem:[%s11861_s5 + $0x398] sm:$0xff]  ;;  %v1704_v18 = vld [vmem:[%s11863_s7] sm:$0xff] }
 0x1d5   :  { %6573 = vmatprep.subr.bf16.mxu1 %v6572_v29  ;;  %6613 = vmatprep.subr.bf16.mxu0 %v6612_v30  ;;  %v6656_v29 = vpack.c.bf16 %v293_v22, %v261_v21  ;;  %v260_v30 = vld [vmem:[%s11861_s5 + $0xc0] sm:$0xff]  ;;  %v6602_v36 = vpack.c.bf16 %v278_v26, %v246_v25  ;;  %v1723_v21 = vld [vmem:[%s11863_s7 + $0x98] sm:$0xff]  ;;  %v6634_v22 = vpack.c.bf16 %v286_v14, %v254_v13  ;;  %v350_v25 = vld [vmem:[%s11861_s5 + $0x390] sm:$0xff] }
 0x1d6   :  { %671 = vmatprep.mubr.f32.mxu1 %v7764_v6  ;;  %1026 = vmatprep.mubr.f32.mxu0 %v7764_v6  ;;  %v259_v26 = vld [vmem:[%s11861_s5 + $0xb8] sm:$0xff] }
 0x1d7   :  { %v267_v13 = vld [vmem:[%s11861_s5 + $0xf8] sm:$0xff] }
 0x1d8   :  { %6575 = vmatpush1.bf16.msra.mxu1 %v6574_v37  ;;  %6615 = vmatpush1.bf16.msra.mxu0 %v6614_v38  ;;  %v6658_v37 = vpack.c.bf16 %v292_v31, %v260_v30  ;;  %v310_v38 = vld [vmem:[%s11861_s5 + $0x250] sm:$0xff]  ;;  %v6692_v30 = vpack.c.bf16 %v1723_v21, %v1722_v20  ;;  %v1733_v20 = vld [vmem:[%s11863_s7 + $0xe8] sm:$0xff] }
 0x1d9   :  { %6577 = vmatprep.subr.bf16.mxu1 %v6576_v41  ;;  %6625 = vmatprep.subr.bf16.mxu0 %v6624_v42  ;;  %v6660_v41 = vpack.c.bf16 %v357_v35, %v325_v34  ;;  %v324_v42 = vld [vmem:[%s11861_s5 + $0x2c0] sm:$0xff]  ;;  %v6606_v48 = vpack.c.bf16 %v342_v39, %v310_v38  ;;  %v1706_v31 = vld [vmem:[%s11863_s7 + $0x10] sm:$0xff]  ;;  %v1725_v34 = vld [vmem:[%s11863_s7 + $0xa8] sm:$0xff] }
 0x1da   :  { %v290_v38 = vld [vmem:[%s11861_s5 + $0x1b0] sm:$0xff]  ;;  %v323_v39 = vld [vmem:[%s11861_s5 + $0x2b8] sm:$0xff] }
 0x1db   :  { %5251 = vmatmul.mubr.msk.f32.vlgmr.msra.gmra.mrb[4].mxu1 %vm532_vm2, %v8036_v28  ;;  %5256 = vmatmul.mubr.msk.f32.vlgmr.msra.gmra.mrb[4].mxu0 %vm532_vm2, %v8036_v28 }
 0x1dc   :  { %6579 = vmatpush1.bf16.msra.mxu1 %v6578_v49  ;;  %6627 = vmatpush1.bf16.msra.mxu0 %v6626_v50  ;;  %v6662_v49 = vpack.c.bf16 %v356_v43, %v324_v42  ;;  %v250_v50 = vld [vmem:[%s11861_s5 + $0x70] sm:$0xff]  ;;  %v6696_v42 = vpack.c.bf16 %v1725_v34, %v1724_v33  ;;  %v1708_v43 = vld [vmem:[%s11863_s7 + $0x20] sm:$0xff] }
 0x1dd   :  { %6581 = vmatprep.subr.bf16.mxu1 %v6580_v53  ;;  %6629 = vmatprep.subr.bf16.mxu0 %v6628_v54  ;;  %v6672_v53 = vpack.c.bf16 %v297_v47, %v265_v46  ;;  %v264_v54 = vld [vmem:[%s11861_s5 + $0xe0] sm:$0xff]  ;;  %v6618_v60 = vpack.c.bf16 %v282_v51, %v250_v50  ;;  %v1727_v46 = vld [vmem:[%s11863_s7 + $0xb8] sm:$0xff]  ;;  %v354_v50 = vld [vmem:[%s11861_s5 + $0x3b0] sm:$0xff] }
 0x1de   :  { %742 = vmatprep.mubr.f32.mxu1 %v7764_v6  ;;  %1168 = vmatprep.mubr.f32.mxu0 %v7764_v6  ;;  %v263_v51 = vld [vmem:[%s11861_s5 + $0xd8] sm:$0xff]  ;;  %v330_v34 = vld [vmem:[%s11861_s5 + $0x2f0] sm:$0xff] }
 0x1e0   :  { %6583 = vmatpush1.bf16.msra.mxu1 %v6582_v61  ;;  %6631 = vmatpush1.bf16.msra.mxu0 %v6630_v62  ;;  %v6674_v61 = vpack.c.bf16 %v296_v55, %v264_v54  ;;  %v314_v62 = vld [vmem:[%s11861_s5 + $0x270] sm:$0xff]  ;;  %v6700_v54 = vpack.c.bf16 %v1727_v46, %v1726_v45 }
 0x1e1   :  { %6585 = vmatprep.subr.bf16.mxu1 %v6584_v1  ;;  %6641 = vmatprep.subr.bf16.mxu0 %v6640_v2  ;;  %v6676_v1 = vpack.c.bf16 %v361_v59, %v329_v58  ;;  %v328_v2 = vld [vmem:[%s11861_s5 + $0x2e0] sm:$0xff]  ;;  %v6622_v10 = vpack.c.bf16 %v346_v63, %v314_v62  ;;  %v1710_v55 = vld [vmem:[%s11863_s7 + $0x30] sm:$0xff]  ;;  %v1729_v58 = vld [vmem:[%s11863_s7 + $0xc8] sm:$0xff] }
 0x1e2   :  { %v294_v62 = vld [vmem:[%s11861_s5 + $0x1d0] sm:$0xff]  ;;  %v327_v63 = vld [vmem:[%s11861_s5 + $0x2d8] sm:$0xff] }
 0x1e3   :  { %5252 = vmatmul.mubr.msk.f32.vlgmr.msra.gmra.mrb[6].mxu1 %vm532_vm2, %v8036_v28  ;;  %5258 = vmatmul.mubr.msk.f32.vlgmr.msra.gmra.mrb[6].mxu0 %vm532_vm2, %v8036_v28 }
 0x1e4   :  { %6587 = vmatpush1.bf16.msra.mxu1 %v6586_v11  ;;  %6643 = vmatpush1.bf16.msra.mxu0 %v6642_v12  ;;  %v6678_v11 = vpack.c.bf16 %v360_v4, %v328_v2  ;;  %v6632_v12 = vpack.c.bf16 %v287_v7, %v255_v5  ;;  %v6704_v2 = vpack.c.bf16 %v1729_v58, %v1728_v57  ;;  %v1712_v4 = vld [vmem:[%s11863_s7 + $0x40] sm:$0xff]  ;;  %v1713_v5 = vld [vmem:[%s11863_s7 + $0x48] sm:$0xff]  ;;  %v1730_v7 = vld [vmem:[%s11863_s7 + $0xd0] sm:$0xff] }
 0x1e5   :  { %6589 = vmatprep.subr.bf16.mxu1 %v6588_v15  ;;  %6645 = vmatprep.subr.bf16.mxu0 %v6644_v16  ;;  %v319_v15 = vld [vmem:[%s11861_s5 + $0x298] sm:$0xff]  ;;  %v6688_v16 = vpack.c.bf16 %v1721_v9, %v1720_v8  ;;  %v6706_v14 = vpack.c.bf16 %v1713_v5, %v1712_v4  ;;  %v1742_v58 = vld [vmem:[%s11863_s7 + $0x130] sm:$0xff] }
 0x1e6   :  { %813 = vmatprep.mubr.f32.mxu1 %v7764_v6  ;;  %1310 = vmatprep.mubr.f32.mxu0 %v7764_v6  ;;  %v1731_v8 = vld [vmem:[%s11863_s7 + $0xd8] sm:$0xff]  ;;  %v1734_v5 = vld [vmem:[%s11863_s7 + $0xf0] sm:$0xff] }
 0x1e7   :  { %v1763_v4 = vld [vmem:[%s11863_s7 + $0x1d8] sm:$0xff] }
 0x1e8   :  { %6591 = vmatpush1.bf16.msra.mxu1 %v6590_v23  ;;  %6647 = vmatpush1.bf16.msra.mxu0 %v6646_v24  ;;  %v6636_v23 = vpack.c.bf16 %v351_v17, %v319_v15  ;;  %v318_v24 = vld [vmem:[%s11861_s5 + $0x290] sm:$0xff]  ;;  %v299_v15 = vld [vmem:[%s11861_s5 + $0x1f8] sm:$0xff] }
 0x1e9   :  { %6601 = vmatprep.subr.bf16.mxu1 %v6600_v27  ;;  %6657 = vmatprep.subr.bf16.mxu0 %v6656_v29  ;;  %v6690_v27 = vpack.c.bf16 %v1705_v19, %v1704_v18  ;;  %v291_v29 = vld [vmem:[%s11861_s5 + $0x1b8] sm:$0xff]  ;;  %v6638_v35 = vpack.c.bf16 %v350_v25, %v318_v24  ;;  %v1714_v17 = vld [vmem:[%s11863_s7 + $0x50] sm:$0xff]  ;;  %v1732_v19 = vld [vmem:[%s11863_s7 + $0xe0] sm:$0xff] }
 0x1ea   :  { %v1715_v18 = vld [vmem:[%s11863_s7 + $0x58] sm:$0xff]  ;;  %v298_v24 = vld [vmem:[%s11861_s5 + $0x1f0] sm:$0xff] }
 0x1eb   :  { %5253 = vmatmul.mubr.msk.f32.vlgmr.msra.gmra.mrb[8].mxu1 %vm532_vm2, %v8036_v28  ;;  %5260 = vmatmul.mubr.msk.f32.vlgmr.msra.gmra.mrb[8].mxu0 %vm532_vm2, %v8036_v28  ;;  %v331_v25 = vld [vmem:[%s11861_s5 + $0x2f8] sm:$0xff] }
 0x1ec   :  { %6603 = vmatpush1.bf16.msra.mxu1 %v6602_v36  ;;  %6659 = vmatpush1.bf16.msra.mxu0 %v6658_v37  ;;  %v6648_v36 = vpack.c.bf16 %v291_v29, %v259_v26  ;;  %v258_v37 = vld [vmem:[%s11861_s5 + $0xb0] sm:$0xff]  ;;  %v6710_v26 = vpack.c.bf16 %v1715_v18, %v1714_v17  ;;  %v6712_v29 = vpack.c.bf16 %v1733_v20, %v1732_v19  ;;  %v1765_v17 = vld [vmem:[%s11863_s7 + $0x1e8] sm:$0xff]  ;;  %v1784_v18 = vld [vmem:[%s11863_s7 + $0x280] sm:$0xff] }
 0x1ed   :  { %6605 = vmatprep.subr.bf16.mxu1 %v6604_v40  ;;  %6661 = vmatprep.subr.bf16.mxu0 %v6660_v41  ;;  %v6694_v40 = vpack.c.bf16 %v1707_v32, %v1706_v31  ;;  %v355_v41 = vld [vmem:[%s11861_s5 + $0x3b8] sm:$0xff]  ;;  %v6650_v47 = vpack.c.bf16 %v290_v38, %v258_v37  ;;  %v1717_v31 = vld [vmem:[%s11863_s7 + $0x68] sm:$0xff]  ;;  %v1752_v37 = vld [vmem:[%s11863_s7 + $0x180] sm:$0xff] }
 0x1ee   :  { %955 = vmatprep.mubr.f32.mxu1 %v7764_v6  ;;  %1452 = vmatprep.mubr.f32.mxu0 %v7764_v6  ;;  %v1753_v38 = vld [vmem:[%s11863_s7 + $0x188] sm:$0xff] }
 0x1ef   :  { %v1785_v19 = vld [vmem:[%s11863_s7 + $0x288] sm:$0xff] }
 0x1f0   :  { %6607 = vmatpush1.bf16.msra.mxu1 %v6606_v48  ;;  %6663 = vmatpush1.bf16.msra.mxu0 %v6662_v49  ;;  %v6652_v48 = vpack.c.bf16 %v355_v41, %v323_v39  ;;  %v322_v49 = vld [vmem:[%s11861_s5 + $0x2b0] sm:$0xff]  ;;  %v1736_v41 = vld [vmem:[%s11863_s7 + $0x100] sm:$0xff] }
 0x1f1   :  { %6617 = vmatprep.subr.bf16.mxu1 %v6616_v52  ;;  %6673 = vmatprep.subr.bf16.mxu0 %v6672_v53  ;;  %v6698_v52 = vpack.c.bf16 %v1709_v44, %v1708_v43  ;;  %v295_v53 = vld [vmem:[%s11861_s5 + $0x1d8] sm:$0xff]  ;;  %v6654_v59 = vpack.c.bf16 %v354_v50, %v322_v49  ;;  %v1754_v43 = vld [vmem:[%s11863_s7 + $0x190] sm:$0xff]  ;;  %v1756_v49 = vld [vmem:[%s11863_s7 + $0x1a0] sm:$0xff] }
 0x1f2   :  { %v1755_v44 = vld [vmem:[%s11863_s7 + $0x198] sm:$0xff]  ;;  %v1757_v50 = vld [vmem:[%s11863_s7 + $0x1a8] sm:$0xff] }
 0x1f3   :  { %5255 = vmatmul.mubr.msk.f32.vlgmr.msra.gmra.mrb[10].mxu1 %vm532_vm2, %v8036_v28  ;;  %5262 = vmatmul.mubr.msk.f32.vlgmr.msra.gmra.mrb[10].mxu0 %vm532_vm2, %v8036_v28  ;;  %v6724_v46 = vpack.c.bf16 %v1755_v44, %v1754_v43  ;;  %v8604_v43 = vld [vmem:[%s11862_s6 + $0x18] sm:$0xff] }
 0x1f4   :  { %6619 = vmatpush1.bf16.msra.mxu1 %v6618_v60  ;;  %6675 = vmatpush1.bf16.msra.mxu0 %v6674_v61  ;;  %v6664_v60 = vpack.c.bf16 %v295_v53, %v263_v51  ;;  %v262_v61 = vld [vmem:[%s11861_s5 + $0xd0] sm:$0xff]  ;;  %v1740_v53 = vld [vmem:[%s11863_s7 + $0x120] sm:$0xff] }
 0x1f5   :  { %6621 = vmatprep.subr.bf16.mxu1 %v6620_v0  ;;  %6677 = vmatprep.subr.bf16.mxu0 %v6676_v1  ;;  %v6702_v0 = vpack.c.bf16 %v1711_v56, %v1710_v55  ;;  %v359_v1 = vld [vmem:[%s11861_s5 + $0x3d8] sm:$0xff]  ;;  %v6666_v9 = vpack.c.bf16 %v294_v62, %v262_v61  ;;  %v1758_v55 = vld [vmem:[%s11863_s7 + $0x1b0] sm:$0xff]  ;;  %v1761_v61 = vld [vmem:[%s11863_s7 + $0x1c8] sm:$0xff] }
 0x1f6   :  { %1097 = vmatprep.mubr.f32.mxu1 %v7764_v6  ;;  %1594 = vmatprep.mubr.f32.mxu0 %v7764_v6 }
 0x1f8   :  { %6623 = vmatpush1.bf16.msra.mxu1 %v6622_v10  ;;  %6679 = vmatpush1.bf16.msra.mxu0 %v6678_v11  ;;  %v6668_v10 = vpack.c.bf16 %v359_v1, %v327_v63  ;;  %v326_v11 = vld [vmem:[%s11861_s5 + $0x2d0] sm:$0xff]  ;;  %v1745_v1 = vld [vmem:[%s11863_s7 + $0x148] sm:$0xff] }
 0x1f9   :  { %6633 = vmatprep.subr.bf16.mxu1 %v6632_v12  ;;  %6689 = vmatprep.subr.bf16.mxu0 %v6688_v16  ;;  %v358_v12 = vld [vmem:[%s11861_s5 + $0x3d0] sm:$0xff]  ;;  %v6708_v16 = vpack.c.bf16 %v1731_v8, %v1730_v7  ;;  %v1735_v7 = vld [vmem:[%s11863_s7 + $0xf8] sm:$0xff] }
 0x1fa   :  { %v6670_v21 = vpack.c.bf16 %v358_v12, %v326_v11  ;;  %v6716_v8 = vpack.c.bf16 %v1735_v7, %v1734_v5  ;;  %v1770_v5 = vld [vmem:[%s11863_s7 + $0x210] sm:$0xff]  ;;  %v1771_v7 = vld [vmem:[%s11863_s7 + $0x218] sm:$0xff] }
 0x1fb   :  { %5257 = vmatmul.mubr.msk.f32.vlgmr.msra.gmra.mrb[12].mxu1 %vm532_vm2, %v8036_v28  ;;  %5264 = vmatmul.mubr.msk.f32.vlgmr.msra.gmra.mrb[12].mxu0 %vm532_vm2, %v8036_v28 }
 0x1fc   :  { %6635 = vmatpush1.bf16.msra.mxu1 %v6634_v22  ;;  %1239 = vmatprep.mubr.f32.mxu1 %v7764_v6  ;;  %v6680_v22 = vpack.c.bf16 %v299_v15, %v267_v13  ;;  %v1747_v15 = vld [vmem:[%s11863_s7 + $0x158] sm:$0xff] }
 0x1fd   :  { %6637 = vmatprep.subr.bf16.mxu1 %v6636_v23  ;;  %6691 = vmatpush3.bf16.msra.mxu0 %v6690_v27  ;;  %v266_v23 = vld [vmem:[%s11861_s5 + $0xf0] sm:$0xff]  ;;  %v363_v27 = vld [vmem:[%s11861_s5 + $0x3f8] sm:$0xff] }
 0x1fe   :  { %6693 = vmatprep.subr.bf16.mxu0 %v6692_v30  ;;  %v1716_v30 = vld [vmem:[%s11863_s7 + $0x60] sm:$0xff]  ;;  %v6682_v32 = vpack.c.bf16 %v298_v24, %v266_v23  ;;  %v6684_v33 = vpack.c.bf16 %v363_v27, %v331_v25  ;;  %v1749_v24 = vld [vmem:[%s11863_s7 + $0x168] sm:$0xff]  ;;  %v1766_v25 = vld [vmem:[%s11863_s7 + $0x1f0] sm:$0xff] }
 0x1ff   :  { %v1748_v23 = vld [vmem:[%s11863_s7 + $0x160] sm:$0xff] }
 0x200   :  { %6639 = vmatpush1.bf16.msra.mxu1 %v6638_v35  ;;  %v362_v35 = vld [vmem:[%s11861_s5 + $0x3f0] sm:$0xff]  ;;  %v6746_v27 = vpack.c.bf16 %v1749_v24, %v1748_v23 }
 0x201   :  { %6649 = vmatprep.subr.bf16.mxu1 %v6648_v36  ;;  %6695 = vmatpush3.bf16.msra.mxu0 %v6694_v40  ;;  %v6714_v36 = vpack.c.bf16 %v1717_v31, %v1716_v30  ;;  %v6686_v39 = vpack.c.bf16 %v362_v35, %v330_v34  ;;  %v6720_v40 = vpack.c.bf16 %v1753_v38, %v1752_v37  ;;  %v1750_v30 = vld [vmem:[%s11863_s7 + $0x170] sm:$0xff]  ;;  %v1751_v31 = vld [vmem:[%s11863_s7 + $0x178] sm:$0xff] }
 0x202   :  { %6697 = vmatprep.subr.bf16.mxu0 %v6696_v42  ;;  %v1737_v42 = vld [vmem:[%s11863_s7 + $0x108] sm:$0xff]  ;;  %v6750_v34 = vpack.c.bf16 %v1751_v31, %v1750_v30  ;;  %v1818_v23 = vld [vmem:[%s11863_s7 + $0x390] sm:$0xff] }
 0x203   :  { %5259 = vmatmul.mubr.msk.f32.vlgmr.msra.gmra.mrb[14].mxu1 %vm532_vm2, %v8036_v28  ;;  %v6722_v45 = vpack.c.bf16 %v1737_v42, %v1736_v41  ;;  %v8597_v41 = vld [vmem:[%s11862_s6 + $0x10] sm:$0xff] }
 0x204   :  { %6651 = vmatpush1.bf16.msra.mxu1 %v6650_v47  ;;  %1381 = vmatprep.mubr.f32.mxu1 %v7764_v6  ;;  %v1738_v47 = vld [vmem:[%s11863_s7 + $0x110] sm:$0xff] }
 0x205   :  { %6653 = vmatprep.subr.bf16.mxu1 %v6652_v48  ;;  %6699 = vmatpush3.bf16.msra.mxu0 %v6698_v52  ;;  %v1739_v48 = vld [vmem:[%s11863_s7 + $0x118] sm:$0xff]  ;;  %v6728_v52 = vpack.c.bf16 %v1757_v50, %v1756_v49 }
 0x206   :  { %6701 = vmatprep.subr.bf16.mxu0 %v6700_v54  ;;  %v6726_v51 = vpack.c.bf16 %v1739_v48, %v1738_v47  ;;  %v1741_v54 = vld [vmem:[%s11863_s7 + $0x128] sm:$0xff] }
 0x207   :  { %v6730_v56 = vpack.c.bf16 %v1741_v54, %v1740_v53 }
 0x208   :  { %6655 = vmatpush1.bf16.msra.mxu1 %v6654_v59  ;;  %v1743_v59 = vld [vmem:[%s11863_s7 + $0x138] sm:$0xff] }
 0x209   :  { %6665 = vmatprep.subr.bf16.mxu1 %v6664_v60  ;;  %6703 = vmatpush3.bf16.msra.mxu0 %v6702_v0  ;;  %v1760_v60 = vld [vmem:[%s11863_s7 + $0x1c0] sm:$0xff]  ;;  %v6734_v62 = vpack.c.bf16 %v1743_v59, %v1742_v58 }
 0x20a   :  { %6705 = vmatprep.subr.bf16.mxu0 %v6704_v2  ;;  %v6736_v63 = vpack.c.bf16 %v1761_v61, %v1760_v60  ;;  %v1744_v0 = vld [vmem:[%s11863_s7 + $0x140] sm:$0xff]  ;;  %v1762_v2 = vld [vmem:[%s11863_s7 + $0x1d0] sm:$0xff]  ;;  %v1787_v61 = vld [vmem:[%s11863_s7 + $0x298] sm:$0xff] }
 0x20b   :  { %5261 = vmatmul.mubr.msk.f32.vlgmr.msra.gmra.mrb[16].mxu1 %vm532_vm2, %v8036_v28  ;;  %v6738_v11 = vpack.c.bf16 %v1745_v1, %v1744_v0  ;;  %v6740_v13 = vpack.c.bf16 %v1763_v4, %v1762_v2  ;;  %v1786_v60 = vld [vmem:[%s11863_s7 + $0x290] sm:$0xff] }
 0x20c   :  { %6667 = vmatpush1.bf16.msra.mxu1 %v6666_v9  ;;  %1523 = vmatprep.mubr.f32.mxu1 %v7764_v6  ;;  %v1718_v9 = vld [vmem:[%s11863_s7 + $0x70] sm:$0xff]  ;;  %v6756_v4 = vpack.c.bf16 %v1787_v61, %v1786_v60  ;;  %v1821_v60 = vld [vmem:[%s11863_s7 + $0x3a8] sm:$0xff]  ;;  %v1792_v61 = vld [vmem:[%s11863_s7 + $0x2c0] sm:$0xff] }
 0x20d   :  { %6669 = vmatprep.subr.bf16.mxu1 %v6668_v10  ;;  %6707 = vmatpush3.bf16.msra.mxu0 %v6706_v14  ;;  %v1719_v10 = vld [vmem:[%s11863_s7 + $0x78] sm:$0xff]  ;;  %v1746_v14 = vld [vmem:[%s11863_s7 + $0x150] sm:$0xff] }
 0x20e   :  { %6709 = vmatprep.subr.bf16.mxu0 %v6708_v16  ;;  %v6718_v12 = vpack.c.bf16 %v1719_v10, %v1718_v9  ;;  %v1764_v16 = vld [vmem:[%s11863_s7 + $0x1e0] sm:$0xff]  ;;  %v6742_v20 = vpack.c.bf16 %v1747_v15, %v1746_v14  ;;  %v1789_v10 = vld [vmem:[%s11863_s7 + $0x2a8] sm:$0xff] }
 0x20f   :  { %v1788_v9 = vld [vmem:[%s11863_s7 + $0x2a0] sm:$0xff]  ;;  %v1801_v15 = vld [vmem:[%s11863_s7 + $0x308] sm:$0xff] }
 0x210   :  { %6671 = vmatpush1.bf16.msra.mxu1 %v6670_v21  ;;  %v6752_v21 = vpack.c.bf16 %v1785_v19, %v1784_v18  ;;  %v1800_v14 = vld [vmem:[%s11863_s7 + $0x300] sm:$0xff] }
 0x211   :  { %6681 = vmatprep.subr.bf16.mxu1 %v6680_v22  ;;  %6711 = vmatpush3.bf16.msra.mxu0 %v6710_v26  ;;  %v6744_v22 = vpack.c.bf16 %v1765_v17, %v1764_v16  ;;  %v1767_v26 = vld [vmem:[%s11863_s7 + $0x1f8] sm:$0xff]  ;;  %v6786_v31 = vpack.c.bf16 %v1801_v15, %v1800_v14 }
 0x212   :  { %6713 = vmatprep.subr.bf16.mxu0 %v6712_v29  ;;  %v6748_v29 = vpack.c.bf16 %v1767_v26, %v1766_v25  ;;  %v1819_v25 = vld [vmem:[%s11863_s7 + $0x398] sm:$0xff]  ;;  %v1790_v26 = vld [vmem:[%s11863_s7 + $0x2b0] sm:$0xff] }
 0x213   :  { %5263 = vmatmul.mubr.msk.f32.vlgmr.msra.gmra.mrb[18].mxu1 %vm532_vm2, %v8036_v28 }
 0x214   :  { %6683 = vmatpush1.bf16.msra.mxu1 %v6682_v32  ;;  %1665 = vmatprep.mubr.f32.mxu1 %v7764_v6  ;;  %v1816_v32 = vld [vmem:[%s11863_s7 + $0x380] sm:$0xff] }
 0x215   :  { %6685 = vmatprep.subr.bf16.mxu1 %v6684_v33  ;;  %6715 = vmatpush3.bf16.msra.mxu0 %v6714_v36  ;;  %v1817_v33 = vld [vmem:[%s11863_s7 + $0x388] sm:$0xff]  ;;  %v372_v36 = vlaneseq }
 0x216   :  { %6717 = vmatprep.subr.bf16.mxu0 %v6716_v8  ;;  %v6784_v35 = vpack.c.bf16 %v1817_v33, %v1816_v32  ;;  %v1802_v33 = vld [vmem:[%s11863_s7 + $0x310] sm:$0xff] }
 0x217   :  { %v8582_v37 = vshrl.u32 %v372_v36, 7  ;;  %v6788_v36 = vpack.c.bf16 %v1819_v25, %v1818_v23 }
 0x218   :  { %6687 = vmatpush1.bf16.msra.mxu1 %v6686_v39  ;;  %v8590_v39 = vld [vmem:[%s11862_s6 + $0x8] sm:$0xff] }
 0x219   :  { %6721 = vmatprep.subr.bf16.mxu1 %v6720_v40  ;;  %6719 = vmatpush3.bf16.msra.mxu0 %v6718_v12  ;;  %v8585_v38 = vsub.s32 6, %v8582_v37  ;;  %v8617_v47 = vsub.s32 1, %v8582_v37  ;;  %v8644_v59 = vsub.s32 3, %v8582_v37  ;;  %v8709_v30 = vsub.s32 5, %v8582_v37 }
 0x21a   :  { %6753 = vmatprep.subr.bf16.mxu0 %v6752_v21  ;;  %v1772_v21 = vld [vmem:[%s11863_s7 + $0x220] sm:$0xff] }
 0x21b   :  { %5265 = vmatmul.mubr.msk.f32.vlgmr.msra.gmra.mrb[20].mxu1 %vm532_vm2, %v8036_v28  ;;  %v1759_v28 = vld [vmem:[%s11863_s7 + $0x1b8] sm:$0xff]  ;;  %v431_v40 = vrot.slane %v8590_v39, %v8585_v38  ;;  %v463_v42 = vrot.slane %v8597_v41, %v8585_v38  ;;  %v495_v44 = vrot.slane %v8604_v43, %v8585_v38 }
 0x21c   :  { %6723 = vmatpush3.bf16.msra.mxu1 %v6722_v45  ;;  %v6732_v57 = vpack.c.bf16 %v1759_v28, %v1758_v55  ;;  %v8609_v45 = vsub.s32 0, %v8582_v37  ;;  %v8630_v55 = vsub.s32 2, %v8582_v37  ;;  %v8633_v28 = vsub.s32 4, %v8582_v37 }
 0x21d   :  { %6725 = vmatprep.subr.bf16.mxu1 %v6724_v46  ;;  %v8614_v46 = vld [vmem:[%s11862_s6] sm:$0xff] }
 0x21e   :  { %v375_v48 = vrot.slane %v8614_v46, %v8609_v45  ;;  %v379_v49 = vrot.slane %v8614_v46, %v8617_v47  ;;  %v383_v1 = vrot.slane %v8614_v46, %v8630_v55  ;;  %v423_v2 = vrot.slane %v8590_v39, %v8633_v28 }
 0x21f   :  { %v387_v8 = vrot.slane %v8614_v46, %v8644_v59 }
 0x220   :  { %6727 = vmatpush3.bf16.msra.mxu1 %v6726_v51 }
 0x221   :  { %6729 = vmatprep.subr.bf16.mxu1 %v6728_v52 }
 0x224   :  { %6731 = vmatpush3.bf16.msra.mxu1 %v6730_v56  ;;  %v1768_v56 = vld [vmem:[%s11863_s7 + $0x200] sm:$0xff] }
 0x225   :  { %6733 = vmatprep.subr.bf16.mxu1 %v6732_v57  ;;  %v1769_v57 = vld [vmem:[%s11863_s7 + $0x208] sm:$0xff] }
 0x228   :  { %6735 = vmatpush3.bf16.msra.mxu1 %v6734_v62 }
 0x229   :  { %6737 = vmatprep.subr.bf16.mxu1 %v6736_v63  ;;  %v6754_v63 = vpack.c.bf16 %v1769_v57, %v1768_v56  ;;  %v395_v56 = vrot.slane %v8614_v46, %v8709_v30  ;;  %v443_v57 = vrot.slane %v8597_v41, %v8617_v47 }
 0x22c   :  { %6739 = vmatpush3.bf16.msra.mxu1 %v6738_v11 }
 0x22d   :  { %6741 = vmatprep.subr.bf16.mxu1 %v6740_v13  ;;  %v6758_v13 = vpack.c.bf16 %v1771_v7, %v1770_v5  ;;  %v1805_v5 = vld [vmem:[%s11863_s7 + $0x328] sm:$0xff] }
 0x230   :  { %6743 = vmatpush3.bf16.msra.mxu1 %v6742_v20  ;;  %v6760_v20 = vpack.c.bf16 %v1789_v10, %v1788_v9 }
 0x231   :  { %6745 = vmatprep.subr.bf16.mxu1 %v6744_v22  ;;  %v1773_v22 = vld [vmem:[%s11863_s7 + $0x228] sm:$0xff] }
 0x232   :  { %v6762_v32 = vpack.c.bf16 %v1773_v22, %v1772_v21  ;;  %v1794_v21 = vld [vmem:[%s11863_s7 + $0x2d0] sm:$0xff]  ;;  %v1795_v22 = vld [vmem:[%s11863_s7 + $0x2d8] sm:$0xff] }
 0x234   :  { %6747 = vmatpush3.bf16.msra.mxu1 %v6746_v27  ;;  %v1791_v27 = vld [vmem:[%s11863_s7 + $0x2b8] sm:$0xff] }
 0x235   :  { %6749 = vmatprep.subr.bf16.mxu1 %v6748_v29 }
 0x238   :  { %6751 = vmatpush3.bf16.msra.mxu1 %v6750_v34  ;;  %v1803_v34 = vld [vmem:[%s11863_s7 + $0x318] sm:$0xff] }
 0x239   :  { %6785 = vmatprep.subr.bf16.mxu1 %v6784_v35 }
 0x2a6   :  { %v602_v50 = vpop.f32.mrb[2].mxu1  ;;  %v8623_v51 = vpop.f32.mrb[2].mxu0 }
 0x2a7   :  { %v8625_v52 = vadd.f32 %v602_v50, %v375_v48  ;;  %v604_v53 = vpop.f32.mrb[3].mxu1  ;;  %v8627_v54 = vpop.f32.mrb[3].mxu0  ;;  %v6764_v48 = vpack.c.bf16 %v1791_v27, %v1790_v26  ;;  %v1775_v50 = vld [vmem:[%s11863_s7 + $0x238] sm:$0xff]  ;;  %v1806_v26 = vld [vmem:[%s11863_s7 + $0x330] sm:$0xff] }
 0x2a8   :  { %v8641_v58 = vadd.f32 %v604_v53, %v379_v49  ;;  %v1774_v49 = vld [vmem:[%s11863_s7 + $0x230] sm:$0xff]  ;;  %v1820_v53 = vld [vmem:[%s11863_s7 + $0x3a0] sm:$0xff]  ;;  %v1807_v27 = vld [vmem:[%s11863_s7 + $0x338] sm:$0xff] }
 0x2a9   :  { %v1672_v0 = vmul.f32 %v8625_v52, %v8625_v52  ;;  %v6792_v9 = vpack.c.bf16 %v1821_v60, %v1820_v53  ;;  %v1797_v53 = vld [vmem:[%s11863_s7 + $0x2e8] sm:$0xff]  ;;  %v6798_v60 = vpack.c.bf16 %v1807_v27, %v1806_v26  ;;  %v1810_v27 = vld [vmem:[%s11863_s7 + $0x350] sm:$0xff] }
 0x2aa   :  { %v1673_v62 = vmul.f32 %v8641_v58, %v8641_v58 }
 0x2ac   :  { %2280 = vmatprep.mubr.f32.mxu0 %v1673_v62  ;;  %v1793_v62 = vld [vmem:[%s11863_s7 + $0x2c8] sm:$0xff] }
 0x2ad   :  { %2281 = vmatmul.mubr.f32.vlgmr.msra.gmra.mrb[14].mxu0 %v1672_v0  ;;  %v6768_v10 = vpack.c.bf16 %v1793_v62, %v1792_v61  ;;  %v1808_v62 = vld [vmem:[%s11863_s7 + $0x340] sm:$0xff] }
 0x2ae   :  { %v673_v11 = vpop.f32.mrb[4].mxu1  ;;  %v1028_v12 = vpop.f32.mrb[4].mxu0  ;;  %6755 = vmatpush3.bf16.msra.mxu0 %v6754_v63 }
 0x2af   :  { %v8680_v16 = vadd.f32 %v673_v11, %v383_v1  ;;  %v8682_v17 = vadd.f32 %v1028_v12, %v423_v2  ;;  %v675_v18 = vpop.f32.mrb[5].mxu1  ;;  %v8684_v19 = vpop.f32.mrb[5].mxu0  ;;  %6757 = vmatprep.subr.bf16.mxu0 %v6756_v4  ;;  %v6790_v1 = vpack.c.bf16 %v1803_v34, %v1802_v33  ;;  %v6766_v2 = vpack.c.bf16 %v1775_v50, %v1774_v49  ;;  %v1804_v4 = vld [vmem:[%s11863_s7 + $0x320] sm:$0xff]  ;;  %v1777_v12 = vld [vmem:[%s11863_s7 + $0x248] sm:$0xff]  ;;  %v1778_v33 = vld [vmem:[%s11863_s7 + $0x250] sm:$0xff] }
 0x2b0   :  { %v8695_v24 = vadd.f32 %v675_v18, %v387_v8  ;;  %v1776_v11 = vld [vmem:[%s11863_s7 + $0x240] sm:$0xff]  ;;  %v8765_v18 = vsub.s32 7, %v8582_v37  ;;  %v6794_v25 = vpack.c.bf16 %v1805_v5, %v1804_v4  ;;  %v1779_v34 = vld [vmem:[%s11863_s7 + $0x258] sm:$0xff]  ;;  %v1825_v49 = vld [vmem:[%s11863_s7 + $0x3c8] sm:$0xff] }
 0x2b1   :  { %v1674_v35 = vmul.f32 %v8680_v16, %v8680_v16  ;;  %v6770_v37 = vpack.c.bf16 %v1777_v12, %v1776_v11  ;;  %v1796_v50 = vld [vmem:[%s11863_s7 + $0x2e0] sm:$0xff]  ;;  %v6774_v61 = vpack.c.bf16 %v1779_v34, %v1778_v33  ;;  %v1826_v11 = vld [vmem:[%s11863_s7 + $0x3d0] sm:$0xff] }
 0x2b2   :  { %v1675_v29 = vmul.f32 %v8695_v24, %v8695_v24  ;;  %6759 = vmatpush3.bf16.msra.mxu0 %v6758_v13  ;;  %v1822_v13 = vld [vmem:[%s11863_s7 + $0x3b0] sm:$0xff] }
 0x2b3   :  { %6761 = vmatprep.subr.bf16.mxu0 %v6760_v20  ;;  %v1823_v20 = vld [vmem:[%s11863_s7 + $0x3b8] sm:$0xff] }
 0x2b4   :  { %2350 = vmatprep.mubr.f32.mxu1 %v1675_v29  ;;  %v455_v29 = vrot.slane %v8597_v41, %v8633_v28 }
 0x2b5   :  { %2351 = vmatmul.mubr.f32.vlgmr.msra.gmra.mrb[22].mxu1 %v1674_v35  ;;  %v1824_v35 = vld [vmem:[%s11863_s7 + $0x3c0] sm:$0xff] }
 0x2b6   :  { %6787 = vmatpush3.bf16.msra.mxu1 %v6786_v31  ;;  %v8741_v63 = vpop.f32.mrb[6].mxu1  ;;  %v8743_v0 = vpop.f32.mrb[6].mxu0  ;;  %6763 = vmatpush3.bf16.msra.mxu0 %v6762_v32  ;;  %v6796_v31 = vpack.c.bf16 %v1823_v20, %v1822_v13  ;;  %v6772_v32 = vpack.c.bf16 %v1795_v22, %v1794_v21  ;;  %v1827_v20 = vld [vmem:[%s11863_s7 + $0x3d8] sm:$0xff]  ;;  %v1798_v21 = vld [vmem:[%s11863_s7 + $0x2f0] sm:$0xff] }
 0x2b7   :  { %v746_v7 = vpop.f32.mrb[7].mxu1  ;;  %v1172_v8 = vpop.f32.mrb[7].mxu0  ;;  %6789 = vmatprep.subr.bf16.mxu1 %v6788_v36  ;;  %6765 = vmatprep.subr.bf16.mxu0 %v6764_v48  ;;  %v403_v36 = vrot.slane %v8614_v46, %v8765_v18  ;;  %v459_v48 = vrot.slane %v8597_v41, %v8709_v30  ;;  %v1799_v22 = vld [vmem:[%s11863_s7 + $0x2f8] sm:$0xff]  ;;  %v6804_v33 = vpack.c.bf16 %v1827_v20, %v1826_v11  ;;  %v1832_v20 = vld [vmem:[%s11863_s7 + $0x400] sm:$0xff] }
 0x2b8   :  { %v8760_v14 = vadd.f32 %v746_v7, %v395_v56  ;;  %v8762_v15 = vadd.f32 %v1172_v8, %v443_v57  ;;  %v6800_v7 = vpack.c.bf16 %v1825_v49, %v1824_v35  ;;  %v6776_v8 = vpack.c.bf16 %v1797_v53, %v1796_v50  ;;  %v1783_v35 = vld [vmem:[%s11863_s7 + $0x278] sm:$0xff]  ;;  %v1848_v50 = vld [vmem:[%s11863_s7 + $0x480] sm:$0xff]  ;;  %v1849_v53 = vld [vmem:[%s11863_s7 + $0x488] sm:$0xff] }
 0x2b9   :  { %v6780_v34 = vpack.c.bf16 %v1799_v22, %v1798_v21  ;;  %v475_v49 = vrot.slane %v8604_v43, %v8617_v47  ;;  %v6816_v11 = vpack.c.bf16 %v1849_v53, %v1848_v50  ;;  %v1830_v22 = vld [vmem:[%s11863_s7 + $0x3f0] sm:$0xff]  ;;  %v1852_v50 = vld [vmem:[%s11863_s7 + $0x4a0] sm:$0xff]  ;;  %v1853_v53 = vld [vmem:[%s11863_s7 + $0x4a8] sm:$0xff] }
 0x2ba   :  { %v1677_v23 = vmul.f32 %v8760_v14, %v8760_v14  ;;  %6791 = vmatpush3.bf16.msra.mxu1 %v6790_v1  ;;  %6767 = vmatpush3.bf16.msra.mxu0 %v6766_v2  ;;  %v1809_v1 = vld [vmem:[%s11863_s7 + $0x348] sm:$0xff] }
 0x2bb   :  { %6793 = vmatprep.subr.bf16.mxu1 %v6792_v9  ;;  %6769 = vmatprep.subr.bf16.mxu0 %v6768_v10  ;;  %v1780_v9 = vld [vmem:[%s11863_s7 + $0x260] sm:$0xff]  ;;  %v1781_v10 = vld [vmem:[%s11863_s7 + $0x268] sm:$0xff] }
 0x2bc   :  { %2420 = vmatprep.mubr.f32.mxu0 %v1677_v23  ;;  %v391_v23 = vrot.slane %v8614_v46, %v8633_v28  ;;  %v6778_v26 = vpack.c.bf16 %v1781_v10, %v1780_v9 }
 0x2be   :  { %6795 = vmatpush3.bf16.msra.mxu1 %v6794_v25  ;;  %v8808_v56 = vpop.f32.mrb[8].mxu1  ;;  %v1312_v57 = vpop.f32.mrb[8].mxu0  ;;  %6771 = vmatpush3.bf16.msra.mxu0 %v6770_v37  ;;  %v6802_v37 = vpack.c.bf16 %v1809_v1, %v1808_v62 }
 0x2bf   :  { %v8816_v2 = vadd.f32 %v1312_v57, %v455_v29  ;;  %v817_v4 = vpop.f32.mrb[9].mxu1  ;;  %v1314_v5 = vpop.f32.mrb[9].mxu0  ;;  %6797 = vmatprep.subr.bf16.mxu1 %v6796_v31  ;;  %6773 = vmatprep.subr.bf16.mxu0 %v6772_v32  ;;  %v1811_v29 = vld [vmem:[%s11863_s7 + $0x358] sm:$0xff]  ;;  %v1782_v31 = vld [vmem:[%s11863_s7 + $0x270] sm:$0xff]  ;;  %v415_v32 = vrot.slane %v8590_v39, %v8630_v55  ;;  %v411_v57 = vrot.slane %v8590_v39, %v8617_v47  ;;  %v1813_v47 = vld [vmem:[%s11863_s7 + $0x368] sm:$0xff] }
 0x2c0   :  { %v8827_v12 = vadd.f32 %v817_v4, %v403_v36  ;;  %v8829_v13 = vadd.f32 %v1314_v5, %v459_v48  ;;  %v1828_v36 = vld [vmem:[%s11863_s7 + $0x3e0] sm:$0xff]  ;;  %v1829_v48 = vld [vmem:[%s11863_s7 + $0x3e8] sm:$0xff]  ;;  %v6806_v62 = vpack.c.bf16 %v1811_v29, %v1810_v27  ;;  %v6782_v1 = vpack.c.bf16 %v1783_v35, %v1782_v31  ;;  %v1850_v27 = vld [vmem:[%s11863_s7 + $0x490] sm:$0xff] }
 0x2c1   :  { %v6808_v4 = vpack.c.bf16 %v1829_v48, %v1828_v36  ;;  %v1812_v5 = vld [vmem:[%s11863_s7 + $0x360] sm:$0xff]  ;;  %v1851_v29 = vld [vmem:[%s11863_s7 + $0x498] sm:$0xff]  ;;  %v399_v31 = vrot.slane %v8614_v46, %v8585_v38  ;;  %v487_v46 = vrot.slane %v8604_v43, %v8633_v28 }
 0x2c2   :  { %v1679_v25 = vmul.f32 %v8827_v12, %v8827_v12  ;;  %6799 = vmatpush3.bf16.msra.mxu1 %v6798_v60  ;;  %6775 = vmatpush3.bf16.msra.mxu0 %v6774_v61  ;;  %v1880_v35 = vld [vmem:[%s11863_s7 + $0x580] sm:$0xff]  ;;  %v6820_v28 = vpack.c.bf16 %v1851_v29, %v1850_v27  ;;  %v1865_v27 = vld [vmem:[%s11863_s7 + $0x508] sm:$0xff] }
 0x2c3   :  { %6801 = vmatprep.subr.bf16.mxu1 %v6800_v7  ;;  %6777 = vmatprep.subr.bf16.mxu0 %v6776_v8  ;;  %v8880_v7 = vadd.f32 %v8741_v63, %v391_v23  ;;  %v1833_v63 = vld [vmem:[%s11863_s7 + $0x408] sm:$0xff]  ;;  %v1831_v23 = vld [vmem:[%s11863_s7 + $0x3f8] sm:$0xff] }
 0x2c4   :  { %2490 = vmatprep.mubr.f32.mxu1 %v1679_v25  ;;  %v1814_v25 = vld [vmem:[%s11863_s7 + $0x370] sm:$0xff]  ;;  %v6812_v48 = vpack.c.bf16 %v1831_v23, %v1830_v22 }
 0x2c5   :  { %v1676_v36 = vmul.f32 %v8880_v7, %v8880_v7 }
 0x2c6   :  { %6803 = vmatpush3.bf16.msra.mxu1 %v6802_v37  ;;  %v957_v60 = vpop.f32.mrb[10].mxu1  ;;  %v8874_v61 = vpop.f32.mrb[10].mxu0  ;;  %6779 = vmatpush3.bf16.msra.mxu0 %v6778_v26  ;;  %v8905_v37 = vadd.f32 %v8627_v54, %v411_v57  ;;  %v1815_v26 = vld [vmem:[%s11863_s7 + $0x378] sm:$0xff]  ;;  %v6818_v54 = vpack.c.bf16 %v1833_v63, %v1832_v20  ;;  %v419_v57 = vrot.slane %v8590_v39, %v8644_v59  ;;  %v1864_v20 = vld [vmem:[%s11863_s7 + $0x500] sm:$0xff] }
 0x2c7   :  { %v8882_v8 = vadd.f32 %v957_v60, %v415_v32  ;;  %v959_v9 = vpop.f32.mrb[11].mxu1  ;;  %v1456_v10 = vpop.f32.mrb[11].mxu0  ;;  %6805 = vmatprep.subr.bf16.mxu1 %v6804_v33  ;;  %6781 = vmatprep.subr.bf16.mxu0 %v6780_v34  ;;  %v6810_v32 = vpack.c.bf16 %v1813_v47, %v1812_v5  ;;  %v1834_v33 = vld [vmem:[%s11863_s7 + $0x410] sm:$0xff]  ;;  %v1835_v34 = vld [vmem:[%s11863_s7 + $0x418] sm:$0xff]  ;;  %v491_v60 = vrot.slane %v8604_v43, %v8709_v30 }
 0x2c8   :  { %v8893_v21 = vadd.f32 %v1456_v10, %v475_v49  ;;  %v1881_v49 = vld [vmem:[%s11863_s7 + $0x588] sm:$0xff]  ;;  %v6822_v10 = vpack.c.bf16 %v1835_v34, %v1834_v33  ;;  %v8950_v63 = vadd.f32 %v8808_v56, %v399_v31  ;;  %v1836_v56 = vld [vmem:[%s11863_s7 + $0x420] sm:$0xff]  ;;  %v8970_v29 = vadd.f32 %v959_v9, %v419_v57  ;;  %v1854_v33 = vld [vmem:[%s11863_s7 + $0x4b0] sm:$0xff] }
 0x2c9   :  { %v6848_v47 = vpack.c.bf16 %v1881_v49, %v1880_v35  ;;  %v1855_v9 = vld [vmem:[%s11863_s7 + $0x4b8] sm:$0xff]  ;;  %v6850_v34 = vpack.c.bf16 %v1865_v27, %v1864_v20  ;;  %v1866_v49 = vld [vmem:[%s11863_s7 + $0x510] sm:$0xff] }
 0x2ca   :  { %6807 = vmatpush3.bf16.msra.mxu1 %v6806_v62  ;;  %6783 = vmatpush3.bf16.msra.mxu0 %v6782_v1  ;;  %v1681_v62 = vmul.f32 %v8905_v37, %v8905_v37  ;;  %v6814_v1 = vpack.c.bf16 %v1815_v26, %v1814_v25  ;;  %v1683_v57 = vmul.f32 %v8970_v29, %v8970_v29 }
 0x2cb   :  { %6809 = vmatprep.subr.bf16.mxu1 %v6808_v4  ;;  %6817 = vmatprep.subr.bf16.mxu0 %v6816_v11  ;;  %v6824_v11 = vpack.c.bf16 %v1853_v53, %v1852_v50  ;;  %v1867_v50 = vld [vmem:[%s11863_s7 + $0x518] sm:$0xff]  ;;  %v1838_v53 = vld [vmem:[%s11863_s7 + $0x430] sm:$0xff] }
 0x2cd   :  { %2421 = vmatmul.mubr.f32.vlgmr.msra.gmra.mrb[16].mxu0 %v1676_v36  ;;  %v1678_v36 = vmul.f32 %v8950_v63, %v8950_v63 }
 0x2ce   :  { %6811 = vmatpush3.bf16.msra.mxu1 %v6810_v32  ;;  %v1099_v4 = vpop.f32.mrb[12].mxu1  ;;  %v1596_v5 = vpop.f32.mrb[12].mxu0  ;;  %6819 = vmatpush3.bf16.msra.mxu0 %v6818_v54  ;;  %v1882_v32 = vld [vmem:[%s11863_s7 + $0x590] sm:$0xff]  ;;  %v1883_v54 = vld [vmem:[%s11863_s7 + $0x598] sm:$0xff] }
 0x2cf   :  { %v8955_v22 = vadd.f32 %v1099_v4, %v431_v40  ;;  %v8957_v23 = vadd.f32 %v1596_v5, %v487_v46  ;;  %2560 = vmatprep.mubr.f32.mxu0 %v1681_v62  ;;  %v8959_v25 = vpop.f32.mrb[13].mxu1  ;;  %v1598_v26 = vpop.f32.mrb[13].mxu0  ;;  %6813 = vmatprep.subr.bf16.mxu1 %v6812_v48  ;;  %v1837_v40 = vld [vmem:[%s11863_s7 + $0x428] sm:$0xff]  ;;  %v447_v46 = vrot.slane %v8597_v41, %v8630_v55  ;;  %v1839_v62 = vld [vmem:[%s11863_s7 + $0x438] sm:$0xff]  ;;  %v1856_v5 = vld [vmem:[%s11863_s7 + $0x4c0] sm:$0xff] }
 0x2d0   :  { %v8972_v31 = vadd.f32 %v1598_v26, %v491_v60  ;;  %6821 = vmatprep.subr.bf16.mxu0 %v6820_v28  ;;  %v6826_v35 = vpack.c.bf16 %v1837_v40, %v1836_v56  ;;  %v6852_v48 = vpack.c.bf16 %v1883_v54, %v1882_v32  ;;  %v451_v60 = vrot.slane %v8597_v41, %v8644_v59  ;;  %v1885_v4 = vld [vmem:[%s11863_s7 + $0x5a8] sm:$0xff]  ;;  %v1868_v40 = vld [vmem:[%s11863_s7 + $0x520] sm:$0xff] }
 0x2d1   :  { %v6828_v28 = vpack.c.bf16 %v1855_v9, %v1854_v33  ;;  %v6830_v27 = vpack.c.bf16 %v1839_v62, %v1838_v53  ;;  %v1869_v32 = vld [vmem:[%s11863_s7 + $0x528] sm:$0xff]  ;;  %v1840_v54 = vld [vmem:[%s11863_s7 + $0x440] sm:$0xff]  ;;  %v467_v62 = vrot.slane %v8597_v41, %v8765_v18 }
 0x2d2   :  { %6815 = vmatpush3.bf16.msra.mxu1 %v6814_v1  ;;  %6823 = vmatpush3.bf16.msra.mxu0 %v6822_v10  ;;  %v1884_v1 = vld [vmem:[%s11863_s7 + $0x5a0] sm:$0xff]  ;;  %v1857_v10 = vld [vmem:[%s11863_s7 + $0x4c8] sm:$0xff] }
 0x2d3   :  { %6849 = vmatprep.subr.bf16.mxu1 %v6848_v47  ;;  %6825 = vmatprep.subr.bf16.mxu0 %v6824_v11  ;;  %v6854_v11 = vpack.c.bf16 %v1867_v50, %v1866_v49  ;;  %v6856_v56 = vpack.c.bf16 %v1885_v4, %v1884_v1  ;;  %v6832_v9 = vpack.c.bf16 %v1857_v10, %v1856_v5  ;;  %v1843_v4 = vld [vmem:[%s11863_s7 + $0x458] sm:$0xff]  ;;  %v1888_v5 = vld [vmem:[%s11863_s7 + $0x5c0] sm:$0xff]  ;;  %v1889_v10 = vld [vmem:[%s11863_s7 + $0x5c8] sm:$0xff] }
 0x2d4   :  { %v6858_v49 = vpack.c.bf16 %v1869_v32, %v1868_v40 }
 0x2d5   :  { %2491 = vmatmul.mubr.f32.vlgmr.msra.gmra.mrb[24].mxu1 %v1678_v36  ;;  %v1887_v36 = vld [vmem:[%s11863_s7 + $0x5b8] sm:$0xff] }
 0x2d6   :  { %6851 = vmatpush3.bf16.msra.mxu1 %v6850_v34  ;;  %2630 = vmatprep.mubr.f32.mxu1 %v1683_v57  ;;  %v1241_v47 = vpop.f32.mrb[14].mxu1  ;;  %v1841_v34 = vld [vmem:[%s11863_s7 + $0x448] sm:$0xff]  ;;  %v1870_v57 = vld [vmem:[%s11863_s7 + $0x530] sm:$0xff] }
 0x2d7   :  { %v9018_v20 = vadd.f32 %v1241_v47, %v447_v46  ;;  %6827 = vmatpush3.bf16.msra.mxu0 %v6826_v35  ;;  %v1243_v26 = vpop.f32.mrb[15].mxu1  ;;  %6853 = vmatprep.subr.bf16.mxu1 %v6852_v48  ;;  %v1886_v35 = vld [vmem:[%s11863_s7 + $0x5b0] sm:$0xff]  ;;  %v1859_v48 = vld [vmem:[%s11863_s7 + $0x4d8] sm:$0xff]  ;;  %v6834_v50 = vpack.c.bf16 %v1841_v34, %v1840_v54  ;;  %v1860_v47 = vld [vmem:[%s11863_s7 + $0x4e0] sm:$0xff]  ;;  %v6864_v54 = vpack.c.bf16 %v1889_v10, %v1888_v5 }
 0x2d8   :  { %v9029_v33 = vadd.f32 %v1243_v26, %v451_v60  ;;  %6829 = vmatprep.subr.bf16.mxu0 %v6828_v28  ;;  %v1858_v46 = vld [vmem:[%s11863_s7 + $0x4d0] sm:$0xff]  ;;  %v6860_v53 = vpack.c.bf16 %v1887_v36, %v1886_v35  ;;  %v1871_v60 = vld [vmem:[%s11863_s7 + $0x538] sm:$0xff]  ;;  %v1873_v34 = vld [vmem:[%s11863_s7 + $0x548] sm:$0xff]  ;;  %v407_v5 = vrot.slane %v8590_v39, %v8609_v45 }
 0x2d9   :  { %v1842_v28 = vld [vmem:[%s11863_s7 + $0x450] sm:$0xff]  ;;  %v6836_v1 = vpack.c.bf16 %v1859_v48, %v1858_v46  ;;  %v1844_v35 = vld [vmem:[%s11863_s7 + $0x460] sm:$0xff]  ;;  %v1845_v36 = vld [vmem:[%s11863_s7 + $0x468] sm:$0xff] }
 0x2da   :  { %6855 = vmatpush3.bf16.msra.mxu1 %v6854_v11  ;;  %v1861_v11 = vld [vmem:[%s11863_s7 + $0x4e8] sm:$0xff]  ;;  %v6838_v32 = vpack.c.bf16 %v1843_v4, %v1842_v28  ;;  %v1890_v46 = vld [vmem:[%s11863_s7 + $0x5d0] sm:$0xff]  ;;  %v1891_v48 = vld [vmem:[%s11863_s7 + $0x5d8] sm:$0xff] }
 0x2db   :  { %6831 = vmatpush3.bf16.msra.mxu0 %v6830_v27  ;;  %6857 = vmatprep.subr.bf16.mxu1 %v6856_v56  ;;  %v6862_v27 = vpack.c.bf16 %v1871_v60, %v1870_v57  ;;  %v479_v57 = vrot.slane %v8604_v43, %v8630_v55  ;;  %v6842_v60 = vpack.c.bf16 %v1845_v36, %v1844_v35  ;;  %v1846_v4 = vld [vmem:[%s11863_s7 + $0x470] sm:$0xff]  ;;  %v1877_v36 = vld [vmem:[%s11863_s7 + $0x568] sm:$0xff] }
 0x2dc   :  { %6833 = vmatprep.subr.bf16.mxu0 %v6832_v9  ;;  %v1872_v9 = vld [vmem:[%s11863_s7 + $0x540] sm:$0xff]  ;;  %v6868_v28 = vpack.c.bf16 %v1891_v48, %v1890_v46  ;;  %v483_v55 = vrot.slane %v8604_v43, %v8644_v59  ;;  %v9144_v46 = vadd.f32 %v8623_v51, %v407_v5  ;;  %v1895_v51 = vld [vmem:[%s11863_s7 + $0x5f8] sm:$0xff]  ;;  %v1878_v5 = vld [vmem:[%s11863_s7 + $0x570] sm:$0xff] }
 0x2dd   :  { %v1912_v59 = vld [vmem:[%s11863_s7 + $0x680] sm:$0xff] }
 0x2de   :  { %6859 = vmatpush3.bf16.msra.mxu1 %v6858_v49  ;;  %v1383_v26 = vpop.f32.mrb[16].mxu1  ;;  %v1862_v49 = vld [vmem:[%s11863_s7 + $0x4f0] sm:$0xff] }
 0x2df   :  { %v9075_v56 = vadd.f32 %v1383_v26, %v463_v42  ;;  %6835 = vmatpush3.bf16.msra.mxu0 %v6834_v50  ;;  %v1385_v40 = vpop.f32.mrb[17].mxu1  ;;  %6861 = vmatprep.subr.bf16.mxu1 %v6860_v53  ;;  %v6840_v42 = vpack.c.bf16 %v1861_v11, %v1860_v47  ;;  %v1863_v50 = vld [vmem:[%s11863_s7 + $0x4f8] sm:$0xff]  ;;  %v6866_v53 = vpack.c.bf16 %v1873_v34, %v1872_v9  ;;  %v1892_v11 = vld [vmem:[%s11863_s7 + $0x5e0] sm:$0xff]  ;;  %v1893_v26 = vld [vmem:[%s11863_s7 + $0x5e8] sm:$0xff] }
 0x2e0   :  { %v9086_v41 = vadd.f32 %v1385_v40, %v467_v62  ;;  %6837 = vmatprep.subr.bf16.mxu0 %v6836_v1  ;;  %v1874_v62 = vld [vmem:[%s11863_s7 + $0x550] sm:$0xff]  ;;  %v1875_v1 = vld [vmem:[%s11863_s7 + $0x558] sm:$0xff]  ;;  %v6844_v10 = vpack.c.bf16 %v1863_v50, %v1862_v49  ;;  %v1913_v40 = vld [vmem:[%s11863_s7 + $0x688] sm:$0xff] }
 0x2e1   :  { %v1847_v47 = vld [vmem:[%s11863_s7 + $0x478] sm:$0xff]  ;;  %v6880_v49 = vpack.c.bf16 %v1913_v40, %v1912_v59  ;;  %v1896_v50 = vld [vmem:[%s11863_s7 + $0x600] sm:$0xff]  ;;  %v1945_v40 = vld [vmem:[%s11863_s7 + $0x788] sm:$0xff] }
 0x2e2   :  { %6863 = vmatpush3.bf16.msra.mxu1 %v6862_v27  ;;  %v427_v27 = vrot.slane %v8590_v39, %v8709_v30  ;;  %v6846_v35 = vpack.c.bf16 %v1847_v47, %v1846_v4  ;;  %v1876_v30 = vld [vmem:[%s11863_s7 + $0x560] sm:$0xff]  ;;  %v435_v4 = vrot.slane %v8590_v39, %v8765_v18  ;;  %v1680_v47 = vmul.f32 %v9144_v46, %v9144_v46 }
 0x2e3   :  { %6839 = vmatpush3.bf16.msra.mxu0 %v6838_v32  ;;  %6865 = vmatprep.subr.bf16.mxu1 %v6864_v54  ;;  %v6870_v54 = vpack.c.bf16 %v1875_v1, %v1874_v62  ;;  %v1915_v62 = vld [vmem:[%s11863_s7 + $0x698] sm:$0xff]  ;;  %v6874_v1 = vpack.c.bf16 %v1877_v36, %v1876_v30  ;;  %v499_v39 = vrot.slane %v8604_v43, %v8765_v18  ;;  %v1944_v59 = vld [vmem:[%s11863_s7 + $0x780] sm:$0xff] }
 0x2e4   :  { %6841 = vmatprep.subr.bf16.mxu0 %v6840_v42  ;;  %v6872_v42 = vpack.c.bf16 %v1893_v26, %v1892_v11  ;;  %v1916_v18 = vld [vmem:[%s11863_s7 + $0x6a0] sm:$0xff]  ;;  %v9216_v38 = vadd.f32 %v8959_v25, %v435_v4  ;;  %v1918_v25 = vld [vmem:[%s11863_s7 + $0x6b0] sm:$0xff] }
 0x2e6   :  { %6867 = vmatpush3.bf16.msra.mxu1 %v6866_v53  ;;  %v1525_v32 = vpop.f32.mrb[18].mxu1  ;;  %v1897_v53 = vld [vmem:[%s11863_s7 + $0x608] sm:$0xff] }
 0x2e7   :  { %v9135_v9 = vadd.f32 %v1525_v32, %v479_v57  ;;  %6843 = vmatpush3.bf16.msra.mxu0 %v6842_v60  ;;  %v1527_v34 = vpop.f32.mrb[19].mxu1  ;;  %6869 = vmatprep.subr.bf16.mxu1 %v6868_v28  ;;  %v1894_v57 = vld [vmem:[%s11863_s7 + $0x5f0] sm:$0xff]  ;;  %v9158_v60 = vadd.f32 %v8684_v19, %v427_v27  ;;  %v6882_v19 = vpack.c.bf16 %v1897_v53, %v1896_v50  ;;  %v1899_v27 = vld [vmem:[%s11863_s7 + $0x618] sm:$0xff]  ;;  %v1928_v50 = vld [vmem:[%s11863_s7 + $0x700] sm:$0xff] }
 0x2e8   :  { %v9146_v48 = vadd.f32 %v1527_v34, %v483_v55  ;;  %6845 = vmatprep.subr.bf16.mxu0 %v6844_v10  ;;  %v1914_v28 = vld [vmem:[%s11863_s7 + $0x690] sm:$0xff]  ;;  %v1879_v55 = vld [vmem:[%s11863_s7 + $0x578] sm:$0xff]  ;;  %v6876_v11 = vpack.c.bf16 %v1895_v51, %v1894_v57  ;;  %v1929_v53 = vld [vmem:[%s11863_s7 + $0x708] sm:$0xff] }
 0x2e9   :  { %v1898_v10 = vld [vmem:[%s11863_s7 + $0x610] sm:$0xff]  ;;  %v6884_v26 = vpack.c.bf16 %v1915_v62, %v1914_v28  ;;  %v1685_v32 = vmul.f32 %v9158_v60, %v9158_v60  ;;  %v1900_v57 = vld [vmem:[%s11863_s7 + $0x620] sm:$0xff]  ;;  %v1901_v51 = vld [vmem:[%s11863_s7 + $0x628] sm:$0xff]  ;;  %v6914_v4 = vpack.c.bf16 %v1929_v53, %v1928_v50 }
 0x2ea   :  { %6871 = vmatpush3.bf16.msra.mxu1 %v6870_v54  ;;  %v1917_v54 = vld [vmem:[%s11863_s7 + $0x6a8] sm:$0xff]  ;;  %v6886_v36 = vpack.c.bf16 %v1899_v27, %v1898_v10  ;;  %v1946_v28 = vld [vmem:[%s11863_s7 + $0x790] sm:$0xff]  ;;  %v1947_v62 = vld [vmem:[%s11863_s7 + $0x798] sm:$0xff] }
 0x2eb   :  { %6847 = vmatpush3.bf16.msra.mxu0 %v6846_v35  ;;  %6873 = vmatprep.subr.bf16.mxu1 %v6872_v42  ;;  %v6878_v35 = vpack.c.bf16 %v1879_v55, %v1878_v5  ;;  %v6890_v5 = vpack.c.bf16 %v1901_v51, %v1900_v57  ;;  %v6916_v55 = vpack.c.bf16 %v1947_v62, %v1946_v28  ;;  %v1930_v10 = vld [vmem:[%s11863_s7 + $0x710] sm:$0xff]  ;;  %v1903_v27 = vld [vmem:[%s11863_s7 + $0x638] sm:$0xff]  ;;  %v1905_v53 = vld [vmem:[%s11863_s7 + $0x648] sm:$0xff] }
 0x2ec   :  { %6881 = vmatprep.subr.bf16.mxu0 %v6880_v49  ;;  %v6912_v49 = vpack.c.bf16 %v1945_v40, %v1944_v59  ;;  %v1948_v59 = vld [vmem:[%s11863_s7 + $0x7a0] sm:$0xff]  ;;  %v1949_v40 = vld [vmem:[%s11863_s7 + $0x7a8] sm:$0xff]  ;;  %v1950_v57 = vld [vmem:[%s11863_s7 + $0x7b0] sm:$0xff] }
 0x2ed   :  { %v1922_v51 = vld [vmem:[%s11863_s7 + $0x6d0] sm:$0xff]  ;;  %v1923_v28 = vld [vmem:[%s11863_s7 + $0x6d8] sm:$0xff] }
 0x2ee   :  { %2561 = vmatmul.mubr.f32.vlgmr.msra.gmra.mrb[18].mxu0 %v1680_v47  ;;  %6875 = vmatpush3.bf16.msra.mxu1 %v6874_v1  ;;  %v1667_v34 = vpop.f32.mrb[20].mxu1  ;;  %v1919_v1 = vld [vmem:[%s11863_s7 + $0x6b8] sm:$0xff] }
 0x2ef   :  { %v9204_v42 = vadd.f32 %v1667_v34, %v495_v44  ;;  %6883 = vmatpush3.bf16.msra.mxu0 %v6882_v19  ;;  %2700 = vmatprep.mubr.f32.mxu0 %v1685_v32  ;;  %v1669_v30 = vpop.f32.mrb[21].mxu1  ;;  %v6888_v44 = vpack.c.bf16 %v1917_v54, %v1916_v18  ;;  %v1682_v19 = vmul.f32 %v8882_v8, %v8882_v8  ;;  %v1931_v47 = vld [vmem:[%s11863_s7 + $0x718] sm:$0xff]  ;;  %v1920_v32 = vld [vmem:[%s11863_s7 + $0x6c0] sm:$0xff]  ;;  %v1921_v18 = vld [vmem:[%s11863_s7 + $0x6c8] sm:$0xff] }
 0x2f0   :  { %v9218_v43 = vadd.f32 %v1669_v30, %v499_v39  ;;  %6877 = vmatprep.subr.bf16.mxu1 %v6876_v11  ;;  %6885 = vmatprep.subr.bf16.mxu0 %v6884_v26  ;;  %v1902_v39 = vld [vmem:[%s11863_s7 + $0x630] sm:$0xff]  ;;  %v1687_v11 = vmul.f32 %v9216_v38, %v9216_v38  ;;  %v6892_v26 = vpack.c.bf16 %v1919_v1, %v1918_v25  ;;  %v1932_v30 = vld [vmem:[%s11863_s7 + $0x720] sm:$0xff] }
 0x2f1   :  { %v6918_v54 = vpack.c.bf16 %v1931_v47, %v1930_v10  ;;  %v6894_v34 = vpack.c.bf16 %v1903_v27, %v1902_v39  ;;  %v6896_v50 = vpack.c.bf16 %v1921_v18, %v1920_v32  ;;  %v1907_v10 = vld [vmem:[%s11863_s7 + $0x658] sm:$0xff]  ;;  %v1952_v47 = vld [vmem:[%s11863_s7 + $0x7c0] sm:$0xff]  ;;  %v1953_v39 = vld [vmem:[%s11863_s7 + $0x7c8] sm:$0xff] }
 0x2f2   :  { %6879 = vmatpush3.bf16.msra.mxu1 %v6878_v35  ;;  %v6920_v35 = vpack.c.bf16 %v1949_v40, %v1948_v59  ;;  %v6928_v40 = vpack.c.bf16 %v1953_v39, %v1952_v47  ;;  %v1936_v32 = vld [vmem:[%s11863_s7 + $0x740] sm:$0xff]  ;;  %v1937_v18 = vld [vmem:[%s11863_s7 + $0x748] sm:$0xff] }
 0x2f3   :  { %6887 = vmatpush3.bf16.msra.mxu0 %v6886_v36  ;;  %6913 = vmatprep.subr.bf16.mxu1 %v6912_v49  ;;  %v1933_v36 = vld [vmem:[%s11863_s7 + $0x728] sm:$0xff]  ;;  %v1904_v49 = vld [vmem:[%s11863_s7 + $0x640] sm:$0xff] }
 0x2f4   :  { %6889 = vmatprep.subr.bf16.mxu0 %v6888_v44  ;;  %v1951_v44 = vld [vmem:[%s11863_s7 + $0x7b8] sm:$0xff]  ;;  %v6922_v62 = vpack.c.bf16 %v1933_v36, %v1932_v30  ;;  %v6898_v25 = vpack.c.bf16 %v1905_v53, %v1904_v49  ;;  %v1954_v30 = vld [vmem:[%s11863_s7 + $0x7d0] sm:$0xff]  ;;  %v6930_v53 = vpack.c.bf16 %v1937_v18, %v1936_v32 }
 0x2f5   :  { %2631 = vmatmul.mubr.f32.vlgmr.msra.gmra.mrb[26].mxu1 %v1682_v19  ;;  %v6924_v1 = vpack.c.bf16 %v1951_v44, %v1950_v57  ;;  %v1935_v19 = vld [vmem:[%s11863_s7 + $0x738] sm:$0xff]  ;;  %v1926_v49 = vld [vmem:[%s11863_s7 + $0x6f0] sm:$0xff] }
 0x2f6   :  { %6915 = vmatpush3.bf16.msra.mxu1 %v6914_v4  ;;  %2770 = vmatprep.mubr.f32.mxu1 %v1687_v11  ;;  %v1934_v4 = vld [vmem:[%s11863_s7 + $0x730] sm:$0xff]  ;;  %v1924_v11 = vld [vmem:[%s11863_s7 + $0x6e0] sm:$0xff]  ;;  %v1955_v36 = vld [vmem:[%s11863_s7 + $0x7d8] sm:$0xff] }
 0x2f7   :  { %6891 = vmatpush3.bf16.msra.mxu0 %v6890_v5  ;;  %6917 = vmatprep.subr.bf16.mxu1 %v6916_v55  ;;  %v1906_v5 = vld [vmem:[%s11863_s7 + $0x650] sm:$0xff]  ;;  %v6900_v55 = vpack.c.bf16 %v1923_v28, %v1922_v51  ;;  %v6926_v27 = vpack.c.bf16 %v1935_v19, %v1934_v4  ;;  %v6932_v44 = vpack.c.bf16 %v1955_v36, %v1954_v30  ;;  %v1939_v28 = vld [vmem:[%s11863_s7 + $0x758] sm:$0xff]  ;;  %v1956_v4 = vld [vmem:[%s11863_s7 + $0x7e0] sm:$0xff] }
 0x2f8   :  { %6893 = vmatprep.subr.bf16.mxu0 %v6892_v26  ;;  %v1925_v26 = vld [vmem:[%s11863_s7 + $0x6e8] sm:$0xff]  ;;  %v6902_v59 = vpack.c.bf16 %v1907_v10, %v1906_v5  ;;  %v1938_v51 = vld [vmem:[%s11863_s7 + $0x750] sm:$0xff]  ;;  %v1976_v5 = vld [vmem:[%s11863_s7 + $0x880] sm:$0xff] }
 0x2f9   :  { %v1957_v19 = vld [vmem:[%s11863_s7 + $0x7e8] sm:$0xff]  ;;  %v6934_v10 = vpack.c.bf16 %v1939_v28, %v1938_v51  ;;  %v1958_v32 = vld [vmem:[%s11863_s7 + $0x7f0] sm:$0xff]  ;;  %v1959_v18 = vld [vmem:[%s11863_s7 + $0x7f8] sm:$0xff] }
 0x2fa   :  { %6919 = vmatpush3.bf16.msra.mxu1 %v6918_v54  ;;  %v1908_v54 = vld [vmem:[%s11863_s7 + $0x660] sm:$0xff]  ;;  %v6936_v39 = vpack.c.bf16 %v1957_v19, %v1956_v4  ;;  %v1942_v36 = vld [vmem:[%s11863_s7 + $0x770] sm:$0xff]  ;;  %v1963_v51 = vld [vmem:[%s11863_s7 + $0x818] sm:$0xff] }
 0x2fb   :  { %6895 = vmatpush3.bf16.msra.mxu0 %v6894_v34  ;;  %6921 = vmatprep.subr.bf16.mxu1 %v6920_v35  ;;  %v6904_v34 = vpack.c.bf16 %v1925_v26, %v1924_v11  ;;  %v1909_v35 = vld [vmem:[%s11863_s7 + $0x668] sm:$0xff]  ;;  %v1940_v11 = vld [vmem:[%s11863_s7 + $0x760] sm:$0xff] }
 0x2fc   :  { %6897 = vmatprep.subr.bf16.mxu0 %v6896_v50  ;;  %v1927_v50 = vld [vmem:[%s11863_s7 + $0x6f8] sm:$0xff]  ;;  %v6906_v57 = vpack.c.bf16 %v1909_v35, %v1908_v54  ;;  %v1941_v26 = vld [vmem:[%s11863_s7 + $0x768] sm:$0xff]  ;;  %v1978_v54 = vld [vmem:[%s11863_s7 + $0x890] sm:$0xff] }
 0x2fd   :  { %v6938_v35 = vpack.c.bf16 %v1941_v26, %v1940_v11  ;;  %v2008_v28 = vld [vmem:[%s11863_s7 + $0x980] sm:$0xff]  ;;  %v1981_v4 = vld [vmem:[%s11863_s7 + $0x8a8] sm:$0xff] }
 0x2fe   :  { %6923 = vmatpush3.bf16.msra.mxu1 %v6922_v62  ;;  %v1910_v62 = vld [vmem:[%s11863_s7 + $0x670] sm:$0xff]  ;;  %v1965_v26 = vld [vmem:[%s11863_s7 + $0x828] sm:$0xff] }
 0x2ff   :  { %6899 = vmatpush3.bf16.msra.mxu0 %v6898_v25  ;;  %6925 = vmatprep.subr.bf16.mxu1 %v6924_v1  ;;  %v6908_v25 = vpack.c.bf16 %v1927_v50, %v1926_v49  ;;  %v1911_v1 = vld [vmem:[%s11863_s7 + $0x678] sm:$0xff]  ;;  %v1962_v50 = vld [vmem:[%s11863_s7 + $0x810] sm:$0xff] }
 0x300   :  { %6901 = vmatprep.subr.bf16.mxu0 %v6900_v55  ;;  %v1977_v55 = vld [vmem:[%s11863_s7 + $0x888] sm:$0xff]  ;;  %v6910_v47 = vpack.c.bf16 %v1911_v1, %v1910_v62  ;;  %v1943_v49 = vld [vmem:[%s11863_s7 + $0x778] sm:$0xff]  ;;  %v1980_v1 = vld [vmem:[%s11863_s7 + $0x8a0] sm:$0xff] }
 0x301   :  { %v2009_v62 = vld [vmem:[%s11863_s7 + $0x988] sm:$0xff]  ;;  %v6942_v19 = vpack.c.bf16 %v1943_v49, %v1942_v36  ;;  %v6952_v11 = vpack.c.bf16 %v1981_v4, %v1980_v1  ;;  %v1995_v36 = vld [vmem:[%s11863_s7 + $0x918] sm:$0xff]  ;;  %v1966_v49 = vld [vmem:[%s11863_s7 + $0x830] sm:$0xff] }
 0x302   :  { %6927 = vmatpush3.bf16.msra.mxu1 %v6926_v27  ;;  %v6944_v27 = vpack.c.bf16 %v1977_v55, %v1976_v5  ;;  %v6950_v5 = vpack.c.bf16 %v1963_v51, %v1962_v50  ;;  %v6976_v55 = vpack.c.bf16 %v2009_v62, %v2008_v28  ;;  %v1691_v50 = vmul.f32 %v9029_v33, %v9029_v33  ;;  %v2013_v51 = vld [vmem:[%s11863_s7 + $0x9a8] sm:$0xff]  ;;  %v1984_v28 = vld [vmem:[%s11863_s7 + $0x8c0] sm:$0xff] }
 0x303   :  { %6903 = vmatpush3.bf16.msra.mxu0 %v6902_v59  ;;  %6929 = vmatprep.subr.bf16.mxu1 %v6928_v40  ;;  %v1960_v59 = vld [vmem:[%s11863_s7 + $0x800] sm:$0xff]  ;;  %v1961_v40 = vld [vmem:[%s11863_s7 + $0x808] sm:$0xff] }
 0x304   :  { %6905 = vmatprep.subr.bf16.mxu0 %v6904_v34  ;;  %v1979_v34 = vld [vmem:[%s11863_s7 + $0x898] sm:$0xff]  ;;  %v6946_v30 = vpack.c.bf16 %v1961_v40, %v1960_v59  ;;  %v1982_v40 = vld [vmem:[%s11863_s7 + $0x8b0] sm:$0xff]  ;;  %v1985_v62 = vld [vmem:[%s11863_s7 + $0x8c8] sm:$0xff] }
 0x305   :  { %v2011_v59 = vld [vmem:[%s11863_s7 + $0x998] sm:$0xff] }
 0x306   :  { %6931 = vmatpush3.bf16.msra.mxu1 %v6930_v53  ;;  %v1684_v53 = vmul.f32 %v8682_v17, %v8682_v17 }
 0x307   :  { %6907 = vmatpush3.bf16.msra.mxu0 %v6906_v57  ;;  %6933 = vmatprep.subr.bf16.mxu1 %v6932_v44  ;;  %v6940_v57 = vpack.c.bf16 %v1959_v18, %v1958_v32  ;;  %v6948_v44 = vpack.c.bf16 %v1979_v34, %v1978_v54  ;;  %v1983_v32 = vld [vmem:[%s11863_s7 + $0x8b8] sm:$0xff]  ;;  %v1686_v54 = vmul.f32 %v8955_v22, %v8955_v22 }
 0x308   :  { %6909 = vmatprep.subr.bf16.mxu0 %v6908_v25  ;;  %v1689_v25 = vmul.f32 %v8762_v15, %v8762_v15 }
 0x30a   :  { %6935 = vmatpush3.bf16.msra.mxu1 %v6934_v10  ;;  %v1992_v10 = vld [vmem:[%s11863_s7 + $0x900] sm:$0xff] }
 0x30b   :  { %6911 = vmatpush3.bf16.msra.mxu0 %v6910_v47  ;;  %6937 = vmatprep.subr.bf16.mxu1 %v6936_v39  ;;  %v1993_v47 = vld [vmem:[%s11863_s7 + $0x908] sm:$0xff]  ;;  %v1964_v39 = vld [vmem:[%s11863_s7 + $0x820] sm:$0xff] }
 0x30c   :  { %6945 = vmatprep.subr.bf16.mxu0 %v6944_v27  ;;  %v2010_v27 = vld [vmem:[%s11863_s7 + $0x990] sm:$0xff]  ;;  %v6978_v18 = vpack.c.bf16 %v1993_v47, %v1992_v10  ;;  %v6954_v34 = vpack.c.bf16 %v1965_v26, %v1964_v39  ;;  %v6960_v10 = vpack.c.bf16 %v1985_v62, %v1984_v28  ;;  %v1969_v47 = vld [vmem:[%s11863_s7 + $0x848] sm:$0xff]  ;;  %v2000_v28 = vld [vmem:[%s11863_s7 + $0x940] sm:$0xff] }
 0x30d   :  { %v2014_v39 = vld [vmem:[%s11863_s7 + $0x9b0] sm:$0xff]  ;;  %v2001_v62 = vld [vmem:[%s11863_s7 + $0x948] sm:$0xff] }
 0x30e   :  { %2701 = vmatmul.mubr.f32.vlgmr.msra.gmra.mrb[20].mxu0 %v1684_v53  ;;  %6939 = vmatpush3.bf16.msra.mxu1 %v6938_v35  ;;  %v6980_v35 = vpack.c.bf16 %v2011_v59, %v2010_v27  ;;  %v6956_v53 = vpack.c.bf16 %v1983_v32, %v1982_v40  ;;  %v1986_v26 = vld [vmem:[%s11863_s7 + $0x8d0] sm:$0xff]  ;;  %v1987_v27 = vld [vmem:[%s11863_s7 + $0x8d8] sm:$0xff] }
 0x30f   :  { %6947 = vmatpush3.bf16.msra.mxu0 %v6946_v30  ;;  %2840 = vmatprep.mubr.f32.mxu0 %v1689_v25  ;;  %v1994_v30 = vld [vmem:[%s11863_s7 + $0x910] sm:$0xff] }
 0x310   :  { %6941 = vmatprep.subr.bf16.mxu1 %v6940_v57  ;;  %6949 = vmatprep.subr.bf16.mxu0 %v6948_v44  ;;  %v1967_v57 = vld [vmem:[%s11863_s7 + $0x838] sm:$0xff]  ;;  %v2012_v44 = vld [vmem:[%s11863_s7 + $0x9a0] sm:$0xff]  ;;  %v6982_v25 = vpack.c.bf16 %v1995_v36, %v1994_v30 }
 0x311   :  { %v6958_v1 = vpack.c.bf16 %v1967_v57, %v1966_v49  ;;  %v6984_v4 = vpack.c.bf16 %v2013_v51, %v2012_v44  ;;  %v1971_v30 = vld [vmem:[%s11863_s7 + $0x858] sm:$0xff]  ;;  %v2016_v36 = vld [vmem:[%s11863_s7 + $0x9c0] sm:$0xff]  ;;  %v2017_v49 = vld [vmem:[%s11863_s7 + $0x9c8] sm:$0xff] }
 0x312   :  { %6943 = vmatpush3.bf16.msra.mxu1 %v6942_v19  ;;  %v1996_v19 = vld [vmem:[%s11863_s7 + $0x920] sm:$0xff]  ;;  %v6992_v51 = vpack.c.bf16 %v2017_v49, %v2016_v36  ;;  %v2041_v36 = vld [vmem:[%s11863_s7 + $0xa88] sm:$0xff] }
 0x313   :  { %6951 = vmatpush3.bf16.msra.mxu0 %v6950_v5  ;;  %6977 = vmatprep.subr.bf16.mxu1 %v6976_v55  ;;  %v1997_v5 = vld [vmem:[%s11863_s7 + $0x928] sm:$0xff]  ;;  %v1968_v55 = vld [vmem:[%s11863_s7 + $0x840] sm:$0xff] }
 0x314   :  { %6953 = vmatprep.subr.bf16.mxu0 %v6952_v11  ;;  %v2015_v11 = vld [vmem:[%s11863_s7 + $0x9b8] sm:$0xff]  ;;  %v6986_v59 = vpack.c.bf16 %v1997_v5, %v1996_v19  ;;  %v6962_v40 = vpack.c.bf16 %v1969_v47, %v1968_v55  ;;  %v2018_v19 = vld [vmem:[%s11863_s7 + $0x9d0] sm:$0xff]  ;;  %v6994_v47 = vpack.c.bf16 %v2001_v62, %v2000_v28  ;;  %v2024_v62 = vld [vmem:[%s11863_s7 + $0xa00] sm:$0xff] }
 0x315   :  { %2771 = vmatmul.mubr.f32.vlgmr.msra.gmra.mrb[28].mxu1 %v1686_v54  ;;  %v6988_v32 = vpack.c.bf16 %v2015_v11, %v2014_v39  ;;  %v1999_v54 = vld [vmem:[%s11863_s7 + $0x938] sm:$0xff]  ;;  %v1990_v55 = vld [vmem:[%s11863_s7 + $0x8f0] sm:$0xff] }
 0x316   :  { %6979 = vmatpush3.bf16.msra.mxu1 %v6978_v18  ;;  %2910 = vmatprep.mubr.f32.mxu1 %v1691_v50  ;;  %v1998_v18 = vld [vmem:[%s11863_s7 + $0x930] sm:$0xff]  ;;  %v1988_v50 = vld [vmem:[%s11863_s7 + $0x8e0] sm:$0xff]  ;;  %v2019_v5 = vld [vmem:[%s11863_s7 + $0x9d8] sm:$0xff] }
 0x317   :  { %6955 = vmatpush3.bf16.msra.mxu0 %v6954_v34  ;;  %6981 = vmatprep.subr.bf16.mxu1 %v6980_v35  ;;  %v1970_v34 = vld [vmem:[%s11863_s7 + $0x850] sm:$0xff]  ;;  %v6964_v35 = vpack.c.bf16 %v1987_v27, %v1986_v26  ;;  %v6990_v57 = vpack.c.bf16 %v1999_v54, %v1998_v18  ;;  %v6996_v11 = vpack.c.bf16 %v2019_v5, %v2018_v19  ;;  %v2003_v27 = vld [vmem:[%s11863_s7 + $0x958] sm:$0xff] }
 0x318   :  { %6957 = vmatprep.subr.bf16.mxu0 %v6956_v53  ;;  %v1989_v53 = vld [vmem:[%s11863_s7 + $0x8e8] sm:$0xff]  ;;  %v6966_v44 = vpack.c.bf16 %v1971_v30, %v1970_v34  ;;  %v2002_v26 = vld [vmem:[%s11863_s7 + $0x950] sm:$0xff]  ;;  %v1975_v54 = vld [vmem:[%s11863_s7 + $0x878] sm:$0xff] }
 0x319   :  { %v2020_v34 = vld [vmem:[%s11863_s7 + $0x9e0] sm:$0xff]  ;;  %v6998_v49 = vpack.c.bf16 %v2003_v27, %v2002_v26  ;;  %v2043_v19 = vld [vmem:[%s11863_s7 + $0xa98] sm:$0xff] }
 0x31a   :  { %6983 = vmatpush3.bf16.msra.mxu1 %v6982_v25  ;;  %v1972_v25 = vld [vmem:[%s11863_s7 + $0x860] sm:$0xff] }
 0x31b   :  { %6959 = vmatpush3.bf16.msra.mxu0 %v6958_v1  ;;  %6985 = vmatprep.subr.bf16.mxu1 %v6984_v4  ;;  %v6968_v1 = vpack.c.bf16 %v1989_v53, %v1988_v50  ;;  %v1973_v4 = vld [vmem:[%s11863_s7 + $0x868] sm:$0xff]  ;;  %v2040_v30 = vld [vmem:[%s11863_s7 + $0xa80] sm:$0xff] }
 0x31c   :  { %6961 = vmatprep.subr.bf16.mxu0 %v6960_v10  ;;  %v1991_v10 = vld [vmem:[%s11863_s7 + $0x8f8] sm:$0xff]  ;;  %v6970_v39 = vpack.c.bf16 %v1973_v4, %v1972_v25  ;;  %v7008_v28 = vpack.c.bf16 %v2041_v36, %v2040_v30  ;;  %v2025_v25 = vld [vmem:[%s11863_s7 + $0xa08] sm:$0xff] }
 0x31d   :  { %v6972_v18 = vpack.c.bf16 %v1991_v10, %v1990_v55  ;;  %v2023_v4 = vld [vmem:[%s11863_s7 + $0x9f8] sm:$0xff]  ;;  %v7010_v55 = vpack.c.bf16 %v2025_v25, %v2024_v62  ;;  %v2006_v10 = vld [vmem:[%s11863_s7 + $0x970] sm:$0xff] }
 0x31e   :  { %6987 = vmatpush3.bf16.msra.mxu1 %v6986_v59  ;;  %v1974_v59 = vld [vmem:[%s11863_s7 + $0x870] sm:$0xff]  ;;  %v2075_v62 = vld [vmem:[%s11863_s7 + $0xb98] sm:$0xff] }
 0x31f   :  { %6963 = vmatpush3.bf16.msra.mxu0 %v6962_v40  ;;  %6989 = vmatprep.subr.bf16.mxu1 %v6988_v32  ;;  %v7736_v40 = vld [vmem:[%s11862_s6 + $0x10] sm:$0xff]  ;;  %v6974_v50 = vpack.c.bf16 %v1975_v54, %v1974_v59  ;;  %v2027_v59 = vld [vmem:[%s11863_s7 + $0xa18] sm:$0xff]  ;;  %v2044_v54 = vld [vmem:[%s11863_s7 + $0xaa0] sm:$0xff] }
 0x320   :  { %6965 = vmatprep.subr.bf16.mxu0 %v6964_v35  ;;  %v439_v32 = vrot.slane %v7736_v40, %v8609_v45  ;;  %v2021_v35 = vld [vmem:[%s11863_s7 + $0x9e8] sm:$0xff]  ;;  %v2072_v40 = vld [vmem:[%s11863_s7 + $0xb80] sm:$0xff]  ;;  %v2046_v25 = vld [vmem:[%s11863_s7 + $0xab0] sm:$0xff] }
 0x321   :  { %v7000_v53 = vpack.c.bf16 %v2021_v35, %v2020_v34  ;;  %v2045_v34 = vld [vmem:[%s11863_s7 + $0xaa8] sm:$0xff] }
 0x322   :  { %6991 = vmatpush3.bf16.msra.mxu1 %v6990_v57  ;;  %v2004_v57 = vld [vmem:[%s11863_s7 + $0x960] sm:$0xff] }
 0x323   :  { %6967 = vmatpush3.bf16.msra.mxu0 %v6966_v44  ;;  %6993 = vmatprep.subr.bf16.mxu1 %v6992_v51  ;;  %v2005_v44 = vld [vmem:[%s11863_s7 + $0x968] sm:$0xff]  ;;  %v9570_v51 = vadd.f32 %v8743_v0, %v439_v32  ;;  %v2042_v0 = vld [vmem:[%s11863_s7 + $0xa90] sm:$0xff] }
 0x324   :  { %6969 = vmatprep.subr.bf16.mxu0 %v6968_v1  ;;  %v2022_v1 = vld [vmem:[%s11863_s7 + $0x9f0] sm:$0xff]  ;;  %v7002_v5 = vpack.c.bf16 %v2005_v44, %v2004_v57  ;;  %v7012_v27 = vpack.c.bf16 %v2043_v19, %v2042_v0  ;;  %v2073_v32 = vld [vmem:[%s11863_s7 + $0xb88] sm:$0xff]  ;;  %v7016_v57 = vpack.c.bf16 %v2045_v34, %v2044_v54  ;;  %v1690_v0 = vmul.f32 %v9018_v20, %v9018_v20 }
 0x325   :  { %v7004_v26 = vpack.c.bf16 %v2023_v4, %v2022_v1  ;;  %v7040_v36 = vpack.c.bf16 %v2073_v32, %v2072_v40  ;;  %v2029_v44 = vld [vmem:[%s11863_s7 + $0xa28] sm:$0xff]  ;;  %v2047_v1 = vld [vmem:[%s11863_s7 + $0xab8] sm:$0xff]  ;;  %v2048_v40 = vld [vmem:[%s11863_s7 + $0xac0] sm:$0xff] }
 0x326   :  { %6995 = vmatpush3.bf16.msra.mxu1 %v6994_v47  ;;  %v2007_v47 = vld [vmem:[%s11863_s7 + $0x978] sm:$0xff]  ;;  %v2049_v32 = vld [vmem:[%s11863_s7 + $0xac8] sm:$0xff] }
 0x327   :  { %6971 = vmatpush3.bf16.msra.mxu0 %v6970_v39  ;;  %6997 = vmatprep.subr.bf16.mxu1 %v6996_v11  ;;  %v2026_v39 = vld [vmem:[%s11863_s7 + $0xa10] sm:$0xff]  ;;  %v1688_v11 = vmul.f32 %v9570_v51, %v9570_v51  ;;  %v7006_v35 = vpack.c.bf16 %v2007_v47, %v2006_v10  ;;  %v2059_v10 = vld [vmem:[%s11863_s7 + $0xb18] sm:$0xff] }
 0x328   :  { %6973 = vmatprep.subr.bf16.mxu0 %v6972_v18  ;;  %v1693_v18 = vmul.f32 %v8829_v13, %v8829_v13  ;;  %v7014_v30 = vpack.c.bf16 %v2027_v59, %v2026_v39  ;;  %v2030_v47 = vld [vmem:[%s11863_s7 + $0xa30] sm:$0xff]  ;;  %v1695_v39 = vmul.f32 %v9086_v41, %v9086_v41  ;;  %v2077_v59 = vld [vmem:[%s11863_s7 + $0xba8] sm:$0xff] }
 0x32a   :  { %6999 = vmatpush3.bf16.msra.mxu1 %v6998_v49  ;;  %v2056_v49 = vld [vmem:[%s11863_s7 + $0xb00] sm:$0xff] }
 0x32b   :  { %6975 = vmatpush3.bf16.msra.mxu0 %v6974_v50  ;;  %7001 = vmatprep.subr.bf16.mxu1 %v7000_v53  ;;  %v2057_v50 = vld [vmem:[%s11863_s7 + $0xb08] sm:$0xff]  ;;  %v2028_v53 = vld [vmem:[%s11863_s7 + $0xa20] sm:$0xff] }
 0x32c   :  { %7009 = vmatprep.subr.bf16.mxu0 %v7008_v28  ;;  %v2074_v28 = vld [vmem:[%s11863_s7 + $0xb90] sm:$0xff]  ;;  %v7042_v4 = vpack.c.bf16 %v2057_v50, %v2056_v49  ;;  %v7018_v19 = vpack.c.bf16 %v2029_v44, %v2028_v53  ;;  %v7024_v49 = vpack.c.bf16 %v2049_v32, %v2048_v40  ;;  %v2033_v50 = vld [vmem:[%s11863_s7 + $0xa48] sm:$0xff]  ;;  %v2064_v40 = vld [vmem:[%s11863_s7 + $0xb40] sm:$0xff] }
 0x32d   :  { %v2078_v53 = vld [vmem:[%s11863_s7 + $0xbb0] sm:$0xff]  ;;  %v2065_v32 = vld [vmem:[%s11863_s7 + $0xb48] sm:$0xff] }
 0x32e   :  { %2841 = vmatmul.mubr.f32.vlgmr.msra.gmra.mrb[22].mxu0 %v1688_v11  ;;  %7003 = vmatpush3.bf16.msra.mxu1 %v7002_v5  ;;  %v7044_v5 = vpack.c.bf16 %v2075_v62, %v2074_v28  ;;  %v7020_v11 = vpack.c.bf16 %v2047_v1, %v2046_v25  ;;  %v2050_v44 = vld [vmem:[%s11863_s7 + $0xad0] sm:$0xff]  ;;  %v2051_v28 = vld [vmem:[%s11863_s7 + $0xad8] sm:$0xff] }
 0x32f   :  { %7011 = vmatpush3.bf16.msra.mxu0 %v7010_v55  ;;  %2980 = vmatprep.mubr.f32.mxu0 %v1693_v18  ;;  %v2058_v55 = vld [vmem:[%s11863_s7 + $0xb10] sm:$0xff] }
 0x330   :  { %7005 = vmatprep.subr.bf16.mxu1 %v7004_v26  ;;  %7013 = vmatprep.subr.bf16.mxu0 %v7012_v27  ;;  %v2031_v26 = vld [vmem:[%s11863_s7 + $0xa38] sm:$0xff]  ;;  %v2076_v27 = vld [vmem:[%s11863_s7 + $0xba0] sm:$0xff]  ;;  %v7046_v18 = vpack.c.bf16 %v2059_v10, %v2058_v55 }
 0x331   :  { %v7022_v54 = vpack.c.bf16 %v2031_v26, %v2030_v47  ;;  %v7048_v34 = vpack.c.bf16 %v2077_v59, %v2076_v27  ;;  %v2035_v55 = vld [vmem:[%s11863_s7 + $0xa58] sm:$0xff]  ;;  %v2080_v10 = vld [vmem:[%s11863_s7 + $0xbc0] sm:$0xff]  ;;  %v2081_v47 = vld [vmem:[%s11863_s7 + $0xbc8] sm:$0xff] }
 0x332   :  { %7007 = vmatpush3.bf16.msra.mxu1 %v7006_v35  ;;  %v2060_v35 = vld [vmem:[%s11863_s7 + $0xb20] sm:$0xff]  ;;  %v7056_v59 = vpack.c.bf16 %v2081_v47, %v2080_v10 }
 0x333   :  { %7015 = vmatpush3.bf16.msra.mxu0 %v7014_v30  ;;  %7041 = vmatprep.subr.bf16.mxu1 %v7040_v36  ;;  %v2061_v30 = vld [vmem:[%s11863_s7 + $0xb28] sm:$0xff]  ;;  %v2032_v36 = vld [vmem:[%s11863_s7 + $0xa40] sm:$0xff] }
 0x334   :  { %7017 = vmatprep.subr.bf16.mxu0 %v7016_v57  ;;  %v2079_v57 = vld [vmem:[%s11863_s7 + $0xbb8] sm:$0xff]  ;;  %v7050_v62 = vpack.c.bf16 %v2061_v30, %v2060_v35  ;;  %v7026_v25 = vpack.c.bf16 %v2033_v50, %v2032_v36  ;;  %v2082_v35 = vld [vmem:[%s11863_s7 + $0xbd0] sm:$0xff]  ;;  %v7058_v50 = vpack.c.bf16 %v2065_v32, %v2064_v40 }
 0x335   :  { %2911 = vmatmul.mubr.f32.vlgmr.msra.gmra.mrb[30].mxu1 %v1690_v0  ;;  %v7052_v1 = vpack.c.bf16 %v2079_v57, %v2078_v53  ;;  %v2063_v0 = vld [vmem:[%s11863_s7 + $0xb38] sm:$0xff]  ;;  %v2054_v36 = vld [vmem:[%s11863_s7 + $0xaf0] sm:$0xff] }
 0x336   :  { %7043 = vmatpush3.bf16.msra.mxu1 %v7042_v4  ;;  %3050 = vmatprep.mubr.f32.mxu1 %v1695_v39  ;;  %v2062_v4 = vld [vmem:[%s11863_s7 + $0xb30] sm:$0xff]  ;;  %v2052_v39 = vld [vmem:[%s11863_s7 + $0xae0] sm:$0xff]  ;;  %v2083_v30 = vld [vmem:[%s11863_s7 + $0xbd8] sm:$0xff] }
 0x337   :  { %7019 = vmatpush3.bf16.msra.mxu0 %v7018_v19  ;;  %7045 = vmatprep.subr.bf16.mxu1 %v7044_v5  ;;  %v2034_v19 = vld [vmem:[%s11863_s7 + $0xa50] sm:$0xff]  ;;  %v7028_v5 = vpack.c.bf16 %v2051_v28, %v2050_v44  ;;  %v7054_v26 = vpack.c.bf16 %v2063_v0, %v2062_v4  ;;  %v7060_v57 = vpack.c.bf16 %v2083_v30, %v2082_v35  ;;  %v2067_v28 = vld [vmem:[%s11863_s7 + $0xb58] sm:$0xff]  ;;  %v2084_v4 = vld [vmem:[%s11863_s7 + $0xbe0] sm:$0xff] }
 0x338   :  { %7021 = vmatprep.subr.bf16.mxu0 %v7020_v11  ;;  %v2053_v11 = vld [vmem:[%s11863_s7 + $0xae8] sm:$0xff]  ;;  %v7030_v27 = vpack.c.bf16 %v2035_v55, %v2034_v19  ;;  %v2066_v44 = vld [vmem:[%s11863_s7 + $0xb50] sm:$0xff]  ;;  %v2104_v19 = vld [vmem:[%s11863_s7 + $0xc80] sm:$0xff] }
 0x339   :  { %v2085_v0 = vld [vmem:[%s11863_s7 + $0xbe8] sm:$0xff]  ;;  %v7062_v55 = vpack.c.bf16 %v2067_v28, %v2066_v44  ;;  %v2086_v40 = vld [vmem:[%s11863_s7 + $0xbf0] sm:$0xff]  ;;  %v2087_v32 = vld [vmem:[%s11863_s7 + $0xbf8] sm:$0xff] }
 0x33a   :  { %7047 = vmatpush3.bf16.msra.mxu1 %v7046_v18  ;;  %v2036_v18 = vld [vmem:[%s11863_s7 + $0xa60] sm:$0xff]  ;;  %v7064_v47 = vpack.c.bf16 %v2085_v0, %v2084_v4  ;;  %v2070_v30 = vld [vmem:[%s11863_s7 + $0xb70] sm:$0xff]  ;;  %v2091_v44 = vld [vmem:[%s11863_s7 + $0xc18] sm:$0xff] }
 0x33b   :  { %7023 = vmatpush3.bf16.msra.mxu0 %v7022_v54  ;;  %7049 = vmatprep.subr.bf16.mxu1 %v7048_v34  ;;  %v7032_v54 = vpack.c.bf16 %v2053_v11, %v2052_v39  ;;  %v2037_v34 = vld [vmem:[%s11863_s7 + $0xa68] sm:$0xff]  ;;  %v2068_v39 = vld [vmem:[%s11863_s7 + $0xb60] sm:$0xff] }
 0x33c   :  { %7025 = vmatprep.subr.bf16.mxu0 %v7024_v49  ;;  %v2055_v49 = vld [vmem:[%s11863_s7 + $0xaf8] sm:$0xff]  ;;  %v7034_v53 = vpack.c.bf16 %v2037_v34, %v2036_v18  ;;  %v2069_v11 = vld [vmem:[%s11863_s7 + $0xb68] sm:$0xff]  ;;  %v2106_v18 = vld [vmem:[%s11863_s7 + $0xc90] sm:$0xff] }
 0x33d   :  { %v7066_v34 = vpack.c.bf16 %v2069_v11, %v2068_v39  ;;  %v2136_v28 = vld [vmem:[%s11863_s7 + $0xd80] sm:$0xff]  ;;  %v2109_v4 = vld [vmem:[%s11863_s7 + $0xca8] sm:$0xff] }
 0x33e   :  { %7051 = vmatpush3.bf16.msra.mxu1 %v7050_v62  ;;  %v2038_v62 = vld [vmem:[%s11863_s7 + $0xa70] sm:$0xff]  ;;  %v2093_v11 = vld [vmem:[%s11863_s7 + $0xc28] sm:$0xff] }
 0x33f   :  { %7027 = vmatpush3.bf16.msra.mxu0 %v7026_v25  ;;  %7053 = vmatprep.subr.bf16.mxu1 %v7052_v1  ;;  %v7036_v25 = vpack.c.bf16 %v2055_v49, %v2054_v36  ;;  %v2039_v1 = vld [vmem:[%s11863_s7 + $0xa78] sm:$0xff]  ;;  %v2090_v49 = vld [vmem:[%s11863_s7 + $0xc10] sm:$0xff] }
 0x340   :  { %7029 = vmatprep.subr.bf16.mxu0 %v7028_v5  ;;  %v2105_v5 = vld [vmem:[%s11863_s7 + $0xc88] sm:$0xff]  ;;  %v7038_v10 = vpack.c.bf16 %v2039_v1, %v2038_v62  ;;  %v2071_v36 = vld [vmem:[%s11863_s7 + $0xb78] sm:$0xff]  ;;  %v2108_v1 = vld [vmem:[%s11863_s7 + $0xca0] sm:$0xff] }
 0x341   :  { %v2137_v62 = vld [vmem:[%s11863_s7 + $0xd88] sm:$0xff]  ;;  %v7070_v0 = vpack.c.bf16 %v2071_v36, %v2070_v30  ;;  %v7080_v39 = vpack.c.bf16 %v2109_v4, %v2108_v1  ;;  %v2123_v30 = vld [vmem:[%s11863_s7 + $0xd18] sm:$0xff]  ;;  %v2094_v36 = vld [vmem:[%s11863_s7 + $0xc30] sm:$0xff] }
 0x342   :  { %7055 = vmatpush3.bf16.msra.mxu1 %v7054_v26  ;;  %v7072_v26 = vpack.c.bf16 %v2105_v5, %v2104_v19  ;;  %v7078_v19 = vpack.c.bf16 %v2091_v44, %v2090_v49  ;;  %v7104_v5 = vpack.c.bf16 %v2137_v62, %v2136_v28  ;;  %v1699_v49 = vmul.f32 %v9146_v48, %v9146_v48  ;;  %v2141_v44 = vld [vmem:[%s11863_s7 + $0xda8] sm:$0xff]  ;;  %v2112_v28 = vld [vmem:[%s11863_s7 + $0xcc0] sm:$0xff] }
 0x343   :  { %7031 = vmatpush3.bf16.msra.mxu0 %v7030_v27  ;;  %7057 = vmatprep.subr.bf16.mxu1 %v7056_v59  ;;  %v2088_v27 = vld [vmem:[%s11863_s7 + $0xc00] sm:$0xff]  ;;  %v2089_v59 = vld [vmem:[%s11863_s7 + $0xc08] sm:$0xff] }
 0x344   :  { %7033 = vmatprep.subr.bf16.mxu0 %v7032_v54  ;;  %v2107_v54 = vld [vmem:[%s11863_s7 + $0xc98] sm:$0xff]  ;;  %v7074_v35 = vpack.c.bf16 %v2089_v59, %v2088_v27  ;;  %v2110_v59 = vld [vmem:[%s11863_s7 + $0xcb0] sm:$0xff]  ;;  %v2113_v62 = vld [vmem:[%s11863_s7 + $0xcc8] sm:$0xff] }
 0x345   :  { %v2139_v27 = vld [vmem:[%s11863_s7 + $0xd98] sm:$0xff] }
 0x346   :  { %7059 = vmatpush3.bf16.msra.mxu1 %v7058_v50  ;;  %v1692_v50 = vmul.f32 %v8816_v2, %v8816_v2 }
 0x347   :  { %7035 = vmatpush3.bf16.msra.mxu0 %v7034_v53  ;;  %7061 = vmatprep.subr.bf16.mxu1 %v7060_v57  ;;  %v7068_v53 = vpack.c.bf16 %v2087_v32, %v2086_v40  ;;  %v7076_v57 = vpack.c.bf16 %v2107_v54, %v2106_v18  ;;  %v2111_v40 = vld [vmem:[%s11863_s7 + $0xcb8] sm:$0xff]  ;;  %v1694_v18 = vmul.f32 %v9075_v56, %v9075_v56 }
 0x348   :  { %7037 = vmatprep.subr.bf16.mxu0 %v7036_v25  ;;  %v1697_v25 = vmul.f32 %v8893_v21, %v8893_v21 }
 0x34a   :  { %7063 = vmatpush3.bf16.msra.mxu1 %v7062_v55  ;;  %v2120_v55 = vld [vmem:[%s11863_s7 + $0xd00] sm:$0xff] }
 0x34b   :  { %7039 = vmatpush3.bf16.msra.mxu0 %v7038_v10  ;;  %7065 = vmatprep.subr.bf16.mxu1 %v7064_v47  ;;  %v2121_v10 = vld [vmem:[%s11863_s7 + $0xd08] sm:$0xff]  ;;  %v2092_v47 = vld [vmem:[%s11863_s7 + $0xc20] sm:$0xff] }
 0x34c   :  { %7073 = vmatprep.subr.bf16.mxu0 %v7072_v26  ;;  %v2138_v26 = vld [vmem:[%s11863_s7 + $0xd90] sm:$0xff]  ;;  %v7106_v32 = vpack.c.bf16 %v2121_v10, %v2120_v55  ;;  %v7082_v54 = vpack.c.bf16 %v2093_v11, %v2092_v47  ;;  %v7088_v55 = vpack.c.bf16 %v2113_v62, %v2112_v28  ;;  %v2097_v10 = vld [vmem:[%s11863_s7 + $0xc48] sm:$0xff]  ;;  %v2128_v28 = vld [vmem:[%s11863_s7 + $0xd40] sm:$0xff] }
 0x34d   :  { %v2142_v47 = vld [vmem:[%s11863_s7 + $0xdb0] sm:$0xff]  ;;  %v2129_v62 = vld [vmem:[%s11863_s7 + $0xd48] sm:$0xff] }
 0x34e   :  { %2981 = vmatmul.mubr.f32.vlgmr.msra.gmra.mrb[24].mxu0 %v1692_v50  ;;  %7067 = vmatpush3.bf16.msra.mxu1 %v7066_v34  ;;  %v7108_v34 = vpack.c.bf16 %v2139_v27, %v2138_v26  ;;  %v7084_v50 = vpack.c.bf16 %v2111_v40, %v2110_v59  ;;  %v2114_v11 = vld [vmem:[%s11863_s7 + $0xcd0] sm:$0xff]  ;;  %v2115_v26 = vld [vmem:[%s11863_s7 + $0xcd8] sm:$0xff] }
 0x34f   :  { %7075 = vmatpush3.bf16.msra.mxu0 %v7074_v35  ;;  %3120 = vmatprep.mubr.f32.mxu0 %v1697_v25  ;;  %v2122_v35 = vld [vmem:[%s11863_s7 + $0xd10] sm:$0xff] }
 0x350   :  { %7069 = vmatprep.subr.bf16.mxu1 %v7068_v53  ;;  %7077 = vmatprep.subr.bf16.mxu0 %v7076_v57  ;;  %v2095_v53 = vld [vmem:[%s11863_s7 + $0xc38] sm:$0xff]  ;;  %v2140_v57 = vld [vmem:[%s11863_s7 + $0xda0] sm:$0xff]  ;;  %v7110_v25 = vpack.c.bf16 %v2123_v30, %v2122_v35 }
 0x351   :  { %v7086_v1 = vpack.c.bf16 %v2095_v53, %v2094_v36  ;;  %v7112_v4 = vpack.c.bf16 %v2141_v44, %v2140_v57  ;;  %v2099_v35 = vld [vmem:[%s11863_s7 + $0xc58] sm:$0xff]  ;;  %v2144_v30 = vld [vmem:[%s11863_s7 + $0xdc0] sm:$0xff]  ;;  %v2145_v36 = vld [vmem:[%s11863_s7 + $0xdc8] sm:$0xff] }
 0x352   :  { %7071 = vmatpush3.bf16.msra.mxu1 %v7070_v0  ;;  %v2124_v0 = vld [vmem:[%s11863_s7 + $0xd20] sm:$0xff]  ;;  %v7120_v44 = vpack.c.bf16 %v2145_v36, %v2144_v30 }
 0x353   :  { %7079 = vmatpush3.bf16.msra.mxu0 %v7078_v19  ;;  %7105 = vmatprep.subr.bf16.mxu1 %v7104_v5  ;;  %v2125_v19 = vld [vmem:[%s11863_s7 + $0xd28] sm:$0xff]  ;;  %v2096_v5 = vld [vmem:[%s11863_s7 + $0xc40] sm:$0xff] }
 0x354   :  { %7081 = vmatprep.subr.bf16.mxu0 %v7080_v39  ;;  %v2143_v39 = vld [vmem:[%s11863_s7 + $0xdb8] sm:$0xff]  ;;  %v7114_v27 = vpack.c.bf16 %v2125_v19, %v2124_v0  ;;  %v7090_v59 = vpack.c.bf16 %v2097_v10, %v2096_v5  ;;  %v2146_v0 = vld [vmem:[%s11863_s7 + $0xdd0] sm:$0xff]  ;;  %v7122_v10 = vpack.c.bf16 %v2129_v62, %v2128_v28  ;;  %v2152_v28 = vld [vmem:[%s11863_s7 + $0xe00] sm:$0xff] }
 0x355   :  { %3051 = vmatmul.mubr.f32.vlgmr.msra.gmra.mrb[32].mxu1 %v1694_v18  ;;  %v7116_v40 = vpack.c.bf16 %v2143_v39, %v2142_v47  ;;  %v2127_v18 = vld [vmem:[%s11863_s7 + $0xd38] sm:$0xff]  ;;  %v2118_v5 = vld [vmem:[%s11863_s7 + $0xcf0] sm:$0xff]  ;;  %v2153_v62 = vld [vmem:[%s11863_s7 + $0xe08] sm:$0xff] }
 0x356   :  { %7107 = vmatpush3.bf16.msra.mxu1 %v7106_v32  ;;  %3190 = vmatprep.mubr.f32.mxu1 %v1699_v49  ;;  %v2126_v32 = vld [vmem:[%s11863_s7 + $0xd30] sm:$0xff]  ;;  %v2116_v49 = vld [vmem:[%s11863_s7 + $0xce0] sm:$0xff]  ;;  %v2147_v19 = vld [vmem:[%s11863_s7 + $0xdd8] sm:$0xff] }
 0x357   :  { %7083 = vmatpush3.bf16.msra.mxu0 %v7082_v54  ;;  %7109 = vmatprep.subr.bf16.mxu1 %v7108_v34  ;;  %v2098_v54 = vld [vmem:[%s11863_s7 + $0xc50] sm:$0xff]  ;;  %v7092_v34 = vpack.c.bf16 %v2115_v26, %v2114_v11  ;;  %v7118_v53 = vpack.c.bf16 %v2127_v18, %v2126_v32  ;;  %v7124_v39 = vpack.c.bf16 %v2147_v19, %v2146_v0  ;;  %v2131_v26 = vld [vmem:[%s11863_s7 + $0xd58] sm:$0xff] }
 0x358   :  { %7085 = vmatprep.subr.bf16.mxu0 %v7084_v50  ;;  %v2117_v50 = vld [vmem:[%s11863_s7 + $0xce8] sm:$0xff]  ;;  %v7094_v57 = vpack.c.bf16 %v2099_v35, %v2098_v54  ;;  %v2130_v11 = vld [vmem:[%s11863_s7 + $0xd50] sm:$0xff]  ;;  %v2103_v18 = vld [vmem:[%s11863_s7 + $0xc78] sm:$0xff]  ;;  %v7138_v19 = vpack.c.bf16 %v2153_v62, %v2152_v28 }
 0x359   :  { %v2148_v54 = vld [vmem:[%s11863_s7 + $0xde0] sm:$0xff]  ;;  %v7126_v30 = vpack.c.bf16 %v2131_v26, %v2130_v11  ;;  %v2155_v26 = vld [vmem:[%s11863_s7 + $0xe18] sm:$0xff]  ;;  %v2174_v28 = vld [vmem:[%s11863_s7 + $0xeb0] sm:$0xff] }
 0x35a   :  { %7111 = vmatpush3.bf16.msra.mxu1 %v7110_v25  ;;  %v2100_v25 = vld [vmem:[%s11863_s7 + $0xc60] sm:$0xff]  ;;  %v2175_v62 = vld [vmem:[%s11863_s7 + $0xeb8] sm:$0xff] }
 0x35b   :  { %7087 = vmatpush3.bf16.msra.mxu0 %v7086_v1  ;;  %7113 = vmatprep.subr.bf16.mxu1 %v7112_v4  ;;  %v7096_v1 = vpack.c.bf16 %v2117_v50, %v2116_v49  ;;  %v2101_v4 = vld [vmem:[%s11863_s7 + $0xc68] sm:$0xff]  ;;  %v2168_v35 = vld [vmem:[%s11863_s7 + $0xe80] sm:$0xff] }
 0x35c   :  { %7089 = vmatprep.subr.bf16.mxu0 %v7088_v55  ;;  %v2119_v55 = vld [vmem:[%s11863_s7 + $0xcf8] sm:$0xff]  ;;  %v7098_v47 = vpack.c.bf16 %v2101_v4, %v2100_v25  ;;  %v2132_v50 = vld [vmem:[%s11863_s7 + $0xd60] sm:$0xff]  ;;  %v2150_v25 = vld [vmem:[%s11863_s7 + $0xdf0] sm:$0xff] }
 0x35d   :  { %v7100_v32 = vpack.c.bf16 %v2119_v55, %v2118_v5  ;;  %v2171_v4 = vld [vmem:[%s11863_s7 + $0xe98] sm:$0xff]  ;;  %v2134_v5 = vld [vmem:[%s11863_s7 + $0xd70] sm:$0xff] }
 0x35e   :  { %7115 = vmatpush3.bf16.msra.mxu1 %v7114_v27  ;;  %v2102_v27 = vld [vmem:[%s11863_s7 + $0xc70] sm:$0xff]  ;;  %v2135_v55 = vld [vmem:[%s11863_s7 + $0xd78] sm:$0xff] }
 0x35f   :  { %7091 = vmatpush3.bf16.msra.mxu0 %v7090_v59  ;;  %7117 = vmatprep.subr.bf16.mxu1 %v7116_v40  ;;  %v7737_v59 = vld [vmem:[%s11862_s6 + $0x18] sm:$0xff]  ;;  %v7102_v36 = vpack.c.bf16 %v2103_v18, %v2102_v27  ;;  %v2200_v27 = vld [vmem:[%s11863_s7 + $0xf80] sm:$0xff]  ;;  %v2173_v18 = vld [vmem:[%s11863_s7 + $0xea8] sm:$0xff]  ;;  %s5239_s6 = sshll.u32 %s7765_s2, 4  ;;  %s5240_s6 = int_to_ptr.vmem [resolvable:$true] %s5239_s6 }
 0x360   :  { %7093 = vmatprep.subr.bf16.mxu0 %v7092_v34  ;;  %v471_v40 = vrot.slane %v7737_v59, %v8609_v45  ;;  %v2149_v34 = vld [vmem:[%s11863_s7 + $0xde8] sm:$0xff]  ;;  %p7743_p1 = scmp.lt.s32.totalorder %s5240_s6, %s5240_s6 }
 0x361   :  { %v2169_v45 = vld [vmem:[%s11863_s7 + $0xe88] sm:$0xff]  ;;  %v7128_v49 = vpack.c.bf16 %v2149_v34, %v2148_v54  ;;  %v7134_v54 = vpack.c.bf16 %v2135_v55, %v2134_v5  ;;  %v2158_v5 = vld [vmem:[%s11863_s7 + $0xe30] sm:$0xff]  ;;  %v1703_v55 = vmul.f32 %v9218_v43, %v9218_v43 }
 0x362   :  { %7119 = vmatpush3.bf16.msra.mxu1 %v7118_v53  ;;  %v2133_v53 = vld [vmem:[%s11863_s7 + $0xd68] sm:$0xff] }
 0x363   :  { %7095 = vmatpush3.bf16.msra.mxu0 %v7094_v57  ;;  %7121 = vmatprep.subr.bf16.mxu1 %v7120_v44  ;;  %v9977_v57 = vadd.f32 %v8874_v61, %v471_v40  ;;  %v7136_v44 = vpack.c.bf16 %v2169_v45, %v2168_v35  ;;  %v2170_v61 = vld [vmem:[%s11863_s7 + $0xe90] sm:$0xff]  ;;  %v7130_v0 = vpack.c.bf16 %v2133_v53, %v2132_v50  ;;  %v2201_v59 = vld [vmem:[%s11863_s7 + $0xf88] sm:$0xff]  ;;  %v2184_v45 = vld [vmem:[%s11863_s7 + $0xf00] sm:$0xff] }
 0x364   :  { %7097 = vmatprep.subr.bf16.mxu0 %v7096_v1  ;;  %v2151_v1 = vld [vmem:[%s11863_s7 + $0xdf8] sm:$0xff]  ;;  %v7140_v11 = vpack.c.bf16 %v2171_v4, %v2170_v61  ;;  %v1701_v40 = vmul.f32 %v8972_v31, %v8972_v31  ;;  %v7168_v35 = vpack.c.bf16 %v2201_v59, %v2200_v27  ;;  %v2157_v50 = vld [vmem:[%s11863_s7 + $0xe28] sm:$0xff]  ;;  %v2202_v53 = vld [vmem:[%s11863_s7 + $0xf90] sm:$0xff] }
 0x365   :  { %v2177_v27 = vld [vmem:[%s11863_s7 + $0xec8] sm:$0xff] }
 0x366   :  { %7123 = vmatpush3.bf16.msra.mxu1 %v7122_v10  ;;  %v2154_v10 = vld [vmem:[%s11863_s7 + $0xe10] sm:$0xff] }
 0x367   :  { %7099 = vmatpush3.bf16.msra.mxu0 %v7098_v47  ;;  %7125 = vmatprep.subr.bf16.mxu1 %v7124_v39  ;;  %v1696_v47 = vmul.f32 %v9977_v57, %v9977_v57  ;;  %v7132_v39 = vpack.c.bf16 %v2151_v1, %v2150_v25  ;;  %v7142_v34 = vpack.c.bf16 %v2155_v26, %v2154_v10  ;;  %v2176_v26 = vld [vmem:[%s11863_s7 + $0xec0] sm:$0xff] }
 0x368   :  { %7101 = vmatprep.subr.bf16.mxu0 %v7100_v32  ;;  %v2172_v32 = vld [vmem:[%s11863_s7 + $0xea0] sm:$0xff]  ;;  %v1698_v1 = vmul.f32 %v9135_v9, %v9135_v9  ;;  %v7148_v10 = vpack.c.bf16 %v2175_v62, %v2174_v28  ;;  %v2190_v62 = vld [vmem:[%s11863_s7 + $0xf30] sm:$0xff] }
 0x36a   :  { %7127 = vmatpush3.bf16.msra.mxu1 %v7126_v30  ;;  %v2185_v30 = vld [vmem:[%s11863_s7 + $0xf08] sm:$0xff] }
 0x36b   :  { %7103 = vmatpush3.bf16.msra.mxu0 %v7102_v36  ;;  %7129 = vmatprep.subr.bf16.mxu1 %v7128_v49  ;;  %v2156_v36 = vld [vmem:[%s11863_s7 + $0xe20] sm:$0xff]  ;;  %v7144_v49 = vpack.c.bf16 %v2173_v18, %v2172_v32  ;;  %v7170_v25 = vpack.c.bf16 %v2185_v30, %v2184_v45  ;;  %v2161_v45 = vld [vmem:[%s11863_s7 + $0xe48] sm:$0xff]  ;;  %v2206_v30 = vld [vmem:[%s11863_s7 + $0xfb0] sm:$0xff] }
 0x36c   :  { %7137 = vmatprep.subr.bf16.mxu0 %v7136_v44  ;;  %v2203_v44 = vld [vmem:[%s11863_s7 + $0xf98] sm:$0xff]  ;;  %v7146_v61 = vpack.c.bf16 %v2157_v50, %v2156_v36  ;;  %v2188_v18 = vld [vmem:[%s11863_s7 + $0xf20] sm:$0xff] }
 0x36d   :  { %v7172_v4 = vpack.c.bf16 %v2203_v44, %v2202_v53  ;;  %v2207_v36 = vld [vmem:[%s11863_s7 + $0xfb8] sm:$0xff] }
 0x36e   :  { %3121 = vmatmul.mubr.f32.vlgmr.msra.gmra.mrb[26].mxu0 %v1696_v47  ;;  %7131 = vmatpush3.bf16.msra.mxu1 %v7130_v0  ;;  %v2186_v0 = vld [vmem:[%s11863_s7 + $0xf10] sm:$0xff]  ;;  %v2159_v47 = vld [vmem:[%s11863_s7 + $0xe38] sm:$0xff]  ;;  %v7180_v28 = vpack.c.bf16 %v2207_v36, %v2206_v30 }
 0x36f   :  { %7139 = vmatpush3.bf16.msra.mxu0 %v7138_v19  ;;  %3260 = vmatprep.mubr.f32.mxu0 %v1701_v40  ;;  %v2187_v19 = vld [vmem:[%s11863_s7 + $0xf18] sm:$0xff]  ;;  %v7150_v40 = vpack.c.bf16 %v2159_v47, %v2158_v5  ;;  %v2180_v5 = vld [vmem:[%s11863_s7 + $0xee0] sm:$0xff] }
 0x370   :  { %7133 = vmatprep.subr.bf16.mxu1 %v7132_v39  ;;  %7141 = vmatprep.subr.bf16.mxu0 %v7140_v11  ;;  %v2204_v39 = vld [vmem:[%s11863_s7 + $0xfa0] sm:$0xff]  ;;  %v2205_v11 = vld [vmem:[%s11863_s7 + $0xfa8] sm:$0xff]  ;;  %v7174_v59 = vpack.c.bf16 %v2187_v19, %v2186_v0  ;;  %v2179_v50 = vld [vmem:[%s11863_s7 + $0xed8] sm:$0xff] }
 0x371   :  { %v7176_v32 = vpack.c.bf16 %v2205_v11, %v2204_v39  ;;  %v2208_v0 = vld [vmem:[%s11863_s7 + $0xfc0] sm:$0xff]  ;;  %v2209_v19 = vld [vmem:[%s11863_s7 + $0xfc8] sm:$0xff] }
 0x372   :  { %7135 = vmatpush3.bf16.msra.mxu1 %v7134_v54  ;;  %v2189_v54 = vld [vmem:[%s11863_s7 + $0xf28] sm:$0xff]  ;;  %v7184_v39 = vpack.c.bf16 %v2209_v19, %v2208_v0  ;;  %v2192_v11 = vld [vmem:[%s11863_s7 + $0xf40] sm:$0xff] }
 0x373   :  { %7143 = vmatpush3.bf16.msra.mxu0 %v7142_v34  ;;  %7169 = vmatprep.subr.bf16.mxu1 %v7168_v35  ;;  %v2160_v34 = vld [vmem:[%s11863_s7 + $0xe40] sm:$0xff]  ;;  %v7152_v35 = vpack.c.bf16 %v2177_v27, %v2176_v26  ;;  %v7178_v53 = vpack.c.bf16 %v2189_v54, %v2188_v18  ;;  %v2193_v26 = vld [vmem:[%s11863_s7 + $0xf48] sm:$0xff]  ;;  %v2210_v18 = vld [vmem:[%s11863_s7 + $0xfd0] sm:$0xff] }
 0x374   :  { %7145 = vmatprep.subr.bf16.mxu0 %v7144_v49  ;;  %v2178_v49 = vld [vmem:[%s11863_s7 + $0xed0] sm:$0xff]  ;;  %v7154_v44 = vpack.c.bf16 %v2161_v45, %v2160_v34  ;;  %v2164_v27 = vld [vmem:[%s11863_s7 + $0xe60] sm:$0xff]  ;;  %v2211_v54 = vld [vmem:[%s11863_s7 + $0xfd8] sm:$0xff]  ;;  %v7186_v36 = vpack.c.bf16 %v2193_v26, %v2192_v11 }
 0x375   :  { %3191 = vmatmul.mubr.f32.vlgmr.msra.gmra.mrb[34].mxu1 %v1698_v1  ;;  %v2162_v1 = vld [vmem:[%s11863_s7 + $0xe50] sm:$0xff]  ;;  %v2183_v45 = vld [vmem:[%s11863_s7 + $0xef8] sm:$0xff]  ;;  %v3355_v0 = vld [vmem:[%s11865_s9 + $0x88] sm:$0xff] }
 0x376   :  { %7171 = vmatpush3.bf16.msra.mxu1 %v7170_v25  ;;  %3330 = vmatprep.mubr.f32.mxu1 %v1703_v55  ;;  %v2191_v25 = vld [vmem:[%s11863_s7 + $0xf38] sm:$0xff]  ;;  %v2181_v55 = vld [vmem:[%s11863_s7 + $0xee8] sm:$0xff]  ;;  %v3338_v26 = vld [vmem:[%s11865_s9] sm:$0xff] }
 0x377   :  { %7147 = vmatpush3.bf16.msra.mxu0 %v7146_v61  ;;  %7173 = vmatprep.subr.bf16.mxu1 %v7172_v4  ;;  %v7156_v61 = vpack.c.bf16 %v2179_v50, %v2178_v49  ;;  %v2163_v4 = vld [vmem:[%s11863_s7 + $0xe58] sm:$0xff]  ;;  %v7188_v50 = vpack.c.bf16 %v2211_v54, %v2210_v18  ;;  %v3356_v18 = vld [vmem:[%s11865_s9 + $0x90] sm:$0xff] }
 0x378   :  { %7149 = vmatprep.subr.bf16.mxu0 %v7148_v10  ;;  %v7182_v10 = vpack.c.bf16 %v2191_v25, %v2190_v62  ;;  %v7158_v47 = vpack.c.bf16 %v2163_v4, %v2162_v1  ;;  %v2167_v25 = vld [vmem:[%s11863_s7 + $0xe78] sm:$0xff]  ;;  %v2212_v1 = vld [vmem:[%s11863_s7 + $0xfe0] sm:$0xff] }
 0x379   :  { %v3354_v4 = vld [vmem:[%s11865_s9 + $0x80] sm:$0xff]  ;;  %v3357_v54 = vld [vmem:[%s11865_s9 + $0x98] sm:$0xff] }
 0x37a   :  { %7175 = vmatpush3.bf16.msra.mxu1 %v7174_v59  ;;  %v7200_v11 = vpack.c.bf16 %v3355_v0, %v3354_v4  ;;  %v3359_v4 = vld [vmem:[%s11865_s9 + $0xa8] sm:$0xff] }
 0x37b   :  { %7151 = vmatpush3.bf16.msra.mxu0 %v7150_v40  ;;  %7177 = vmatprep.subr.bf16.mxu1 %v7176_v32  ;;  %v7160_v40 = vpack.c.bf16 %v2181_v55, %v2180_v5  ;;  %v2165_v32 = vld [vmem:[%s11863_s7 + $0xe68] sm:$0xff] }
 0x37c   :  { %7153 = vmatprep.subr.bf16.mxu0 %v7152_v35  ;;  %v2182_v35 = vld [vmem:[%s11863_s7 + $0xef0] sm:$0xff]  ;;  %v7162_v49 = vpack.c.bf16 %v2165_v32, %v2164_v27  ;;  %v3339_v27 = vld [vmem:[%s11865_s9 + $0x8] sm:$0xff]  ;;  %v2215_v32 = vld [vmem:[%s11863_s7 + $0xff8] sm:$0xff] }
 0x37d   :  { %v7164_v62 = vpack.c.bf16 %v2183_v45, %v2182_v35  ;;  %v7202_v45 = vpack.c.bf16 %v3339_v27, %v3338_v26  ;;  %v3389_v26 = vld [vmem:[%s11865_s9 + $0x198] sm:$0xff]  ;;  %v3360_v27 = vld [vmem:[%s11865_s9 + $0xb0] sm:$0xff] }
 0x37e   :  { %7179 = vmatpush3.bf16.msra.mxu1 %v7178_v53  ;;  %v2194_v53 = vld [vmem:[%s11863_s7 + $0xf50] sm:$0xff] }
 0x37f   :  { %7155 = vmatpush3.bf16.msra.mxu0 %v7154_v44  ;;  %7181 = vmatprep.subr.bf16.mxu1 %v7180_v28  ;;  %v2195_v44 = vld [vmem:[%s11863_s7 + $0xf58] sm:$0xff]  ;;  %v2166_v28 = vld [vmem:[%s11863_s7 + $0xe70] sm:$0xff] }
 0x380   :  { %v5331_v59 = vpop.f32.mrb[14].mxu0  ;;  %7157 = vmatprep.subr.bf16.mxu0 %v7156_v61  ;;  %v2213_v61 = vld [vmem:[%s11863_s7 + $0xfe8] sm:$0xff]  ;;  %v7190_v19 = vpack.c.bf16 %v2195_v44, %v2194_v53  ;;  %v7166_v5 = vpack.c.bf16 %v2167_v25, %v2166_v28  ;;  %v1700_v53 = vmul.f32 %v8957_v23, %v8957_v23  ;;  %v3341_v25 = vld [vmem:[%s11865_s9 + $0x18] sm:$0xff] }
 0x381   :  { %v5332_v34 = vpop.f32.mrb[15].mxu0  ;;  %v7192_v55 = vpack.c.bf16 %v2213_v61, %v2212_v1  ;;  %v3386_v1 = vld [vmem:[%s11865_s9 + $0x180] sm:$0xff]  ;;  %v3387_v61 = vld [vmem:[%s11865_s9 + $0x188] sm:$0xff] }
 0x382   :  { %7183 = vmatpush3.bf16.msra.mxu1 %v7182_v10  ;;  %v5333_v30 = vadd.f32 %v5332_v34, %v5331_v59  ;;  %v2196_v10 = vld [vmem:[%s11863_s7 + $0xf60] sm:$0xff]  ;;  %v2214_v59 = vld [vmem:[%s11863_s7 + $0xff0] sm:$0xff] }
 0x383   :  { %7159 = vmatpush3.bf16.msra.mxu0 %v7158_v47  ;;  %7185 = vmatprep.subr.bf16.mxu1 %v7184_v39  ;;  %v2197_v47 = vld [vmem:[%s11863_s7 + $0xf68] sm:$0xff]  ;;  %v7196_v28 = vpack.c.bf16 %v2215_v32, %v2214_v59  ;;  %v3361_v59 = vld [vmem:[%s11865_s9 + $0xb8] sm:$0xff]  ;;  %v1702_v32 = vmul.f32 %v9204_v42, %v9204_v42 }
 0x384   :  { %7161 = vmatprep.subr.bf16.mxu0 %v7160_v40  ;;  %v7194_v35 = vpack.c.bf16 %v2197_v47, %v2196_v10  ;;  %v3371_v10 = vld [vmem:[%s11865_s9 + $0x108] sm:$0xff]  ;;  %v3342_v47 = vld [vmem:[%s11865_s9 + $0x20] sm:$0xff] }
 0x386   :  { %7187 = vmatpush3.bf16.msra.mxu1 %v7186_v36  ;;  %v2198_v36 = vld [vmem:[%s11863_s7 + $0xf70] sm:$0xff] }
 0x387   :  { %7163 = vmatpush3.bf16.msra.mxu0 %v7162_v49  ;;  %7189 = vmatprep.subr.bf16.mxu1 %v7188_v50  ;;  %v2199_v49 = vld [vmem:[%s11863_s7 + $0xf78] sm:$0xff]  ;;  %v3340_v50 = vld [vmem:[%s11865_s9 + $0x10] sm:$0xff] }
 0x388   :  { %v5366_v39 = vpop.f32.mrb[22].mxu1  ;;  %7165 = vmatprep.subr.bf16.mxu0 %v7164_v62  ;;  %v7204_v62 = vpack.c.bf16 %v3357_v54, %v3356_v18  ;;  %v7198_v0 = vpack.c.bf16 %v2199_v49, %v2198_v36  ;;  %v7212_v36 = vpack.c.bf16 %v3361_v59, %v3360_v27  ;;  %v3345_v49 = vld [vmem:[%s11865_s9 + $0x38] sm:$0xff]  ;;  %v3348_v59 = vld [vmem:[%s11865_s9 + $0x50] sm:$0xff] }
 0x389   :  { %v5367_v40 = vpop.f32.mrb[23].mxu1  ;;  %v3377_v27 = vld [vmem:[%s11865_s9 + $0x138] sm:$0xff] }
 0x38a   :  { %v5368_v34 = vadd.f32 %v5367_v40, %v5366_v39  ;;  %7191 = vmatpush3.bf16.msra.mxu1 %v7190_v19  ;;  %v7206_v19 = vpack.c.bf16 %v3341_v25, %v3340_v50  ;;  %v3390_v50 = vld [vmem:[%s11865_s9 + $0x1a0] sm:$0xff] }
 0x38b   :  { %7167 = vmatpush3.bf16.msra.mxu0 %v7166_v5  ;;  %7193 = vmatprep.subr.bf16.mxu1 %v7192_v55  ;;  %v7232_v5 = vpack.c.bf16 %v3387_v61, %v3386_v1  ;;  %v3370_v55 = vld [vmem:[%s11865_s9 + $0x100] sm:$0xff] }
 0x38c   :  { %v10208_v44 = vadd.f32 %v5368_v34, %v5333_v30  ;;  %7201 = vmatprep.subr.bf16.mxu0 %v7200_v11  ;;  %v3358_v30 = vld [vmem:[%s11865_s9 + $0xa0] sm:$0xff]  ;;  %v3388_v11 = vld [vmem:[%s11865_s9 + $0x190] sm:$0xff]  ;;  %v7234_v40 = vpack.c.bf16 %v3371_v10, %v3370_v55  ;;  %v3393_v55 = vld [vmem:[%s11865_s9 + $0x1b8] sm:$0xff] }
 0x38d   :  { %v7208_v39 = vpack.c.bf16 %v3359_v4, %v3358_v30  ;;  %v7236_v54 = vpack.c.bf16 %v3389_v26, %v3388_v11  ;;  %v3372_v34 = vld [vmem:[%s11865_s9 + $0x110] sm:$0xff]  ;;  %v3374_v30 = vld [vmem:[%s11865_s9 + $0x120] sm:$0xff]  ;;  %v3375_v4 = vld [vmem:[%s11865_s9 + $0x128] sm:$0xff] }
 0x38e   :  { %3261 = vmatmul.mubr.f32.vlgmr.msra.gmra.mrb[28].mxu0 %v1700_v53  ;;  %7195 = vmatpush3.bf16.msra.mxu1 %v7194_v35  ;;  %v3373_v35 = vld [vmem:[%s11865_s9 + $0x118] sm:$0xff]  ;;  %v3391_v53 = vld [vmem:[%s11865_s9 + $0x1a8] sm:$0xff]  ;;  %v3364_v10 = vld [vmem:[%s11865_s9 + $0xd0] sm:$0xff] }
 0x38f   :  { %7203 = vmatpush3.bf16.msra.mxu0 %v7202_v45  ;;  %3914 = vmatprep.mubr.f32.mxu0 %v8641_v58  ;;  %v3343_v58 = vld [vmem:[%s11865_s9 + $0x28] sm:$0xff]  ;;  %v3344_v45 = vld [vmem:[%s11865_s9 + $0x30] sm:$0xff]  ;;  %v7238_v25 = vpack.c.bf16 %v3373_v35, %v3372_v34  ;;  %v7240_v61 = vpack.c.bf16 %v3391_v53, %v3390_v50  ;;  %v3366_v34 = vld [vmem:[%s11865_s9 + $0xe0] sm:$0xff] }
 0x390   :  { %7197 = vmatprep.subr.bf16.mxu1 %v7196_v28  ;;  %7205 = vmatprep.subr.bf16.mxu0 %v7204_v62  ;;  %v7210_v18 = vpack.c.bf16 %v3343_v58, %v3342_v47  ;;  %v3362_v28 = vld [vmem:[%s11865_s9 + $0xc0] sm:$0xff]  ;;  %v3363_v62 = vld [vmem:[%s11865_s9 + $0xc8] sm:$0xff]  ;;  %v7214_v1 = vpack.c.bf16 %v3345_v49, %v3344_v45  ;;  %v3365_v47 = vld [vmem:[%s11865_s9 + $0xd8] sm:$0xff] }
 0x391   :  { %v3376_v26 = vld [vmem:[%s11865_s9 + $0x130] sm:$0xff]  ;;  %v3367_v35 = vld [vmem:[%s11865_s9 + $0xe8] sm:$0xff]  ;;  %v3378_v50 = vld [vmem:[%s11865_s9 + $0x140] sm:$0xff] }
 0x392   :  { %7199 = vmatpush3.bf16.msra.mxu1 %v7198_v0  ;;  %v3346_v0 = vld [vmem:[%s11865_s9 + $0x40] sm:$0xff]  ;;  %v7246_v45 = vpack.c.bf16 %v3377_v27, %v3376_v26  ;;  %v3379_v53 = vld [vmem:[%s11865_s9 + $0x148] sm:$0xff]  ;;  %v3353_v27 = vld [vmem:[%s11865_s9 + $0x78] sm:$0xff] }
 0x393   :  { %7207 = vmatpush3.bf16.msra.mxu0 %v7206_v19  ;;  %7233 = vmatprep.subr.bf16.mxu1 %v7232_v5  ;;  %v7216_v19 = vpack.c.bf16 %v3363_v62, %v3362_v28  ;;  %v3392_v5 = vld [vmem:[%s11865_s9 + $0x1b0] sm:$0xff]  ;;  %v3350_v28 = vld [vmem:[%s11865_s9 + $0x60] sm:$0xff] }
 0x394   :  { %7209 = vmatprep.subr.bf16.mxu0 %v7208_v39  ;;  %v7242_v39 = vpack.c.bf16 %v3375_v4, %v3374_v30  ;;  %v7244_v11 = vpack.c.bf16 %v3393_v55, %v3392_v5  ;;  %v3397_v30 = vld [vmem:[%s11865_s9 + $0x1d8] sm:$0xff]  ;;  %v7250_v5 = vpack.c.bf16 %v3379_v53, %v3378_v50  ;;  %v3402_v50 = vld [vmem:[%s11865_s9 + $0x200] sm:$0xff]  ;;  %v3403_v53 = vld [vmem:[%s11865_s9 + $0x208] sm:$0xff] }
 0x395   :  { %3331 = vmatmul.mubr.f32.vlgmr.msra.gmra.mrb[36].mxu1 %v1702_v32  ;;  %v3349_v32 = vld [vmem:[%s11865_s9 + $0x58] sm:$0xff] }
 0x396   :  { %7235 = vmatpush3.bf16.msra.mxu1 %v7234_v40  ;;  %3984 = vmatprep.mubr.f32.mxu1 %v8695_v24  ;;  %v3347_v24 = vld [vmem:[%s11865_s9 + $0x48] sm:$0xff]  ;;  %v7220_v40 = vpack.c.bf16 %v3365_v47, %v3364_v10  ;;  %v3380_v47 = vld [vmem:[%s11865_s9 + $0x150] sm:$0xff] }
 0x397   :  { %7211 = vmatpush3.bf16.msra.mxu0 %v7210_v18  ;;  %7237 = vmatprep.subr.bf16.mxu1 %v7236_v54  ;;  %v7218_v58 = vpack.c.bf16 %v3347_v24, %v3346_v0  ;;  %v3394_v18 = vld [vmem:[%s11865_s9 + $0x1c0] sm:$0xff]  ;;  %v3395_v54 = vld [vmem:[%s11865_s9 + $0x1c8] sm:$0xff]  ;;  %v3368_v0 = vld [vmem:[%s11865_s9 + $0xf0] sm:$0xff] }
 0x398   :  { %7213 = vmatprep.subr.bf16.mxu0 %v7212_v36  ;;  %v7222_v36 = vpack.c.bf16 %v3349_v32, %v3348_v59  ;;  %v7248_v49 = vpack.c.bf16 %v3395_v54, %v3394_v18  ;;  %v3398_v59 = vld [vmem:[%s11865_s9 + $0x1e0] sm:$0xff] }
 0x399   :  { %v3418_v32 = vld [vmem:[%s11865_s9 + $0x280] sm:$0xff] }
 0x39a   :  { %7239 = vmatpush3.bf16.msra.mxu1 %v7238_v25  ;;  %v7224_v25 = vpack.c.bf16 %v3367_v35, %v3366_v34  ;;  %v3382_v35 = vld [vmem:[%s11865_s9 + $0x160] sm:$0xff] }
 0x39b   :  { %7215 = vmatpush3.bf16.msra.mxu0 %v7214_v1  ;;  %7241 = vmatprep.subr.bf16.mxu1 %v7240_v61  ;;  %v3351_v1 = vld [vmem:[%s11865_s9 + $0x68] sm:$0xff]  ;;  %v3396_v61 = vld [vmem:[%s11865_s9 + $0x1d0] sm:$0xff] }
 0x39c   :  { %7217 = vmatprep.subr.bf16.mxu0 %v7216_v19  ;;  %v3369_v19 = vld [vmem:[%s11865_s9 + $0xf8] sm:$0xff]  ;;  %v7226_v55 = vpack.c.bf16 %v3351_v1, %v3350_v28  ;;  %v7252_v10 = vpack.c.bf16 %v3397_v30, %v3396_v61  ;;  %v3400_v28 = vld [vmem:[%s11865_s9 + $0x1f0] sm:$0xff] }
 0x39d   :  { %v7228_v26 = vpack.c.bf16 %v3369_v19, %v3368_v0  ;;  %v3420_v1 = vld [vmem:[%s11865_s9 + $0x290] sm:$0xff]  ;;  %v3421_v61 = vld [vmem:[%s11865_s9 + $0x298] sm:$0xff]  ;;  %v7266_v0 = vpack.c.bf16 %v3403_v53, %v3402_v50 }
 0x39e   :  { %7243 = vmatpush3.bf16.msra.mxu1 %v7242_v39  ;;  %v3381_v39 = vld [vmem:[%s11865_s9 + $0x158] sm:$0xff]  ;;  %v3384_v19 = vld [vmem:[%s11865_s9 + $0x170] sm:$0xff] }
 0x39f   :  { %7219 = vmatpush3.bf16.msra.mxu0 %v7218_v58  ;;  %7245 = vmatprep.subr.bf16.mxu1 %v7244_v11  ;;  %v3352_v58 = vld [vmem:[%s11865_s9 + $0x70] sm:$0xff]  ;;  %v7254_v18 = vpack.c.bf16 %v3381_v39, %v3380_v47  ;;  %v7268_v47 = vpack.c.bf16 %v3421_v61, %v3420_v1  ;;  %v3405_v39 = vld [vmem:[%s11865_s9 + $0x218] sm:$0xff] }
 0x3a0   :  { %v5401_v62 = vpop.f32.mrb[16].mxu0  ;;  %7221 = vmatprep.subr.bf16.mxu0 %v7220_v40  ;;  %v3399_v40 = vld [vmem:[%s11865_s9 + $0x1e8] sm:$0xff]  ;;  %v7230_v54 = vpack.c.bf16 %v3353_v27, %v3352_v58  ;;  %v3450_v58 = vld [vmem:[%s11865_s9 + $0x380] sm:$0xff]  ;;  %v3409_v61 = vld [vmem:[%s11865_s9 + $0x238] sm:$0xff] }
 0x3a1   :  { %v5402_v4 = vpop.f32.mrb[17].mxu0  ;;  %v7256_v34 = vpack.c.bf16 %v3399_v40, %v3398_v59  ;;  %v3423_v27 = vld [vmem:[%s11865_s9 + $0x2a8] sm:$0xff] }
 0x3a2   :  { %v5403_v24 = vadd.f32 %v5402_v4, %v5401_v62  ;;  %7247 = vmatpush3.bf16.msra.mxu1 %v7246_v45  ;;  %v3383_v45 = vld [vmem:[%s11865_s9 + $0x168] sm:$0xff] }
 0x3a3   :  { %7223 = vmatpush3.bf16.msra.mxu0 %v7222_v36  ;;  %7249 = vmatprep.subr.bf16.mxu1 %v7248_v49  ;;  %v7258_v4 = vpack.c.bf16 %v3383_v45, %v3382_v35  ;;  %v3453_v35 = vld [vmem:[%s11865_s9 + $0x398] sm:$0xff]  ;;  %v3424_v45 = vld [vmem:[%s11865_s9 + $0x2b0] sm:$0xff] }
 0x3a4   :  { %v2423_v11 = vadd.f32 %v5403_v24, %v10208_v44  ;;  %7225 = vmatprep.subr.bf16.mxu0 %v7224_v25  ;;  %v3419_v44 = vld [vmem:[%s11865_s9 + $0x288] sm:$0xff]  ;;  %v3401_v25 = vld [vmem:[%s11865_s9 + $0x1f8] sm:$0xff] }
 0x3a5   :  { %v7264_v49 = vpack.c.bf16 %v3419_v44, %v3418_v32  ;;  %v3385_v24 = vld [vmem:[%s11865_s9 + $0x178] sm:$0xff]  ;;  %v3434_v44 = vld [vmem:[%s11865_s9 + $0x300] sm:$0xff] }
 0x3a6   :  { %7251 = vmatpush3.bf16.msra.mxu1 %v7250_v5  ;;  %v3404_v5 = vld [vmem:[%s11865_s9 + $0x210] sm:$0xff]  ;;  %v7262_v59 = vpack.c.bf16 %v3385_v24, %v3384_v19  ;;  %v3427_v19 = vld [vmem:[%s11865_s9 + $0x2c8] sm:$0xff] }
 0x3a7   :  { %7227 = vmatpush3.bf16.msra.mxu0 %v7226_v55  ;;  %7253 = vmatprep.subr.bf16.mxu1 %v7252_v10  ;;  %v7260_v10 = vpack.c.bf16 %v3401_v25, %v3400_v28  ;;  %v7270_v40 = vpack.c.bf16 %v3405_v39, %v3404_v5  ;;  %v3436_v28 = vld [vmem:[%s11865_s9 + $0x310] sm:$0xff]  ;;  %v3410_v39 = vld [vmem:[%s11865_s9 + $0x240] sm:$0xff] }
 0x3a8   :  { %v5436_v36 = vpop.f32.mrb[24].mxu1  ;;  %7229 = vmatprep.subr.bf16.mxu0 %v7228_v26  ;;  %v3451_v26 = vld [vmem:[%s11865_s9 + $0x388] sm:$0xff]  ;;  %v3408_v25 = vld [vmem:[%s11865_s9 + $0x230] sm:$0xff] }
 0x3a9   :  { %v5437_v62 = vpop.f32.mrb[25].mxu1  ;;  %v7296_v32 = vpack.c.bf16 %v3451_v26, %v3450_v58  ;;  %v7278_v5 = vpack.c.bf16 %v3409_v61, %v3408_v25  ;;  %v3456_v26 = vld [vmem:[%s11865_s9 + $0x3b0] sm:$0xff]  ;;  %v3443_v25 = vld [vmem:[%s11865_s9 + $0x348] sm:$0xff] }
 0x3aa   :  { %v5438_v30 = vadd.f32 %v5437_v62, %v5436_v36  ;;  %7255 = vmatpush3.bf16.msra.mxu1 %v7254_v18  ;;  %v3435_v18 = vld [vmem:[%s11865_s9 + $0x308] sm:$0xff]  ;;  %v3425_v36 = vld [vmem:[%s11865_s9 + $0x2b8] sm:$0xff] }
 0x3ab   :  { %7231 = vmatpush3.bf16.msra.mxu0 %v7230_v54  ;;  %7257 = vmatprep.subr.bf16.mxu1 %v7256_v34  ;;  %v3406_v54 = vld [vmem:[%s11865_s9 + $0x220] sm:$0xff]  ;;  %v3452_v34 = vld [vmem:[%s11865_s9 + $0x390] sm:$0xff]  ;;  %v3437_v62 = vld [vmem:[%s11865_s9 + $0x318] sm:$0xff]  ;;  %v7276_v1 = vpack.c.bf16 %v3425_v36, %v3424_v45 }
 0x3ac   :  { %v10407_v55 = vadd.f32 %v5438_v30, %v2423_v11  ;;  %7265 = vmatprep.subr.bf16.mxu0 %v7264_v49  ;;  %v3422_v11 = vld [vmem:[%s11865_s9 + $0x2a0] sm:$0xff]  ;;  %v7298_v49 = vpack.c.bf16 %v3435_v18, %v3434_v44  ;;  %v7300_v53 = vpack.c.bf16 %v3453_v35, %v3452_v34  ;;  %v7302_v24 = vpack.c.bf16 %v3437_v62, %v3436_v28  ;;  %v3440_v18 = vld [vmem:[%s11865_s9 + $0x330] sm:$0xff]  ;;  %v3413_v34 = vld [vmem:[%s11865_s9 + $0x258] sm:$0xff] }
 0x3ad   :  { %v3454_v30 = vld [vmem:[%s11865_s9 + $0x3a0] sm:$0xff]  ;;  %v3459_v45 = vld [vmem:[%s11865_s9 + $0x3c8] sm:$0xff] }
 0x3ae   :  { %3915 = vmatmul.mubr.f32.vlgmr.msra.gmra.mrb[30].mxu0 %v8625_v52  ;;  %7259 = vmatpush3.bf16.msra.mxu1 %v7258_v4  ;;  %v7272_v52 = vpack.c.bf16 %v3423_v27, %v3422_v11  ;;  %v3455_v4 = vld [vmem:[%s11865_s9 + $0x3a8] sm:$0xff]  ;;  %v3457_v11 = vld [vmem:[%s11865_s9 + $0x3b8] sm:$0xff]  ;;  %v3428_v27 = vld [vmem:[%s11865_s9 + $0x2d0] sm:$0xff] }
 0x3af   :  { %7267 = vmatpush3.bf16.msra.mxu0 %v7266_v0  ;;  %4054 = vmatprep.mubr.f32.mxu0 %v8760_v14  ;;  %v3407_v14 = vld [vmem:[%s11865_s9 + $0x228] sm:$0xff]  ;;  %v3426_v0 = vld [vmem:[%s11865_s9 + $0x2c0] sm:$0xff]  ;;  %v7308_v44 = vpack.c.bf16 %v3457_v11, %v3456_v26  ;;  %v3445_v26 = vld [vmem:[%s11865_s9 + $0x358] sm:$0xff] }
 0x3b0   :  { %7261 = vmatprep.subr.bf16.mxu1 %v7260_v10  ;;  %7269 = vmatprep.subr.bf16.mxu0 %v7268_v47  ;;  %v7274_v50 = vpack.c.bf16 %v3407_v14, %v3406_v54  ;;  %v7304_v10 = vpack.c.bf16 %v3455_v4, %v3454_v30  ;;  %v3439_v47 = vld [vmem:[%s11865_s9 + $0x328] sm:$0xff]  ;;  %v7280_v58 = vpack.c.bf16 %v3427_v19, %v3426_v0  ;;  %v3441_v54 = vld [vmem:[%s11865_s9 + $0x338] sm:$0xff]  ;;  %v3458_v35 = vld [vmem:[%s11865_s9 + $0x3c0] sm:$0xff] }
 0x3b1   :  { %v3430_v36 = vld [vmem:[%s11865_s9 + $0x2e0] sm:$0xff]  ;;  %v7312_v28 = vpack.c.bf16 %v3459_v45, %v3458_v35  ;;  %v3415_v30 = vld [vmem:[%s11865_s9 + $0x268] sm:$0xff]  ;;  %v3460_v4 = vld [vmem:[%s11865_s9 + $0x3d0] sm:$0xff] }
 0x3b2   :  { %7263 = vmatpush3.bf16.msra.mxu1 %v7262_v59  ;;  %v3429_v59 = vld [vmem:[%s11865_s9 + $0x2d8] sm:$0xff]  ;;  %v3442_v62 = vld [vmem:[%s11865_s9 + $0x340] sm:$0xff]  ;;  %v3416_v11 = vld [vmem:[%s11865_s9 + $0x270] sm:$0xff] }
 0x3b3   :  { %7271 = vmatpush3.bf16.msra.mxu0 %v7270_v40  ;;  %7297 = vmatprep.subr.bf16.mxu1 %v7296_v32  ;;  %v7284_v14 = vpack.c.bf16 %v3429_v59, %v3428_v27  ;;  %v3461_v0 = vld [vmem:[%s11865_s9 + $0x3d8] sm:$0xff]  ;;  %v3446_v35 = vld [vmem:[%s11865_s9 + $0x360] sm:$0xff] }
 0x3b4   :  { %7273 = vmatprep.subr.bf16.mxu0 %v7272_v52  ;;  %v3412_v52 = vld [vmem:[%s11865_s9 + $0x250] sm:$0xff]  ;;  %v3417_v59 = vld [vmem:[%s11865_s9 + $0x278] sm:$0xff] }
 0x3b5   :  { %3985 = vmatmul.mubr.f32.vlgmr.msra.gmra.mrb[38].mxu1 %v8680_v16  ;;  %v3438_v16 = vld [vmem:[%s11865_s9 + $0x320] sm:$0xff] }
 0x3b6   :  { %7299 = vmatpush3.bf16.msra.mxu1 %v7298_v49  ;;  %4124 = vmatprep.mubr.f32.mxu1 %v8827_v12  ;;  %v3411_v12 = vld [vmem:[%s11865_s9 + $0x248] sm:$0xff]  ;;  %v7306_v40 = vpack.c.bf16 %v3439_v47, %v3438_v16  ;;  %v7314_v16 = vpack.c.bf16 %v3443_v25, %v3442_v62  ;;  %v3465_v62 = vld [vmem:[%s11865_s9 + $0x3f8] sm:$0xff]  ;;  %v3484_v25 = vld [vmem:[%s11865_s9 + $0x490] sm:$0xff] }
 0x3b7   :  { %7275 = vmatpush3.bf16.msra.mxu0 %v7274_v50  ;;  %7301 = vmatprep.subr.bf16.mxu1 %v7300_v53  ;;  %v7282_v32 = vpack.c.bf16 %v3411_v12, %v3410_v39  ;;  %v3431_v49 = vld [vmem:[%s11865_s9 + $0x2e8] sm:$0xff]  ;;  %v7310_v50 = vpack.c.bf16 %v3441_v54, %v3440_v18  ;;  %v7286_v53 = vpack.c.bf16 %v3413_v34, %v3412_v52  ;;  %v3444_v12 = vld [vmem:[%s11865_s9 + $0x350] sm:$0xff]  ;;  %v3482_v18 = vld [vmem:[%s11865_s9 + $0x480] sm:$0xff] }
 0x3b8   :  { %7277 = vmatprep.subr.bf16.mxu0 %v7276_v1  ;;  %v3414_v1 = vld [vmem:[%s11865_s9 + $0x260] sm:$0xff]  ;;  %v7288_v61 = vpack.c.bf16 %v3431_v49, %v3430_v36  ;;  %v3483_v54 = vld [vmem:[%s11865_s9 + $0x488] sm:$0xff]  ;;  %v7318_v52 = vpack.c.bf16 %v3445_v26, %v3444_v12 }
 0x3b9   :  { %v7290_v39 = vpack.c.bf16 %v3415_v30, %v3414_v1  ;;  %v7328_v36 = vpack.c.bf16 %v3483_v54, %v3482_v18  ;;  %v3466_v49 = vld [vmem:[%s11865_s9 + $0x400] sm:$0xff]  ;;  %v3485_v1 = vld [vmem:[%s11865_s9 + $0x498] sm:$0xff]  ;;  %v3487_v26 = vld [vmem:[%s11865_s9 + $0x4a8] sm:$0xff] }
 0x3ba   :  { %7303 = vmatpush3.bf16.msra.mxu1 %v7302_v24  ;;  %v3432_v24 = vld [vmem:[%s11865_s9 + $0x2f0] sm:$0xff]  ;;  %v3486_v12 = vld [vmem:[%s11865_s9 + $0x4a0] sm:$0xff]  ;;  %v3517_v54 = vld [vmem:[%s11865_s9 + $0x598] sm:$0xff] }
 0x3bb   :  { %7279 = vmatpush3.bf16.msra.mxu0 %v7278_v5  ;;  %7305 = vmatprep.subr.bf16.mxu1 %v7304_v10  ;;  %v3433_v5 = vld [vmem:[%s11865_s9 + $0x2f8] sm:$0xff]  ;;  %v3516_v18 = vld [vmem:[%s11865_s9 + $0x590] sm:$0xff] }
 0x3bc   :  { %7281 = vmatprep.subr.bf16.mxu0 %v7280_v58  ;;  %v7316_v58 = vpack.c.bf16 %v3461_v0, %v3460_v4  ;;  %v7292_v27 = vpack.c.bf16 %v3433_v5, %v3432_v24  ;;  %v3448_v0 = vld [vmem:[%s11865_s9 + $0x370] sm:$0xff] }
 0x3bd   :  { %v3468_v24 = vld [vmem:[%s11865_s9 + $0x410] sm:$0xff] }
 0x3be   :  { %7307 = vmatpush3.bf16.msra.mxu1 %v7306_v40  ;;  %v3462_v40 = vld [vmem:[%s11865_s9 + $0x3e0] sm:$0xff] }
 0x3bf   :  { %7283 = vmatpush3.bf16.msra.mxu0 %v7282_v32  ;;  %7309 = vmatprep.subr.bf16.mxu1 %v7308_v44  ;;  %v3463_v32 = vld [vmem:[%s11865_s9 + $0x3e8] sm:$0xff] }
 0x3c0   :  { %7285 = vmatprep.subr.bf16.mxu0 %v7284_v14  ;;  %v7294_v14 = vpack.c.bf16 %v3417_v59, %v3416_v11  ;;  %v7320_v34 = vpack.c.bf16 %v3463_v32, %v3462_v40  ;;  %v3498_v40 = vld [vmem:[%s11865_s9 + $0x500] sm:$0xff]  ;;  %v3499_v32 = vld [vmem:[%s11865_s9 + $0x508] sm:$0xff] }
 0x3c1   :  { %v5471_v19 = vpop.f32.mrb[18].mxu0 }
 0x3c2   :  { %v5472_v10 = vpop.f32.mrb[19].mxu0  ;;  %7311 = vmatpush3.bf16.msra.mxu1 %v7310_v50  ;;  %v3467_v50 = vld [vmem:[%s11865_s9 + $0x408] sm:$0xff] }
 0x3c3   :  { %v5473_v47 = vadd.f32 %v5472_v10, %v5471_v19  ;;  %7287 = vmatpush3.bf16.msra.mxu0 %v7286_v53  ;;  %7313 = vmatprep.subr.bf16.mxu1 %v7312_v28  ;;  %v3464_v53 = vld [vmem:[%s11865_s9 + $0x3f0] sm:$0xff]  ;;  %v7330_v4 = vpack.c.bf16 %v3467_v50, %v3466_v49  ;;  %v3449_v19 = vld [vmem:[%s11865_s9 + $0x378] sm:$0xff] }
 0x3c4   :  { %7289 = vmatprep.subr.bf16.mxu0 %v7288_v61  ;;  %v7324_v10 = vpack.c.bf16 %v3465_v62, %v3464_v53  ;;  %v7326_v11 = vpack.c.bf16 %v3449_v19, %v3448_v0  ;;  %v3472_v49 = vld [vmem:[%s11865_s9 + $0x430] sm:$0xff]  ;;  %v3473_v53 = vld [vmem:[%s11865_s9 + $0x438] sm:$0xff]  ;;  %v3519_v62 = vld [vmem:[%s11865_s9 + $0x5a8] sm:$0xff] }
 0x3c5   :  { %v2563_v44 = vadd.f32 %v5473_v47, %v10407_v55  ;;  %v3447_v55 = vld [vmem:[%s11865_s9 + $0x368] sm:$0xff]  ;;  %v3469_v47 = vld [vmem:[%s11865_s9 + $0x418] sm:$0xff]  ;;  %v3474_v19 = vld [vmem:[%s11865_s9 + $0x440] sm:$0xff] }
 0x3c6   :  { %7315 = vmatpush3.bf16.msra.mxu1 %v7314_v16  ;;  %v7322_v30 = vpack.c.bf16 %v3447_v55, %v3446_v35  ;;  %v7332_v16 = vpack.c.bf16 %v3485_v1, %v3484_v25  ;;  %v7364_v55 = vpack.c.bf16 %v3517_v54, %v3516_v18  ;;  %v3490_v25 = vld [vmem:[%s11865_s9 + $0x4c0] sm:$0xff]  ;;  %v3491_v1 = vld [vmem:[%s11865_s9 + $0x4c8] sm:$0xff] }
 0x3c7   :  { %7291 = vmatpush3.bf16.msra.mxu0 %v7290_v39  ;;  %7317 = vmatprep.subr.bf16.mxu1 %v7316_v58  ;;  %v3514_v39 = vld [vmem:[%s11865_s9 + $0x580] sm:$0xff]  ;;  %v3515_v58 = vld [vmem:[%s11865_s9 + $0x588] sm:$0xff] }
 0x3c8   :  { %v5506_v45 = vpop.f32.mrb[26].mxu1  ;;  %7293 = vmatprep.subr.bf16.mxu0 %v7292_v27  ;;  %v7334_v27 = vpack.c.bf16 %v3469_v47, %v3468_v24  ;;  %v7360_v59 = vpack.c.bf16 %v3515_v58, %v3514_v39  ;;  %v3503_v0 = vld [vmem:[%s11865_s9 + $0x528] sm:$0xff]  ;;  %v7344_v24 = vpack.c.bf16 %v3491_v1, %v3490_v25  ;;  %v3492_v47 = vld [vmem:[%s11865_s9 + $0x4d0] sm:$0xff]  ;;  %v3493_v39 = vld [vmem:[%s11865_s9 + $0x4d8] sm:$0xff] }
 0x3c9   :  { %v5507_v28 = vpop.f32.mrb[27].mxu1  ;;  %v3495_v18 = vld [vmem:[%s11865_s9 + $0x4e8] sm:$0xff] }
 0x3ca   :  { %v5508_v61 = vadd.f32 %v5507_v28, %v5506_v45  ;;  %7319 = vmatpush3.bf16.msra.mxu1 %v7318_v52  ;;  %v3488_v52 = vld [vmem:[%s11865_s9 + $0x4b0] sm:$0xff]  ;;  %v3518_v28 = vld [vmem:[%s11865_s9 + $0x5a0] sm:$0xff] }
 0x3cb   :  { %7295 = vmatpush3.bf16.msra.mxu0 %v7294_v14  ;;  %7321 = vmatprep.subr.bf16.mxu1 %v7320_v34  ;;  %v3489_v14 = vld [vmem:[%s11865_s9 + $0x4b8] sm:$0xff]  ;;  %v7362_v34 = vpack.c.bf16 %v3499_v32, %v3498_v40  ;;  %v3500_v45 = vld [vmem:[%s11865_s9 + $0x510] sm:$0xff]  ;;  %v7348_v40 = vpack.c.bf16 %v3493_v39, %v3492_v47  ;;  %v3546_v39 = vld [vmem:[%s11865_s9 + $0x680] sm:$0xff] }
 0x3cc   :  { %v10606_v5 = vadd.f32 %v5508_v61, %v2563_v44  ;;  %7329 = vmatprep.subr.bf16.mxu0 %v7328_v36  ;;  %v3470_v44 = vld [vmem:[%s11865_s9 + $0x420] sm:$0xff]  ;;  %v3501_v36 = vld [vmem:[%s11865_s9 + $0x518] sm:$0xff]  ;;  %v7340_v50 = vpack.c.bf16 %v3489_v14, %v3488_v52 }
 0x3cd   :  { %v7366_v61 = vpack.c.bf16 %v3501_v36, %v3500_v45  ;;  %v3477_v32 = vld [vmem:[%s11865_s9 + $0x458] sm:$0xff]  ;;  %v3479_v36 = vld [vmem:[%s11865_s9 + $0x468] sm:$0xff] }
 0x3ce   :  { %4055 = vmatmul.mubr.f32.vlgmr.msra.gmra.mrb[32].mxu0 %v8880_v7  ;;  %7323 = vmatpush3.bf16.msra.mxu1 %v7322_v30  ;;  %v7336_v7 = vpack.c.bf16 %v3487_v26, %v3486_v12  ;;  %v7342_v30 = vpack.c.bf16 %v3473_v53, %v3472_v49  ;;  %v3524_v49 = vld [vmem:[%s11865_s9 + $0x5d0] sm:$0xff] }
 0x3cf   :  { %7331 = vmatpush3.bf16.msra.mxu0 %v7330_v4  ;;  %4194 = vmatprep.mubr.f32.mxu0 %v8905_v37  ;;  %v3471_v37 = vld [vmem:[%s11865_s9 + $0x428] sm:$0xff]  ;;  %v7368_v4 = vpack.c.bf16 %v3519_v62, %v3518_v28  ;;  %v3496_v28 = vld [vmem:[%s11865_s9 + $0x4f0] sm:$0xff]  ;;  %v3497_v62 = vld [vmem:[%s11865_s9 + $0x4f8] sm:$0xff] }
 0x3d0   :  { %7325 = vmatprep.subr.bf16.mxu1 %v7324_v10  ;;  %7333 = vmatprep.subr.bf16.mxu0 %v7332_v16  ;;  %v7338_v35 = vpack.c.bf16 %v3471_v37, %v3470_v44  ;;  %v3520_v10 = vld [vmem:[%s11865_s9 + $0x5b0] sm:$0xff]  ;;  %v3521_v16 = vld [vmem:[%s11865_s9 + $0x5b8] sm:$0xff]  ;;  %v3522_v44 = vld [vmem:[%s11865_s9 + $0x5c0] sm:$0xff] }
 0x3d1   :  { %v7372_v26 = vpack.c.bf16 %v3521_v16, %v3520_v10  ;;  %v3494_v37 = vld [vmem:[%s11865_s9 + $0x4e0] sm:$0xff]  ;;  %v3527_v16 = vld [vmem:[%s11865_s9 + $0x5e8] sm:$0xff] }
 0x3d2   :  { %7327 = vmatpush3.bf16.msra.mxu1 %v7326_v11  ;;  %v3504_v11 = vld [vmem:[%s11865_s9 + $0x530] sm:$0xff]  ;;  %v7352_v45 = vpack.c.bf16 %v3495_v18, %v3494_v37  ;;  %v3526_v10 = vld [vmem:[%s11865_s9 + $0x5e0] sm:$0xff]  ;;  %v3529_v18 = vld [vmem:[%s11865_s9 + $0x5f8] sm:$0xff] }
 0x3d3   :  { %7335 = vmatpush3.bf16.msra.mxu0 %v7334_v27  ;;  %7361 = vmatprep.subr.bf16.mxu1 %v7360_v59  ;;  %v3505_v27 = vld [vmem:[%s11865_s9 + $0x538] sm:$0xff]  ;;  %v3476_v59 = vld [vmem:[%s11865_s9 + $0x450] sm:$0xff] }
 0x3d4   :  { %7337 = vmatprep.subr.bf16.mxu0 %v7336_v7  ;;  %v3523_v7 = vld [vmem:[%s11865_s9 + $0x5c8] sm:$0xff]  ;;  %v7374_v54 = vpack.c.bf16 %v3505_v27, %v3504_v11  ;;  %v7350_v52 = vpack.c.bf16 %v3477_v32, %v3476_v59  ;;  %v7384_v11 = vpack.c.bf16 %v3527_v16, %v3526_v10  ;;  %v3510_v27 = vld [vmem:[%s11865_s9 + $0x560] sm:$0xff]  ;;  %v3581_v10 = vld [vmem:[%s11865_s9 + $0x798] sm:$0xff] }
 0x3d5   :  { %4125 = vmatmul.mubr.f32.vlgmr.msra.gmra.mrb[40].mxu1 %v8950_v63  ;;  %v3502_v63 = vld [vmem:[%s11865_s9 + $0x520] sm:$0xff]  ;;  %v7376_v14 = vpack.c.bf16 %v3523_v7, %v3522_v44  ;;  %v3531_v44 = vld [vmem:[%s11865_s9 + $0x608] sm:$0xff]  ;;  %v3528_v7 = vld [vmem:[%s11865_s9 + $0x5f0] sm:$0xff] }
 0x3d6   :  { %7363 = vmatpush3.bf16.msra.mxu1 %v7362_v34  ;;  %4264 = vmatprep.mubr.f32.mxu1 %v8970_v29  ;;  %v3475_v29 = vld [vmem:[%s11865_s9 + $0x448] sm:$0xff]  ;;  %v7370_v58 = vpack.c.bf16 %v3503_v0, %v3502_v63  ;;  %v3506_v34 = vld [vmem:[%s11865_s9 + $0x540] sm:$0xff]  ;;  %v3508_v63 = vld [vmem:[%s11865_s9 + $0x550] sm:$0xff] }
 0x3d7   :  { %7339 = vmatpush3.bf16.msra.mxu0 %v7338_v35  ;;  %7365 = vmatprep.subr.bf16.mxu1 %v7364_v55  ;;  %v7346_v12 = vpack.c.bf16 %v3475_v29, %v3474_v19  ;;  %v3507_v35 = vld [vmem:[%s11865_s9 + $0x548] sm:$0xff]  ;;  %v3478_v55 = vld [vmem:[%s11865_s9 + $0x460] sm:$0xff]  ;;  %v3509_v0 = vld [vmem:[%s11865_s9 + $0x558] sm:$0xff] }
 0x3d8   :  { %7341 = vmatprep.subr.bf16.mxu0 %v7340_v50  ;;  %v3525_v50 = vld [vmem:[%s11865_s9 + $0x5d8] sm:$0xff]  ;;  %v7378_v1 = vpack.c.bf16 %v3507_v35, %v3506_v34  ;;  %v3480_v19 = vld [vmem:[%s11865_s9 + $0x470] sm:$0xff]  ;;  %v3530_v32 = vld [vmem:[%s11865_s9 + $0x600] sm:$0xff] }
 0x3d9   :  { %v3481_v29 = vld [vmem:[%s11865_s9 + $0x478] sm:$0xff]  ;;  %v7394_v35 = vpack.c.bf16 %v3531_v44, %v3530_v32  ;;  %v3552_v16 = vld [vmem:[%s11865_s9 + $0x6b0] sm:$0xff]  ;;  %v3583_v32 = vld [vmem:[%s11865_s9 + $0x7a8] sm:$0xff] }
 0x3da   :  { %7367 = vmatpush3.bf16.msra.mxu1 %v7366_v61  ;;  %v3554_v44 = vld [vmem:[%s11865_s9 + $0x6c0] sm:$0xff] }
 0x3db   :  { %7343 = vmatpush3.bf16.msra.mxu0 %v7342_v30  ;;  %7369 = vmatprep.subr.bf16.mxu1 %v7368_v4  ;;  %v7354_v30 = vpack.c.bf16 %v3479_v36, %v3478_v55  ;;  %v7380_v4 = vpack.c.bf16 %v3525_v50, %v3524_v49  ;;  %v3512_v55 = vld [vmem:[%s11865_s9 + $0x570] sm:$0xff]  ;;  %v7388_v50 = vpack.c.bf16 %v3529_v18, %v3528_v7  ;;  %v3555_v7 = vld [vmem:[%s11865_s9 + $0x6c8] sm:$0xff] }
 0x3dc   :  { %7345 = vmatprep.subr.bf16.mxu0 %v7344_v24  ;;  %v7356_v24 = vpack.c.bf16 %v3497_v62, %v3496_v28  ;;  %v3532_v36 = vld [vmem:[%s11865_s9 + $0x610] sm:$0xff]  ;;  %v3533_v28 = vld [vmem:[%s11865_s9 + $0x618] sm:$0xff]  ;;  %v3578_v62 = vld [vmem:[%s11865_s9 + $0x780] sm:$0xff] }
 0x3de   :  { %7371 = vmatpush3.bf16.msra.mxu1 %v7370_v58  ;;  %v3547_v58 = vld [vmem:[%s11865_s9 + $0x688] sm:$0xff] }
 0x3df   :  { %7347 = vmatpush3.bf16.msra.mxu0 %v7346_v12  ;;  %7373 = vmatprep.subr.bf16.mxu1 %v7372_v26  ;;  %v7382_v12 = vpack.c.bf16 %v3509_v0, %v3508_v63  ;;  %v7358_v26 = vpack.c.bf16 %v3481_v29, %v3480_v19  ;;  %v3562_v0 = vld [vmem:[%s11865_s9 + $0x700] sm:$0xff]  ;;  %v3563_v19 = vld [vmem:[%s11865_s9 + $0x708] sm:$0xff]  ;;  %v3580_v29 = vld [vmem:[%s11865_s9 + $0x790] sm:$0xff] }
 0x3e0   :  { %7349 = vmatprep.subr.bf16.mxu0 %v7348_v40  ;;  %v7392_v40 = vpack.c.bf16 %v3547_v58, %v3546_v39  ;;  %v7426_v39 = vpack.c.bf16 %v3563_v19, %v3562_v0  ;;  %v3558_v0 = vld [vmem:[%s11865_s9 + $0x6e0] sm:$0xff]  ;;  %v3559_v19 = vld [vmem:[%s11865_s9 + $0x6e8] sm:$0xff] }
 0x3e1   :  { %v5541_v53 = vpop.f32.mrb[20].mxu0 }
 0x3e2   :  { %v5542_v25 = vpop.f32.mrb[21].mxu0  ;;  %7375 = vmatpush3.bf16.msra.mxu1 %v7374_v54  ;;  %v3548_v54 = vld [vmem:[%s11865_s9 + $0x690] sm:$0xff] }
 0x3e3   :  { %v5543_v61 = vadd.f32 %v5542_v25, %v5541_v53  ;;  %7351 = vmatpush3.bf16.msra.mxu0 %v7350_v52  ;;  %7377 = vmatprep.subr.bf16.mxu1 %v7376_v14  ;;  %v3549_v52 = vld [vmem:[%s11865_s9 + $0x698] sm:$0xff]  ;;  %v3579_v25 = vld [vmem:[%s11865_s9 + $0x788] sm:$0xff] }
 0x3e4   :  { %7353 = vmatprep.subr.bf16.mxu0 %v7352_v45  ;;  %v3513_v45 = vld [vmem:[%s11865_s9 + $0x578] sm:$0xff]  ;;  %v7396_v53 = vpack.c.bf16 %v3549_v52, %v3548_v54  ;;  %v7424_v63 = vpack.c.bf16 %v3579_v25, %v3578_v62  ;;  %v3567_v52 = vld [vmem:[%s11865_s9 + $0x728] sm:$0xff]  ;;  %v3568_v62 = vld [vmem:[%s11865_s9 + $0x730] sm:$0xff] }
 0x3e5   :  { %v2703_v47 = vadd.f32 %v5543_v61, %v10606_v5  ;;  %v3511_v5 = vld [vmem:[%s11865_s9 + $0x568] sm:$0xff]  ;;  %v3569_v25 = vld [vmem:[%s11865_s9 + $0x738] sm:$0xff] }
 0x3e6   :  { %7379 = vmatpush3.bf16.msra.mxu1 %v7378_v1  ;;  %v7386_v34 = vpack.c.bf16 %v3511_v5, %v3510_v27  ;;  %v3550_v1 = vld [vmem:[%s11865_s9 + $0x6a0] sm:$0xff]  ;;  %v3551_v61 = vld [vmem:[%s11865_s9 + $0x6a8] sm:$0xff]  ;;  %v3536_v27 = vld [vmem:[%s11865_s9 + $0x630] sm:$0xff] }
 0x3e7   :  { %7355 = vmatpush3.bf16.msra.mxu0 %v7354_v30  ;;  %7381 = vmatprep.subr.bf16.mxu1 %v7380_v4  ;;  %v7390_v30 = vpack.c.bf16 %v3513_v45, %v3512_v55  ;;  %v7398_v4 = vpack.c.bf16 %v3533_v28, %v3532_v36  ;;  %v3585_v55 = vld [vmem:[%s11865_s9 + $0x7b8] sm:$0xff]  ;;  %v3556_v45 = vld [vmem:[%s11865_s9 + $0x6d0] sm:$0xff] }
 0x3e8   :  { %v5576_v59 = vpop.f32.mrb[28].mxu1  ;;  %7357 = vmatprep.subr.bf16.mxu0 %v7356_v24  ;;  %v3534_v24 = vld [vmem:[%s11865_s9 + $0x620] sm:$0xff]  ;;  %v3557_v36 = vld [vmem:[%s11865_s9 + $0x6d8] sm:$0xff] }
 0x3e9   :  { %v5577_v37 = vpop.f32.mrb[29].mxu1 }
 0x3ea   :  { %v5578_v14 = vadd.f32 %v5577_v37, %v5576_v59  ;;  %7383 = vmatpush3.bf16.msra.mxu1 %v7382_v12  ;;  %v7428_v12 = vpack.c.bf16 %v3581_v10, %v3580_v29  ;;  %v3537_v59 = vld [vmem:[%s11865_s9 + $0x638] sm:$0xff]  ;;  %v3570_v29 = vld [vmem:[%s11865_s9 + $0x740] sm:$0xff]  ;;  %v3571_v10 = vld [vmem:[%s11865_s9 + $0x748] sm:$0xff] }
 0x3eb   :  { %7359 = vmatpush3.bf16.msra.mxu0 %v7358_v26  ;;  %7385 = vmatprep.subr.bf16.mxu1 %v7384_v11  ;;  %v3564_v26 = vld [vmem:[%s11865_s9 + $0x710] sm:$0xff]  ;;  %v3565_v11 = vld [vmem:[%s11865_s9 + $0x718] sm:$0xff]  ;;  %v7406_v18 = vpack.c.bf16 %v3537_v59, %v3536_v27  ;;  %v7442_v59 = vpack.c.bf16 %v3571_v10, %v3570_v29 }
 0x3ec   :  { %v10805_v49 = vadd.f32 %v5578_v14, %v2703_v47  ;;  %7393 = vmatprep.subr.bf16.mxu0 %v7392_v40  ;;  %v3553_v47 = vld [vmem:[%s11865_s9 + $0x6b8] sm:$0xff]  ;;  %v3582_v40 = vld [vmem:[%s11865_s9 + $0x7a0] sm:$0xff]  ;;  %v7430_v37 = vpack.c.bf16 %v3565_v11, %v3564_v26  ;;  %v3560_v11 = vld [vmem:[%s11865_s9 + $0x6f0] sm:$0xff] }
 0x3ed   :  { %v7404_v5 = vpack.c.bf16 %v3553_v47, %v3552_v16  ;;  %v7432_v54 = vpack.c.bf16 %v3583_v32, %v3582_v40  ;;  %v3538_v14 = vld [vmem:[%s11865_s9 + $0x640] sm:$0xff]  ;;  %v7416_v47 = vpack.c.bf16 %v3559_v19, %v3558_v0  ;;  %v3561_v27 = vld [vmem:[%s11865_s9 + $0x6f8] sm:$0xff]  ;;  %v3596_v29 = vld [vmem:[%s11865_s9 + $0x810] sm:$0xff] }
 0x3ee   :  { %4195 = vmatmul.mubr.f32.vlgmr.msra.gmra.mrb[34].mxu0 %v9144_v46  ;;  %7387 = vmatpush3.bf16.msra.mxu1 %v7386_v34  ;;  %v7400_v46 = vpack.c.bf16 %v3551_v61, %v3550_v1  ;;  %v7408_v34 = vpack.c.bf16 %v3555_v7, %v3554_v44  ;;  %v3540_v1 = vld [vmem:[%s11865_s9 + $0x650] sm:$0xff]  ;;  %v7412_v61 = vpack.c.bf16 %v3557_v36, %v3556_v45  ;;  %v3542_v16 = vld [vmem:[%s11865_s9 + $0x660] sm:$0xff] }
 0x3ef   :  { %7395 = vmatpush3.bf16.msra.mxu0 %v7394_v35  ;;  %4334 = vmatprep.mubr.f32.mxu0 %v9158_v60  ;;  %v3535_v60 = vld [vmem:[%s11865_s9 + $0x628] sm:$0xff]  ;;  %v3584_v35 = vld [vmem:[%s11865_s9 + $0x7b0] sm:$0xff] }
 0x3f0   :  { %7389 = vmatprep.subr.bf16.mxu1 %v7388_v50  ;;  %7397 = vmatprep.subr.bf16.mxu0 %v7396_v53  ;;  %v7402_v58 = vpack.c.bf16 %v3535_v60, %v3534_v24  ;;  %v7436_v28 = vpack.c.bf16 %v3585_v55, %v3584_v35  ;;  %v7438_v24 = vpack.c.bf16 %v3569_v25, %v3568_v62  ;;  %v3572_v7 = vld [vmem:[%s11865_s9 + $0x750] sm:$0xff]  ;;  %v3611_v35 = vld [vmem:[%s11865_s9 + $0x888] sm:$0xff]  ;;  %v3594_v62 = vld [vmem:[%s11865_s9 + $0x800] sm:$0xff] }
 0x3f1   :  { %v3595_v25 = vld [vmem:[%s11865_s9 + $0x808] sm:$0xff] }
 0x3f2   :  { %7391 = vmatpush3.bf16.msra.mxu1 %v7390_v30  ;;  %v3541_v30 = vld [vmem:[%s11865_s9 + $0x658] sm:$0xff] }
 0x3f3   :  { %7399 = vmatpush3.bf16.msra.mxu0 %v7398_v4  ;;  %7425 = vmatprep.subr.bf16.mxu1 %v7424_v63  ;;  %v3586_v4 = vld [vmem:[%s11865_s9 + $0x7c0] sm:$0xff]  ;;  %v3587_v63 = vld [vmem:[%s11865_s9 + $0x7c8] sm:$0xff] }
 0x3f4   :  { %7401 = vmatprep.subr.bf16.mxu0 %v7400_v46  ;;  %v7414_v46 = vpack.c.bf16 %v3541_v30, %v3540_v1  ;;  %v7440_v60 = vpack.c.bf16 %v3587_v63, %v3586_v4  ;;  %v3592_v1 = vld [vmem:[%s11865_s9 + $0x7f0] sm:$0xff]  ;;  %v3593_v30 = vld [vmem:[%s11865_s9 + $0x7f8] sm:$0xff] }
 0x3f5   :  { %4265 = vmatmul.mubr.f32.vlgmr.msra.gmra.mrb[42].mxu1 %v8882_v8  ;;  %v3566_v8 = vld [vmem:[%s11865_s9 + $0x720] sm:$0xff]  ;;  %v3612_v4 = vld [vmem:[%s11865_s9 + $0x890] sm:$0xff]  ;;  %v3613_v63 = vld [vmem:[%s11865_s9 + $0x898] sm:$0xff] }
 0x3f6   :  { %7427 = vmatpush3.bf16.msra.mxu1 %v7426_v39  ;;  %4404 = vmatprep.mubr.f32.mxu1 %v9216_v38  ;;  %v3539_v38 = vld [vmem:[%s11865_s9 + $0x648] sm:$0xff]  ;;  %v7434_v50 = vpack.c.bf16 %v3567_v52, %v3566_v8  ;;  %v3545_v8 = vld [vmem:[%s11865_s9 + $0x678] sm:$0xff]  ;;  %v3590_v52 = vld [vmem:[%s11865_s9 + $0x7e0] sm:$0xff] }
 0x3f7   :  { %7403 = vmatpush3.bf16.msra.mxu0 %v7402_v58  ;;  %7429 = vmatprep.subr.bf16.mxu1 %v7428_v12  ;;  %v7410_v53 = vpack.c.bf16 %v3539_v38, %v3538_v14  ;;  %v3543_v39 = vld [vmem:[%s11865_s9 + $0x668] sm:$0xff]  ;;  %v3588_v58 = vld [vmem:[%s11865_s9 + $0x7d0] sm:$0xff]  ;;  %v3589_v12 = vld [vmem:[%s11865_s9 + $0x7d8] sm:$0xff] }
 0x3f8   :  { %7405 = vmatprep.subr.bf16.mxu0 %v7404_v5  ;;  %v7418_v32 = vpack.c.bf16 %v3543_v39, %v3542_v16  ;;  %v7444_v44 = vpack.c.bf16 %v3589_v12, %v3588_v58  ;;  %v3591_v14 = vld [vmem:[%s11865_s9 + $0x7e8] sm:$0xff]  ;;  %v3610_v38 = vld [vmem:[%s11865_s9 + $0x880] sm:$0xff]  ;;  %v7452_v16 = vpack.c.bf16 %v3593_v30, %v3592_v1  ;;  %v3597_v39 = vld [vmem:[%s11865_s9 + $0x818] sm:$0xff] }
 0x3f9   :  { %v7448_v36 = vpack.c.bf16 %v3591_v14, %v3590_v52  ;;  %v3642_v58 = vld [vmem:[%s11865_s9 + $0x980] sm:$0xff]  ;;  %v3643_v12 = vld [vmem:[%s11865_s9 + $0x988] sm:$0xff] }
 0x3fa   :  { %7431 = vmatpush3.bf16.msra.mxu1 %v7430_v37  ;;  %v3573_v37 = vld [vmem:[%s11865_s9 + $0x758] sm:$0xff]  ;;  %v3631_v1 = vld [vmem:[%s11865_s9 + $0x928] sm:$0xff] }
 0x3fb   :  { %7407 = vmatpush3.bf16.msra.mxu0 %v7406_v18  ;;  %7433 = vmatprep.subr.bf16.mxu1 %v7432_v54  ;;  %v3544_v18 = vld [vmem:[%s11865_s9 + $0x670] sm:$0xff]  ;;  %v7420_v54 = vpack.c.bf16 %v3561_v27, %v3560_v11  ;;  %v7446_v55 = vpack.c.bf16 %v3573_v37, %v3572_v7  ;;  %v3615_v11 = vld [vmem:[%s11865_s9 + $0x8a8] sm:$0xff]  ;;  %v3645_v37 = vld [vmem:[%s11865_s9 + $0x998] sm:$0xff] }
 0x3fc   :  { %7409 = vmatprep.subr.bf16.mxu0 %v7408_v34  ;;  %v7422_v45 = vpack.c.bf16 %v3545_v8, %v3544_v18  ;;  %v3644_v7 = vld [vmem:[%s11865_s9 + $0x990] sm:$0xff] }
 0x3fd   :  { %v3616_v18 = vld [vmem:[%s11865_s9 + $0x8b0] sm:$0xff]  ;;  %v7492_v14 = vpack.c.bf16 %v3645_v37, %v3644_v7  ;;  %v3607_v7 = vld [vmem:[%s11865_s9 + $0x868] sm:$0xff] }
 0x3fe   :  { %7435 = vmatpush3.bf16.msra.mxu1 %v7434_v50  ;;  %v3574_v50 = vld [vmem:[%s11865_s9 + $0x760] sm:$0xff]  ;;  %v3652_v37 = vld [vmem:[%s11865_s9 + $0x9d0] sm:$0xff] }
 0x3ff   :  { %7411 = vmatpush3.bf16.msra.mxu0 %v7410_v53  ;;  %7437 = vmatprep.subr.bf16.mxu1 %v7436_v28  ;;  %v7456_v28 = vpack.c.bf16 %v3611_v35, %v3610_v38  ;;  %v3629_v38 = vld [vmem:[%s11865_s9 + $0x918] sm:$0xff]  ;;  %v3600_v35 = vld [vmem:[%s11865_s9 + $0x830] sm:$0xff] }
 0x400   :  { %7413 = vmatprep.subr.bf16.mxu0 %v7412_v61 }
 0x401   :  { %v5611_v26 = vpop.f32.mrb[22].mxu0 }
 0x402   :  { %v5612_v5 = vpop.f32.mrb[23].mxu0  ;;  %7439 = vmatpush3.bf16.msra.mxu1 %v7438_v24  ;;  %v7458_v24 = vpack.c.bf16 %v3595_v25, %v3594_v62 }
 0x403   :  { %v5613_v40 = vadd.f32 %v5612_v5, %v5611_v26  ;;  %7415 = vmatpush3.bf16.msra.mxu0 %v7414_v46  ;;  %7441 = vmatprep.subr.bf16.mxu1 %v7440_v60  ;;  %v3576_v46 = vld [vmem:[%s11865_s9 + $0x770] sm:$0xff]  ;;  %v3577_v60 = vld [vmem:[%s11865_s9 + $0x778] sm:$0xff]  ;;  %v3614_v26 = vld [vmem:[%s11865_s9 + $0x8a0] sm:$0xff]  ;;  %v7462_v5 = vpack.c.bf16 %v3597_v39, %v3596_v29 }
 0x404   :  { %7417 = vmatprep.subr.bf16.mxu0 %v7416_v47  ;;  %v7460_v47 = vpack.c.bf16 %v3613_v63, %v3612_v4  ;;  %v7454_v27 = vpack.c.bf16 %v3577_v60, %v3576_v46  ;;  %v3648_v4 = vld [vmem:[%s11865_s9 + $0x9b0] sm:$0xff]  ;;  %v3649_v63 = vld [vmem:[%s11865_s9 + $0x9b8] sm:$0xff] }
 0x405   :  { %v2843_v34 = vadd.f32 %v5613_v40, %v10805_v49  ;;  %v3575_v49 = vld [vmem:[%s11865_s9 + $0x768] sm:$0xff]  ;;  %v3626_v40 = vld [vmem:[%s11865_s9 + $0x900] sm:$0xff]  ;;  %v7500_v60 = vpack.c.bf16 %v3649_v63, %v3648_v4  ;;  %v3632_v29 = vld [vmem:[%s11865_s9 + $0x930] sm:$0xff] }
 0x406   :  { %7443 = vmatpush3.bf16.msra.mxu1 %v7442_v59  ;;  %v7450_v19 = vpack.c.bf16 %v3575_v49, %v3574_v50  ;;  %v7488_v59 = vpack.c.bf16 %v3643_v12, %v3642_v58  ;;  %v3647_v50 = vld [vmem:[%s11865_s9 + $0x9a8] sm:$0xff]  ;;  %v3618_v49 = vld [vmem:[%s11865_s9 + $0x8c0] sm:$0xff]  ;;  %v3605_v58 = vld [vmem:[%s11865_s9 + $0x858] sm:$0xff] }
 0x407   :  { %7419 = vmatpush3.bf16.msra.mxu0 %v7418_v32  ;;  %7445 = vmatprep.subr.bf16.mxu1 %v7444_v44  ;;  %v3627_v32 = vld [vmem:[%s11865_s9 + $0x908] sm:$0xff]  ;;  %v3598_v44 = vld [vmem:[%s11865_s9 + $0x820] sm:$0xff] }
 0x408   :  { %v5646_v53 = vpop.f32.mrb[30].mxu1  ;;  %7421 = vmatprep.subr.bf16.mxu0 %v7420_v54  ;;  %v3617_v54 = vld [vmem:[%s11865_s9 + $0x8b8] sm:$0xff]  ;;  %v7490_v8 = vpack.c.bf16 %v3627_v32, %v3626_v40  ;;  %v3650_v12 = vld [vmem:[%s11865_s9 + $0x9c0] sm:$0xff] }
 0x409   :  { %v5647_v61 = vpop.f32.mrb[31].mxu1  ;;  %v3634_v32 = vld [vmem:[%s11865_s9 + $0x940] sm:$0xff] }
 0x40a   :  { %v5648_v0 = vadd.f32 %v5647_v61, %v5646_v53  ;;  %7447 = vmatpush3.bf16.msra.mxu1 %v7446_v55  ;;  %v7468_v55 = vpack.c.bf16 %v3617_v54, %v3616_v18  ;;  %v3619_v53 = vld [vmem:[%s11865_s9 + $0x8c8] sm:$0xff]  ;;  %v3602_v61 = vld [vmem:[%s11865_s9 + $0x840] sm:$0xff]  ;;  %v3653_v18 = vld [vmem:[%s11865_s9 + $0x9d8] sm:$0xff] }
 0x40b   :  { %7423 = vmatpush3.bf16.msra.mxu0 %v7422_v45  ;;  %7449 = vmatprep.subr.bf16.mxu1 %v7448_v36  ;;  %v3601_v45 = vld [vmem:[%s11865_s9 + $0x838] sm:$0xff]  ;;  %v3646_v36 = vld [vmem:[%s11865_s9 + $0x9a0] sm:$0xff]  ;;  %v7472_v30 = vpack.c.bf16 %v3619_v53, %v3618_v49 }
 0x40c   :  { %v11004_v10 = vadd.f32 %v5648_v0, %v2843_v34  ;;  %7457 = vmatprep.subr.bf16.mxu0 %v7456_v28  ;;  %v3628_v34 = vld [vmem:[%s11865_s9 + $0x910] sm:$0xff]  ;;  %v7470_v62 = vpack.c.bf16 %v3601_v45, %v3600_v35  ;;  %v7496_v25 = vpack.c.bf16 %v3647_v50, %v3646_v36  ;;  %v3637_v36 = vld [vmem:[%s11865_s9 + $0x958] sm:$0xff]  ;;  %v3638_v4 = vld [vmem:[%s11865_s9 + $0x960] sm:$0xff] }
 0x40d   :  { %v7494_v28 = vpack.c.bf16 %v3629_v38, %v3628_v34  ;;  %v3620_v0 = vld [vmem:[%s11865_s9 + $0x8d0] sm:$0xff]  ;;  %v3609_v53 = vld [vmem:[%s11865_s9 + $0x878] sm:$0xff] }
 0x40e   :  { %4335 = vmatmul.mubr.f32.vlgmr.msra.gmra.mrb[36].mxu0 %v8682_v17  ;;  %7451 = vmatpush3.bf16.msra.mxu1 %v7450_v19  ;;  %v7464_v17 = vpack.c.bf16 %v3615_v11, %v3614_v26  ;;  %v3621_v19 = vld [vmem:[%s11865_s9 + $0x8d8] sm:$0xff]  ;;  %v3651_v26 = vld [vmem:[%s11865_s9 + $0x9c8] sm:$0xff]  ;;  %v3622_v11 = vld [vmem:[%s11865_s9 + $0x8e0] sm:$0xff] }
 0x40f   :  { %7459 = vmatpush3.bf16.msra.mxu0 %v7458_v24  ;;  %4474 = vmatprep.mubr.f32.mxu0 %v8762_v15  ;;  %v3599_v15 = vld [vmem:[%s11865_s9 + $0x828] sm:$0xff]  ;;  %v7476_v39 = vpack.c.bf16 %v3621_v19, %v3620_v0  ;;  %v7504_v40 = vpack.c.bf16 %v3651_v26, %v3650_v12  ;;  %v3636_v45 = vld [vmem:[%s11865_s9 + $0x950] sm:$0xff]  ;;  %v3658_v19 = vld [vmem:[%s11865_s9 + $0xa00] sm:$0xff] }
 0x410   :  { %7453 = vmatprep.subr.bf16.mxu1 %v7452_v16  ;;  %7461 = vmatprep.subr.bf16.mxu0 %v7460_v47  ;;  %v7466_v52 = vpack.c.bf16 %v3599_v15, %v3598_v44  ;;  %v3633_v16 = vld [vmem:[%s11865_s9 + $0x938] sm:$0xff]  ;;  %v3604_v47 = vld [vmem:[%s11865_s9 + $0x850] sm:$0xff]  ;;  %v3635_v44 = vld [vmem:[%s11865_s9 + $0x948] sm:$0xff] }
 0x411   :  { %v7506_v34 = vpack.c.bf16 %v3635_v44, %v3634_v32  ;;  %v3608_v50 = vld [vmem:[%s11865_s9 + $0x870] sm:$0xff]  ;;  %v3661_v32 = vld [vmem:[%s11865_s9 + $0xa18] sm:$0xff]  ;;  %v3706_v44 = vld [vmem:[%s11865_s9 + $0xb80] sm:$0xff] }
 0x412   :  { %7455 = vmatpush3.bf16.msra.mxu1 %v7454_v27  ;;  %v3623_v27 = vld [vmem:[%s11865_s9 + $0x8e8] sm:$0xff]  ;;  %v3640_v26 = vld [vmem:[%s11865_s9 + $0x970] sm:$0xff] }
 0x413   :  { %7463 = vmatpush3.bf16.msra.mxu0 %v7462_v5  ;;  %7489 = vmatprep.subr.bf16.mxu1 %v7488_v59  ;;  %v7502_v5 = vpack.c.bf16 %v3633_v16, %v3632_v29  ;;  %v7478_v59 = vpack.c.bf16 %v3605_v58, %v3604_v47  ;;  %v7480_v15 = vpack.c.bf16 %v3623_v27, %v3622_v11  ;;  %v3657_v29 = vld [vmem:[%s11865_s9 + $0x9f8] sm:$0xff]  ;;  %v3676_v16 = vld [vmem:[%s11865_s9 + $0xa90] sm:$0xff] }
 0x414   :  { %7465 = vmatprep.subr.bf16.mxu0 %v7464_v17  ;;  %v3606_v17 = vld [vmem:[%s11865_s9 + $0x860] sm:$0xff]  ;;  %v3677_v47 = vld [vmem:[%s11865_s9 + $0xa98] sm:$0xff]  ;;  %v3660_v27 = vld [vmem:[%s11865_s9 + $0xa10] sm:$0xff] }
 0x415   :  { %4405 = vmatmul.mubr.f32.vlgmr.msra.gmra.mrb[44].mxu1 %v8955_v22  ;;  %v3630_v22 = vld [vmem:[%s11865_s9 + $0x920] sm:$0xff]  ;;  %v7482_v35 = vpack.c.bf16 %v3607_v7, %v3606_v17  ;;  %v3641_v11 = vld [vmem:[%s11865_s9 + $0x978] sm:$0xff]  ;;  %v3707_v17 = vld [vmem:[%s11865_s9 + $0xb88] sm:$0xff] }
 0x416   :  { %7491 = vmatpush3.bf16.msra.mxu1 %v7490_v8  ;;  %4544 = vmatprep.mubr.f32.mxu1 %v9029_v33  ;;  %v3603_v33 = vld [vmem:[%s11865_s9 + $0x848] sm:$0xff]  ;;  %v7498_v24 = vpack.c.bf16 %v3631_v1, %v3630_v22  ;;  %v3624_v8 = vld [vmem:[%s11865_s9 + $0x8f0] sm:$0xff]  ;;  %v3674_v22 = vld [vmem:[%s11865_s9 + $0xa80] sm:$0xff] }
 0x417   :  { %7467 = vmatpush3.bf16.msra.mxu0 %v7466_v52  ;;  %7493 = vmatprep.subr.bf16.mxu1 %v7492_v14  ;;  %v7474_v46 = vpack.c.bf16 %v3603_v33, %v3602_v61  ;;  %v3625_v52 = vld [vmem:[%s11865_s9 + $0x8f8] sm:$0xff]  ;;  %v3675_v1 = vld [vmem:[%s11865_s9 + $0xa88] sm:$0xff]  ;;  %v7510_v61 = vpack.c.bf16 %v3637_v36, %v3636_v45 }
 0x418   :  { %7469 = vmatprep.subr.bf16.mxu0 %v7468_v55  ;;  %v7508_v55 = vpack.c.bf16 %v3653_v18, %v3652_v37  ;;  %v7484_v49 = vpack.c.bf16 %v3625_v52, %v3624_v8  ;;  %v7520_v0 = vpack.c.bf16 %v3675_v1, %v3674_v22  ;;  %v3679_v7 = vld [vmem:[%s11865_s9 + $0xaa8] sm:$0xff]  ;;  %v7518_v37 = vpack.c.bf16 %v3641_v11, %v3640_v26  ;;  %v3690_v8 = vld [vmem:[%s11865_s9 + $0xb00] sm:$0xff]  ;;  %v3668_v26 = vld [vmem:[%s11865_s9 + $0xa50] sm:$0xff] }
 0x419   :  { %v7526_v18 = vpack.c.bf16 %v3661_v32, %v3660_v27  ;;  %v3691_v52 = vld [vmem:[%s11865_s9 + $0xb08] sm:$0xff]  ;;  %v3710_v22 = vld [vmem:[%s11865_s9 + $0xba0] sm:$0xff]  ;;  %v3669_v27 = vld [vmem:[%s11865_s9 + $0xa58] sm:$0xff] }
 0x41a   :  { %7495 = vmatpush3.bf16.msra.mxu1 %v7494_v28  ;;  %v3654_v28 = vld [vmem:[%s11865_s9 + $0x9e0] sm:$0xff]  ;;  %v7554_v45 = vpack.c.bf16 %v3691_v52, %v3690_v8  ;;  %v3711_v1 = vld [vmem:[%s11865_s9 + $0xba8] sm:$0xff] }
 0x41b   :  { %7471 = vmatpush3.bf16.msra.mxu0 %v7470_v62  ;;  %7497 = vmatprep.subr.bf16.mxu1 %v7496_v25  ;;  %v3655_v62 = vld [vmem:[%s11865_s9 + $0x9e8] sm:$0xff]  ;;  %v3686_v32 = vld [vmem:[%s11865_s9 + $0xae0] sm:$0xff] }
 0x41c   :  { %7473 = vmatprep.subr.bf16.mxu0 %v7472_v30  ;;  %v7486_v30 = vpack.c.bf16 %v3609_v53, %v3608_v50  ;;  %v7512_v33 = vpack.c.bf16 %v3655_v62, %v3654_v28  ;;  %v3693_v53 = vld [vmem:[%s11865_s9 + $0xb18] sm:$0xff]  ;;  %v3664_v28 = vld [vmem:[%s11865_s9 + $0xa30] sm:$0xff]  ;;  %v3671_v52 = vld [vmem:[%s11865_s9 + $0xa68] sm:$0xff] }
 0x41e   :  { %7499 = vmatpush3.bf16.msra.mxu1 %v7498_v24  ;;  %v3659_v24 = vld [vmem:[%s11865_s9 + $0xa08] sm:$0xff] }
 0x41f   :  { %7475 = vmatpush3.bf16.msra.mxu0 %v7474_v46  ;;  %7501 = vmatprep.subr.bf16.mxu1 %v7500_v60  ;;  %v3656_v46 = vld [vmem:[%s11865_s9 + $0x9f0] sm:$0xff]  ;;  %v7522_v12 = vpack.c.bf16 %v3659_v24, %v3658_v19 }
 0x420   :  { %7477 = vmatprep.subr.bf16.mxu0 %v7476_v39  ;;  %v3712_v24 = vld [vmem:[%s11865_s9 + $0xbb0] sm:$0xff] }
 0x421   :  { %v5681_v54 = vpop.f32.mrb[24].mxu0 }
 0x422   :  { %v5682_v14 = vpop.f32.mrb[25].mxu0  ;;  %7503 = vmatpush3.bf16.msra.mxu1 %v7502_v5 }
 0x423   :  { %v5683_v38 = vadd.f32 %v5682_v14, %v5681_v54  ;;  %7479 = vmatpush3.bf16.msra.mxu0 %v7478_v59  ;;  %7505 = vmatprep.subr.bf16.mxu1 %v7504_v40  ;;  %v7516_v59 = vpack.c.bf16 %v3657_v29, %v3656_v46  ;;  %v7524_v40 = vpack.c.bf16 %v3677_v47, %v3676_v16  ;;  %v3662_v14 = vld [vmem:[%s11865_s9 + $0xa20] sm:$0xff]  ;;  %v3713_v46 = vld [vmem:[%s11865_s9 + $0xbb8] sm:$0xff] }
 0x424   :  { %7481 = vmatprep.subr.bf16.mxu0 %v7480_v15  ;;  %v3678_v15 = vld [vmem:[%s11865_s9 + $0xaa0] sm:$0xff]  ;;  %v7552_v54 = vpack.c.bf16 %v3707_v17, %v3706_v44  ;;  %v3685_v29 = vld [vmem:[%s11865_s9 + $0xad8] sm:$0xff]  ;;  %v3687_v44 = vld [vmem:[%s11865_s9 + $0xae8] sm:$0xff] }
 0x425   :  { %v2983_v25 = vadd.f32 %v5683_v38, %v11004_v10  ;;  %v3639_v10 = vld [vmem:[%s11865_s9 + $0x968] sm:$0xff]  ;;  %v3709_v38 = vld [vmem:[%s11865_s9 + $0xb98] sm:$0xff]  ;;  %v7544_v8 = vpack.c.bf16 %v3687_v44, %v3686_v32 }
 0x426   :  { %7507 = vmatpush3.bf16.msra.mxu1 %v7506_v34  ;;  %v7514_v58 = vpack.c.bf16 %v3639_v10, %v3638_v4  ;;  %v3708_v34 = vld [vmem:[%s11865_s9 + $0xb90] sm:$0xff]  ;;  %v7560_v10 = vpack.c.bf16 %v3711_v1, %v3710_v22  ;;  %v3718_v22 = vld [vmem:[%s11865_s9 + $0xbe0] sm:$0xff]  ;;  %v3719_v1 = vld [vmem:[%s11865_s9 + $0xbe8] sm:$0xff] }
 0x427   :  { %7483 = vmatpush3.bf16.msra.mxu0 %v7482_v35  ;;  %7509 = vmatprep.subr.bf16.mxu1 %v7508_v55  ;;  %v3680_v35 = vld [vmem:[%s11865_s9 + $0xab0] sm:$0xff]  ;;  %v3681_v55 = vld [vmem:[%s11865_s9 + $0xab8] sm:$0xff]  ;;  %v7556_v50 = vpack.c.bf16 %v3709_v38, %v3708_v34 }
 0x428   :  { %v5716_v63 = vpop.f32.mrb[32].mxu1  ;;  %7485 = vmatprep.subr.bf16.mxu0 %v7484_v49  ;;  %v3692_v49 = vld [vmem:[%s11865_s9 + $0xb10] sm:$0xff]  ;;  %v7532_v62 = vpack.c.bf16 %v3681_v55, %v3680_v35  ;;  %v3689_v38 = vld [vmem:[%s11865_s9 + $0xaf8] sm:$0xff] }
 0x429   :  { %v5717_v60 = vpop.f32.mrb[33].mxu1  ;;  %v3688_v34 = vld [vmem:[%s11865_s9 + $0xaf0] sm:$0xff]  ;;  %v3725_v44 = vld [vmem:[%s11865_s9 + $0xc18] sm:$0xff] }
 0x42a   :  { %v5718_v39 = vadd.f32 %v5717_v60, %v5716_v63  ;;  %7511 = vmatpush3.bf16.msra.mxu1 %v7510_v61  ;;  %v3682_v61 = vld [vmem:[%s11865_s9 + $0xac0] sm:$0xff]  ;;  %v3695_v63 = vld [vmem:[%s11865_s9 + $0xb28] sm:$0xff]  ;;  %v3684_v60 = vld [vmem:[%s11865_s9 + $0xad0] sm:$0xff] }
 0x42b   :  { %7487 = vmatpush3.bf16.msra.mxu0 %v7486_v30  ;;  %7513 = vmatprep.subr.bf16.mxu1 %v7512_v33  ;;  %v3683_v30 = vld [vmem:[%s11865_s9 + $0xac8] sm:$0xff]  ;;  %v7558_v33 = vpack.c.bf16 %v3693_v53, %v3692_v49  ;;  %v7540_v11 = vpack.c.bf16 %v3685_v29, %v3684_v60  ;;  %v3700_v49 = vld [vmem:[%s11865_s9 + $0xb50] sm:$0xff]  ;;  %v3701_v53 = vld [vmem:[%s11865_s9 + $0xb58] sm:$0xff] }
 0x42c   :  { %v11203_v5 = vadd.f32 %v5718_v39, %v2983_v25  ;;  %7521 = vmatprep.subr.bf16.mxu0 %v7520_v0  ;;  %v3665_v25 = vld [vmem:[%s11865_s9 + $0xa38] sm:$0xff]  ;;  %v3666_v0 = vld [vmem:[%s11865_s9 + $0xa40] sm:$0xff]  ;;  %v7536_v19 = vpack.c.bf16 %v3683_v30, %v3682_v61  ;;  %v7564_v39 = vpack.c.bf16 %v3713_v46, %v3712_v24  ;;  %v3723_v24 = vld [vmem:[%s11865_s9 + $0xc08] sm:$0xff] }
 0x42d   :  { %v7534_v4 = vpack.c.bf16 %v3665_v25, %v3664_v28  ;;  %v3672_v28 = vld [vmem:[%s11865_s9 + $0xa70] sm:$0xff]  ;;  %v3673_v25 = vld [vmem:[%s11865_s9 + $0xa78] sm:$0xff]  ;;  %v3738_v30 = vld [vmem:[%s11865_s9 + $0xc80] sm:$0xff] }
 0x42e   :  { %4475 = vmatmul.mubr.f32.vlgmr.msra.gmra.mrb[38].mxu0 %v9570_v51  ;;  %7515 = vmatpush3.bf16.msra.mxu1 %v7514_v58  ;;  %v7528_v51 = vpack.c.bf16 %v3679_v7, %v3678_v15  ;;  %v3696_v58 = vld [vmem:[%s11865_s9 + $0xb30] sm:$0xff]  ;;  %v7542_v15 = vpack.c.bf16 %v3669_v27, %v3668_v26  ;;  %v3721_v29 = vld [vmem:[%s11865_s9 + $0xbf8] sm:$0xff] }
 0x42f   :  { %7523 = vmatpush3.bf16.msra.mxu0 %v7522_v12  ;;  %4614 = vmatprep.mubr.f32.mxu0 %v8829_v13  ;;  %v3663_v13 = vld [vmem:[%s11865_s9 + $0xa28] sm:$0xff]  ;;  %v3697_v12 = vld [vmem:[%s11865_s9 + $0xb38] sm:$0xff]  ;;  %v3720_v46 = vld [vmem:[%s11865_s9 + $0xbf0] sm:$0xff] }
 0x430   :  { %7517 = vmatprep.subr.bf16.mxu1 %v7516_v59  ;;  %7525 = vmatprep.subr.bf16.mxu0 %v7524_v40  ;;  %v7530_v36 = vpack.c.bf16 %v3663_v13, %v3662_v14  ;;  %v3714_v59 = vld [vmem:[%s11865_s9 + $0xbc0] sm:$0xff]  ;;  %v3715_v40 = vld [vmem:[%s11865_s9 + $0xbc8] sm:$0xff]  ;;  %v7566_v17 = vpack.c.bf16 %v3697_v12, %v3696_v58  ;;  %v3716_v14 = vld [vmem:[%s11865_s9 + $0xbd0] sm:$0xff] }
 0x431   :  { %v7568_v7 = vpack.c.bf16 %v3715_v40, %v3714_v59  ;;  %v3704_v26 = vld [vmem:[%s11865_s9 + $0xb70] sm:$0xff]  ;;  %v7580_v40 = vpack.c.bf16 %v3721_v29, %v3720_v46 }
 0x432   :  { %7519 = vmatpush3.bf16.msra.mxu1 %v7518_v37  ;;  %v3698_v37 = vld [vmem:[%s11865_s9 + $0xb40] sm:$0xff]  ;;  %v3724_v27 = vld [vmem:[%s11865_s9 + $0xc10] sm:$0xff] }
 0x433   :  { %7527 = vmatpush3.bf16.msra.mxu0 %v7526_v18  ;;  %7553 = vmatprep.subr.bf16.mxu1 %v7552_v54  ;;  %v3699_v18 = vld [vmem:[%s11865_s9 + $0xb48] sm:$0xff]  ;;  %v3670_v54 = vld [vmem:[%s11865_s9 + $0xa60] sm:$0xff]  ;;  %v3760_v29 = vld [vmem:[%s11865_s9 + $0xd30] sm:$0xff] }
 0x434   :  { %7529 = vmatprep.subr.bf16.mxu0 %v7528_v51  ;;  %v3717_v51 = vld [vmem:[%s11865_s9 + $0xbd8] sm:$0xff]  ;;  %v7570_v55 = vpack.c.bf16 %v3699_v18, %v3698_v37  ;;  %v3743_v37 = vld [vmem:[%s11865_s9 + $0xca8] sm:$0xff] }
 0x435   :  { %4545 = vmatmul.mubr.f32.vlgmr.msra.gmra.mrb[46].mxu1 %v9018_v20  ;;  %v3694_v20 = vld [vmem:[%s11865_s9 + $0xb20] sm:$0xff] }
 0x436   :  { %7555 = vmatpush3.bf16.msra.mxu1 %v7554_v45  ;;  %4684 = vmatprep.mubr.f32.mxu1 %v9086_v41  ;;  %v3667_v41 = vld [vmem:[%s11865_s9 + $0xa48] sm:$0xff]  ;;  %v7562_v16 = vpack.c.bf16 %v3695_v63, %v3694_v20  ;;  %v7576_v20 = vpack.c.bf16 %v3719_v1, %v3718_v22  ;;  %v3702_v63 = vld [vmem:[%s11865_s9 + $0xb60] sm:$0xff] }
 0x437   :  { %7531 = vmatpush3.bf16.msra.mxu0 %v7530_v36  ;;  %7557 = vmatprep.subr.bf16.mxu1 %v7556_v50  ;;  %v7538_v47 = vpack.c.bf16 %v3667_v41, %v3666_v0  ;;  %v7546_v36 = vpack.c.bf16 %v3671_v52, %v3670_v54  ;;  %v7572_v50 = vpack.c.bf16 %v3717_v51, %v3716_v14  ;;  %v3722_v41 = vld [vmem:[%s11865_s9 + $0xc00] sm:$0xff]  ;;  %v3755_v14 = vld [vmem:[%s11865_s9 + $0xd08] sm:$0xff] }
 0x438   :  { %7533 = vmatprep.subr.bf16.mxu0 %v7532_v62  ;;  %v7548_v62 = vpack.c.bf16 %v3689_v38, %v3688_v34  ;;  %v7586_v12 = vpack.c.bf16 %v3723_v24, %v3722_v41  ;;  %v7590_v54 = vpack.c.bf16 %v3725_v44, %v3724_v27  ;;  %v3754_v52 = vld [vmem:[%s11865_s9 + $0xd00] sm:$0xff]  ;;  %v3773_v34 = vld [vmem:[%s11865_s9 + $0xd98] sm:$0xff]  ;;  %v3744_v38 = vld [vmem:[%s11865_s9 + $0xcb0] sm:$0xff] }
 0x439   :  { %v3726_v51 = vld [vmem:[%s11865_s9 + $0xc20] sm:$0xff]  ;;  %v3775_v22 = vld [vmem:[%s11865_s9 + $0xda8] sm:$0xff]  ;;  %v3749_v41 = vld [vmem:[%s11865_s9 + $0xcd8] sm:$0xff] }
 0x43a   :  { %7559 = vmatpush3.bf16.msra.mxu1 %v7558_v33  ;;  %v3739_v33 = vld [vmem:[%s11865_s9 + $0xc88] sm:$0xff]  ;;  %v3746_v1 = vld [vmem:[%s11865_s9 + $0xcc0] sm:$0xff] }
 0x43b   :  { %7535 = vmatpush3.bf16.msra.mxu0 %v7534_v4  ;;  %7561 = vmatprep.subr.bf16.mxu1 %v7560_v10  ;;  %v7574_v4 = vpack.c.bf16 %v3701_v53, %v3700_v49  ;;  %v7550_v10 = vpack.c.bf16 %v3673_v25, %v3672_v28  ;;  %v3757_v49 = vld [vmem:[%s11865_s9 + $0xd18] sm:$0xff]  ;;  %v3728_v53 = vld [vmem:[%s11865_s9 + $0xc30] sm:$0xff]  ;;  %v3774_v25 = vld [vmem:[%s11865_s9 + $0xda0] sm:$0xff] }
 0x43c   :  { %7537 = vmatprep.subr.bf16.mxu0 %v7536_v19  ;;  %v7584_v19 = vpack.c.bf16 %v3739_v33, %v3738_v30  ;;  %v3751_v27 = vld [vmem:[%s11865_s9 + $0xce8] sm:$0xff] }
 0x43e   :  { %7563 = vmatpush3.bf16.msra.mxu1 %v7562_v16  ;;  %v3740_v16 = vld [vmem:[%s11865_s9 + $0xc90] sm:$0xff] }
 0x43f   :  { %7539 = vmatpush3.bf16.msra.mxu0 %v7538_v47  ;;  %7565 = vmatprep.subr.bf16.mxu1 %v7564_v39  ;;  %v3741_v47 = vld [vmem:[%s11865_s9 + $0xc98] sm:$0xff] }
 0x440   :  { %7541 = vmatprep.subr.bf16.mxu0 %v7540_v11  ;;  %v3705_v11 = vld [vmem:[%s11865_s9 + $0xb78] sm:$0xff]  ;;  %v7588_v32 = vpack.c.bf16 %v3741_v47, %v3740_v16  ;;  %v3732_v47 = vld [vmem:[%s11865_s9 + $0xc50] sm:$0xff] }
 0x441   :  { %v5751_v13 = vpop.f32.mrb[26].mxu0  ;;  %v7582_v18 = vpack.c.bf16 %v3705_v11, %v3704_v26  ;;  %v3761_v16 = vld [vmem:[%s11865_s9 + $0xd38] sm:$0xff]  ;;  %v3779_v26 = vld [vmem:[%s11865_s9 + $0xdc8] sm:$0xff]  ;;  %v3750_v11 = vld [vmem:[%s11865_s9 + $0xce0] sm:$0xff] }
 0x442   :  { %v5752_v35 = vpop.f32.mrb[27].mxu0  ;;  %7567 = vmatpush3.bf16.msra.mxu1 %v7566_v17  ;;  %v3770_v17 = vld [vmem:[%s11865_s9 + $0xd80] sm:$0xff] }
 0x443   :  { %v5753_v45 = vadd.f32 %v5752_v35, %v5751_v13  ;;  %7543 = vmatpush3.bf16.msra.mxu0 %v7542_v15  ;;  %7569 = vmatprep.subr.bf16.mxu1 %v7568_v7  ;;  %v3771_v15 = vld [vmem:[%s11865_s9 + $0xd88] sm:$0xff]  ;;  %v3742_v7 = vld [vmem:[%s11865_s9 + $0xca0] sm:$0xff]  ;;  %v3772_v13 = vld [vmem:[%s11865_s9 + $0xd90] sm:$0xff] }
 0x444   :  { %7545 = vmatprep.subr.bf16.mxu0 %v7544_v8  ;;  %v7616_v8 = vpack.c.bf16 %v3771_v15, %v3770_v17  ;;  %v3745_v35 = vld [vmem:[%s11865_s9 + $0xcb8] sm:$0xff]  ;;  %v3762_v17 = vld [vmem:[%s11865_s9 + $0xd40] sm:$0xff]  ;;  %v3763_v15 = vld [vmem:[%s11865_s9 + $0xd48] sm:$0xff] }
 0x445   :  { %v3123_v61 = vadd.f32 %v5753_v45, %v11203_v5  ;;  %v3703_v5 = vld [vmem:[%s11865_s9 + $0xb68] sm:$0xff]  ;;  %v7596_v28 = vpack.c.bf16 %v3745_v35, %v3744_v38  ;;  %v3764_v35 = vld [vmem:[%s11865_s9 + $0xd50] sm:$0xff] }
 0x446   :  { %7571 = vmatpush3.bf16.msra.mxu1 %v7570_v55  ;;  %v7578_v58 = vpack.c.bf16 %v3703_v5, %v3702_v63  ;;  %v7618_v55 = vpack.c.bf16 %v3755_v14, %v3754_v52  ;;  %v3776_v5 = vld [vmem:[%s11865_s9 + $0xdb0] sm:$0xff] }
 0x447   :  { %7547 = vmatpush3.bf16.msra.mxu0 %v7546_v36  ;;  %7573 = vmatprep.subr.bf16.mxu1 %v7572_v50  ;;  %v7620_v36 = vpack.c.bf16 %v3773_v34, %v3772_v13  ;;  %v3756_v50 = vld [vmem:[%s11865_s9 + $0xd10] sm:$0xff] }
 0x448   :  { %v5786_v0 = vpop.f32.mrb[34].mxu1  ;;  %7549 = vmatprep.subr.bf16.mxu0 %v7548_v62  ;;  %v3729_v62 = vld [vmem:[%s11865_s9 + $0xc38] sm:$0xff]  ;;  %v7622_v30 = vpack.c.bf16 %v3757_v49, %v3756_v50  ;;  %v3752_v14 = vld [vmem:[%s11865_s9 + $0xcf0] sm:$0xff]  ;;  %v3782_v49 = vld [vmem:[%s11865_s9 + $0xde0] sm:$0xff] }
 0x449   :  { %v5787_v60 = vpop.f32.mrb[35].mxu1  ;;  %v7598_v33 = vpack.c.bf16 %v3729_v62, %v3728_v53  ;;  %v3737_v50 = vld [vmem:[%s11865_s9 + $0xc78] sm:$0xff]  ;;  %v3783_v53 = vld [vmem:[%s11865_s9 + $0xde8] sm:$0xff]  ;;  %v3802_v62 = vld [vmem:[%s11865_s9 + $0xe80] sm:$0xff] }
 0x44a   :  { %v5788_v39 = vadd.f32 %v5787_v60, %v5786_v0  ;;  %7575 = vmatpush3.bf16.msra.mxu1 %v7574_v4  ;;  %v7624_v4 = vpack.c.bf16 %v3775_v22, %v3774_v25  ;;  %v3777_v0 = vld [vmem:[%s11865_s9 + $0xdb8] sm:$0xff]  ;;  %v3803_v25 = vld [vmem:[%s11865_s9 + $0xe88] sm:$0xff] }
 0x44b   :  { %7551 = vmatpush3.bf16.msra.mxu0 %v7550_v10  ;;  %7577 = vmatprep.subr.bf16.mxu1 %v7576_v20  ;;  %v3759_v10 = vld [vmem:[%s11865_s9 + $0xd28] sm:$0xff]  ;;  %v3730_v20 = vld [vmem:[%s11865_s9 + $0xc40] sm:$0xff]  ;;  %v7628_v60 = vpack.c.bf16 %v3777_v0, %v3776_v5  ;;  %v3804_v5 = vld [vmem:[%s11865_s9 + $0xe90] sm:$0xff] }
 0x44c   :  { %v11402_v59 = vadd.f32 %v5788_v39, %v3123_v61  ;;  %7585 = vmatprep.subr.bf16.mxu0 %v7584_v19  ;;  %v3747_v61 = vld [vmem:[%s11865_s9 + $0xcc8] sm:$0xff]  ;;  %v3748_v19 = vld [vmem:[%s11865_s9 + $0xcd0] sm:$0xff]  ;;  %v3805_v0 = vld [vmem:[%s11865_s9 + $0xe98] sm:$0xff] }
 0x44d   :  { %v7600_v63 = vpack.c.bf16 %v3747_v61, %v3746_v1  ;;  %v7604_v39 = vpack.c.bf16 %v3749_v41, %v3748_v19  ;;  %v7640_v61 = vpack.c.bf16 %v3783_v53, %v3782_v49 }
 0x44e   :  { %4615 = vmatmul.mubr.f32.vlgmr.msra.gmra.mrb[40].mxu0 %v8816_v2  ;;  %7579 = vmatpush3.bf16.msra.mxu1 %v7578_v58  ;;  %v7592_v2 = vpack.c.bf16 %v3743_v37, %v3742_v7  ;;  %v3733_v58 = vld [vmem:[%s11865_s9 + $0xc58] sm:$0xff]  ;;  %v3734_v7 = vld [vmem:[%s11865_s9 + $0xc60] sm:$0xff]  ;;  %v7608_v37 = vpack.c.bf16 %v3751_v27, %v3750_v11  ;;  %v3807_v27 = vld [vmem:[%s11865_s9 + $0xea8] sm:$0xff] }
 0x44f   :  { %7587 = vmatpush3.bf16.msra.mxu0 %v7586_v12  ;;  %4754 = vmatprep.mubr.f32.mxu0 %v8893_v21  ;;  %v3727_v21 = vld [vmem:[%s11865_s9 + $0xc28] sm:$0xff]  ;;  %v3778_v12 = vld [vmem:[%s11865_s9 + $0xdc0] sm:$0xff] }
 0x450   :  { %7581 = vmatprep.subr.bf16.mxu1 %v7580_v40  ;;  %7589 = vmatprep.subr.bf16.mxu0 %v7588_v32  ;;  %v7594_v45 = vpack.c.bf16 %v3727_v21, %v3726_v51  ;;  %v7630_v40 = vpack.c.bf16 %v3761_v16, %v3760_v29  ;;  %v7606_v32 = vpack.c.bf16 %v3733_v58, %v3732_v47  ;;  %v3753_v51 = vld [vmem:[%s11865_s9 + $0xcf8] sm:$0xff]  ;;  %v3788_v29 = vld [vmem:[%s11865_s9 + $0xe10] sm:$0xff]  ;;  %v3806_v11 = vld [vmem:[%s11865_s9 + $0xea0] sm:$0xff] }
 0x451   :  { %v7632_v44 = vpack.c.bf16 %v3779_v26, %v3778_v12  ;;  %v7634_v21 = vpack.c.bf16 %v3763_v15, %v3762_v17  ;;  %v3789_v58 = vld [vmem:[%s11865_s9 + $0xe18] sm:$0xff]  ;;  %v3834_v12 = vld [vmem:[%s11865_s9 + $0xf80] sm:$0xff]  ;;  %v3835_v26 = vld [vmem:[%s11865_s9 + $0xf88] sm:$0xff] }
 0x452   :  { %7583 = vmatpush3.bf16.msra.mxu1 %v7582_v18  ;;  %v3735_v18 = vld [vmem:[%s11865_s9 + $0xc68] sm:$0xff]  ;;  %v3818_v17 = vld [vmem:[%s11865_s9 + $0xf00] sm:$0xff] }
 0x453   :  { %7591 = vmatpush3.bf16.msra.mxu0 %v7590_v54  ;;  %7617 = vmatprep.subr.bf16.mxu1 %v7616_v8  ;;  %v3780_v54 = vld [vmem:[%s11865_s9 + $0xdd0] sm:$0xff]  ;;  %v3781_v8 = vld [vmem:[%s11865_s9 + $0xdd8] sm:$0xff]  ;;  %v7610_v34 = vpack.c.bf16 %v3735_v18, %v3734_v7  ;;  %v3819_v15 = vld [vmem:[%s11865_s9 + $0xf08] sm:$0xff] }
 0x454   :  { %7593 = vmatprep.subr.bf16.mxu0 %v7592_v2  ;;  %v7636_v38 = vpack.c.bf16 %v3781_v8, %v3780_v54  ;;  %v3790_v7 = vld [vmem:[%s11865_s9 + $0xe20] sm:$0xff]  ;;  %v3837_v18 = vld [vmem:[%s11865_s9 + $0xf98] sm:$0xff]  ;;  %v3808_v54 = vld [vmem:[%s11865_s9 + $0xeb0] sm:$0xff] }
 0x455   :  { %4685 = vmatmul.mubr.f32.vlgmr.msra.gmra.mrb[48].mxu1 %v9075_v56  ;;  %v3758_v56 = vld [vmem:[%s11865_s9 + $0xd20] sm:$0xff]  ;;  %v3809_v8 = vld [vmem:[%s11865_s9 + $0xeb8] sm:$0xff] }
 0x456   :  { %7619 = vmatpush3.bf16.msra.mxu1 %v7618_v55  ;;  %4824 = vmatprep.mubr.f32.mxu1 %v9146_v48  ;;  %v3731_v48 = vld [vmem:[%s11865_s9 + $0xc48] sm:$0xff]  ;;  %v7626_v24 = vpack.c.bf16 %v3759_v10, %v3758_v56  ;;  %v3765_v55 = vld [vmem:[%s11865_s9 + $0xd58] sm:$0xff]  ;;  %v3786_v56 = vld [vmem:[%s11865_s9 + $0xe00] sm:$0xff] }
 0x457   :  { %7595 = vmatpush3.bf16.msra.mxu0 %v7594_v45  ;;  %7621 = vmatprep.subr.bf16.mxu1 %v7620_v36  ;;  %v7602_v46 = vpack.c.bf16 %v3731_v48, %v3730_v20  ;;  %v3736_v45 = vld [vmem:[%s11865_s9 + $0xc70] sm:$0xff]  ;;  %v7612_v36 = vpack.c.bf16 %v3753_v51, %v3752_v14  ;;  %v7638_v22 = vpack.c.bf16 %v3765_v55, %v3764_v35  ;;  %v3787_v10 = vld [vmem:[%s11865_s9 + $0xe08] sm:$0xff]  ;;  %v3785_v48 = vld [vmem:[%s11865_s9 + $0xdf8] sm:$0xff] }
 0x458   :  { %7597 = vmatprep.subr.bf16.mxu0 %v7596_v28  ;;  %v7614_v1 = vpack.c.bf16 %v3737_v50, %v3736_v45  ;;  %v3784_v20 = vld [vmem:[%s11865_s9 + $0xdf0] sm:$0xff]  ;;  %v3838_v35 = vld [vmem:[%s11865_s9 + $0xfa0] sm:$0xff]  ;;  %v3839_v55 = vld [vmem:[%s11865_s9 + $0xfa8] sm:$0xff] }
 0x459   :  { %v7644_v47 = vpack.c.bf16 %v3785_v48, %v3784_v20  ;;  %v3810_v45 = vld [vmem:[%s11865_s9 + $0xec0] sm:$0xff]  ;;  %v7688_v53 = vpack.c.bf16 %v3839_v55, %v3838_v35  ;;  %v3796_v20 = vld [vmem:[%s11865_s9 + $0xe50] sm:$0xff]  ;;  %v3797_v48 = vld [vmem:[%s11865_s9 + $0xe58] sm:$0xff] }
 0x45a   :  { %7623 = vmatpush3.bf16.msra.mxu1 %v7622_v30  ;;  %v3766_v30 = vld [vmem:[%s11865_s9 + $0xd60] sm:$0xff]  ;;  %v3848_v35 = vld [vmem:[%s11865_s9 + $0xff0] sm:$0xff]  ;;  %v3849_v55 = vld [vmem:[%s11865_s9 + $0xff8] sm:$0xff] }
 0x45b   :  { %7599 = vmatpush3.bf16.msra.mxu0 %v7598_v33  ;;  %7625 = vmatprep.subr.bf16.mxu1 %v7624_v4  ;;  %v7648_v4 = vpack.c.bf16 %v3803_v25, %v3802_v62  ;;  %v3794_v62 = vld [vmem:[%s11865_s9 + $0xe40] sm:$0xff] }
 0x45c   :  { %7601 = vmatprep.subr.bf16.mxu0 %v7600_v63 }
 0x45e   :  { %7627 = vmatpush3.bf16.msra.mxu1 %v7626_v24  ;;  %v7650_v24 = vpack.c.bf16 %v3787_v10, %v3786_v56  ;;  %v3824_v56 = vld [vmem:[%s11865_s9 + $0xf30] sm:$0xff]  ;;  %v3825_v10 = vld [vmem:[%s11865_s9 + $0xf38] sm:$0xff] }
 0x45f   :  { %7603 = vmatpush3.bf16.msra.mxu0 %v7602_v46  ;;  %7629 = vmatprep.subr.bf16.mxu1 %v7628_v60  ;;  %v3768_v46 = vld [vmem:[%s11865_s9 + $0xd70] sm:$0xff]  ;;  %v3769_v60 = vld [vmem:[%s11865_s9 + $0xd78] sm:$0xff] }
 0x460   :  { %7605 = vmatprep.subr.bf16.mxu0 %v7604_v39  ;;  %v7652_v39 = vpack.c.bf16 %v3805_v0, %v3804_v5  ;;  %v3842_v5 = vld [vmem:[%s11865_s9 + $0xfc0] sm:$0xff]  ;;  %v3843_v0 = vld [vmem:[%s11865_s9 + $0xfc8] sm:$0xff] }
 0x461   :  { %v5821_v52 = vpop.f32.mrb[28].mxu0 }
 0x462   :  { %v5822_v2 = vpop.f32.mrb[29].mxu0  ;;  %7631 = vmatpush3.bf16.msra.mxu1 %v7630_v40  ;;  %v7646_v40 = vpack.c.bf16 %v3769_v60, %v3768_v46  ;;  %v7670_v46 = vpack.c.bf16 %v3797_v48, %v3796_v20  ;;  %v7696_v60 = vpack.c.bf16 %v3843_v0, %v3842_v5 }
 0x463   :  { %v5823_v13 = vadd.f32 %v5822_v2, %v5821_v52  ;;  %7607 = vmatpush3.bf16.msra.mxu0 %v7606_v32  ;;  %7633 = vmatprep.subr.bf16.mxu1 %v7632_v44  ;;  %v7654_v32 = vpack.c.bf16 %v3789_v58, %v3788_v29  ;;  %v7680_v44 = vpack.c.bf16 %v3835_v26, %v3834_v12  ;;  %v3820_v2 = vld [vmem:[%s11865_s9 + $0xf10] sm:$0xff]  ;;  %v3826_v29 = vld [vmem:[%s11865_s9 + $0xf40] sm:$0xff]  ;;  %v3799_v12 = vld [vmem:[%s11865_s9 + $0xe68] sm:$0xff] }
 0x464   :  { %7609 = vmatprep.subr.bf16.mxu0 %v7608_v37  ;;  %v3836_v37 = vld [vmem:[%s11865_s9 + $0xf90] sm:$0xff]  ;;  %v7682_v52 = vpack.c.bf16 %v3819_v15, %v3818_v17 }
 0x465   :  { %v3263_v28 = vadd.f32 %v5823_v13, %v11402_v59  ;;  %v3767_v59 = vld [vmem:[%s11865_s9 + $0xd68] sm:$0xff]  ;;  %v7684_v51 = vpack.c.bf16 %v3837_v18, %v3836_v37  ;;  %v3792_v13 = vld [vmem:[%s11865_s9 + $0xe30] sm:$0xff]  ;;  %v3829_v18 = vld [vmem:[%s11865_s9 + $0xf58] sm:$0xff] }
 0x466   :  { %7635 = vmatpush3.bf16.msra.mxu1 %v7634_v21  ;;  %v7642_v41 = vpack.c.bf16 %v3767_v59, %v3766_v30  ;;  %v3821_v21 = vld [vmem:[%s11865_s9 + $0xf18] sm:$0xff]  ;;  %v3844_v26 = vld [vmem:[%s11865_s9 + $0xfd0] sm:$0xff] }
 0x467   :  { %7611 = vmatpush3.bf16.msra.mxu0 %v7610_v34  ;;  %7637 = vmatprep.subr.bf16.mxu1 %v7636_v38  ;;  %v7660_v34 = vpack.c.bf16 %v3809_v8, %v3808_v54  ;;  %v3793_v38 = vld [vmem:[%s11865_s9 + $0xe38] sm:$0xff]  ;;  %v7686_v50 = vpack.c.bf16 %v3821_v21, %v3820_v2  ;;  %v3828_v37 = vld [vmem:[%s11865_s9 + $0xf50] sm:$0xff] }
 0x468   :  { %v5856_v33 = vpop.f32.mrb[36].mxu1  ;;  %7613 = vmatprep.subr.bf16.mxu0 %v7612_v36  ;;  %v3811_v36 = vld [vmem:[%s11865_s9 + $0xec8] sm:$0xff]  ;;  %v7662_v49 = vpack.c.bf16 %v3793_v38, %v3792_v13  ;;  %v3813_v30 = vld [vmem:[%s11865_s9 + $0xed8] sm:$0xff]  ;;  %v3800_v54 = vld [vmem:[%s11865_s9 + $0xe70] sm:$0xff] }
 0x469   :  { %v5857_v63 = vpop.f32.mrb[37].mxu1  ;;  %v7664_v25 = vpack.c.bf16 %v3811_v36, %v3810_v45  ;;  %v3830_v13 = vld [vmem:[%s11865_s9 + $0xf60] sm:$0xff] }
 0x46a   :  { %v5858_v19 = vadd.f32 %v5857_v63, %v5856_v33  ;;  %7639 = vmatpush3.bf16.msra.mxu1 %v7638_v22  ;;  %v3840_v22 = vld [vmem:[%s11865_s9 + $0xfb0] sm:$0xff] }
 0x46b   :  { %7615 = vmatpush3.bf16.msra.mxu0 %v7614_v1  ;;  %7641 = vmatprep.subr.bf16.mxu1 %v7640_v61  ;;  %v3841_v1 = vld [vmem:[%s11865_s9 + $0xfb8] sm:$0xff]  ;;  %v3812_v61 = vld [vmem:[%s11865_s9 + $0xed0] sm:$0xff] }
 0x46c   :  { %v11601_v16 = vadd.f32 %v5858_v19, %v3263_v28  ;;  %7649 = vmatprep.subr.bf16.mxu0 %v7648_v4  ;;  %v3823_v28 = vld [vmem:[%s11865_s9 + $0xf28] sm:$0xff]  ;;  %v7692_v4 = vpack.c.bf16 %v3841_v1, %v3840_v22  ;;  %v7668_v63 = vpack.c.bf16 %v3813_v30, %v3812_v61  ;;  %v3814_v19 = vld [vmem:[%s11865_s9 + $0xee0] sm:$0xff] }
 0x46e   :  { %4755 = vmatmul.mubr.f32.vlgmr.msra.gmra.mrb[42].mxu0 %v9977_v57  ;;  %7643 = vmatpush3.bf16.msra.mxu1 %v7642_v41  ;;  %v7656_v57 = vpack.c.bf16 %v3807_v27, %v3806_v11  ;;  %v3815_v41 = vld [vmem:[%s11865_s9 + $0xee8] sm:$0xff]  ;;  %v3845_v11 = vld [vmem:[%s11865_s9 + $0xfd8] sm:$0xff]  ;;  %v3336_v15 = vmax.f32 %v11601_v16, 1e-24 }
 0x46f   :  { %7651 = vmatpush3.bf16.msra.mxu0 %v7650_v24  ;;  %4894 = vmatprep.mubr.f32.mxu0 %v8972_v31  ;;  %v3791_v31 = vld [vmem:[%s11865_s9 + $0xe28] sm:$0xff]  ;;  %v7694_v24 = vpack.c.bf16 %v3825_v10, %v3824_v56  ;;  %v7672_v58 = vpack.c.bf16 %v3815_v41, %v3814_v19  ;;  %v3801_v16 = vld [vmem:[%s11865_s9 + $0xe78] sm:$0xff] }
 0x470   :  { %7645 = vmatprep.subr.bf16.mxu1 %v7644_v47  ;;  %7653 = vmatprep.subr.bf16.mxu0 %v7652_v39  ;;  %v7658_v14 = vpack.c.bf16 %v3791_v31, %v3790_v7  ;;  %v3827_v47 = vld [vmem:[%s11865_s9 + $0xf48] sm:$0xff]  ;;  %v3798_v39 = vld [vmem:[%s11865_s9 + $0xe60] sm:$0xff]  ;;  %v7700_v31 = vpack.c.bf16 %v3845_v11, %v3844_v26  ;;  %7734 = vrsqrt.f32 %v3336_v15  ;;  %v7678_v2 = vpack.c.bf16 %v3801_v16, %v3800_v54  ;;  %v5061_v26 = vld [vmem:[%s11867_s11 + $0x10] sm:$0xff] }
 0x471   :  { %v7698_v17 = vpack.c.bf16 %v3827_v47, %v3826_v29  ;;  %v5059_v47 = vld [vmem:[%s11867_s11] sm:$0xff]  ;;  %v5062_v11 = vld [vmem:[%s11867_s11 + $0x18] sm:$0xff] }
 0x472   :  { %7647 = vmatpush3.bf16.msra.mxu1 %v7646_v40  ;;  %v3816_v40 = vld [vmem:[%s11865_s9 + $0xef0] sm:$0xff]  ;;  %v5147_v15 = vld [vmem:[%s11869_s13 + $0x18] sm:$0xff] }
 0x473   :  { %7655 = vmatpush3.bf16.msra.mxu0 %v7654_v32  ;;  %7681 = vmatprep.subr.bf16.mxu1 %v7680_v44  ;;  %v3817_v32 = vld [vmem:[%s11865_s9 + $0xef8] sm:$0xff] }
 0x474   :  { %7657 = vmatprep.subr.bf16.mxu0 %v7656_v57  ;;  %v7674_v57 = vpack.c.bf16 %v3799_v12, %v3798_v39  ;;  %v7676_v8 = vpack.c.bf16 %v3817_v32, %v3816_v40  ;;  %v5060_v39 = vld [vmem:[%s11867_s11 + $0x8] sm:$0xff]  ;;  %v5144_v40 = vld [vmem:[%s11869_s13] sm:$0xff] }
 0x475   :  { %4825 = vmatmul.mubr.f32.vlgmr.msra.gmra.mrb[50].mxu1 %v9135_v9  ;;  %v3822_v9 = vld [vmem:[%s11865_s9 + $0xf20] sm:$0xff]  ;;  %v5145_v32 = vld [vmem:[%s11869_s13 + $0x8] sm:$0xff] }
 0x476   :  { %7683 = vmatpush3.bf16.msra.mxu1 %v7682_v52  ;;  %4964 = vmatprep.mubr.f32.mxu1 %v9218_v43  ;;  %v3795_v43 = vld [vmem:[%s11865_s9 + $0xe48] sm:$0xff]  ;;  %v7690_v59 = vpack.c.bf16 %v3823_v28, %v3822_v9  ;;  %v3846_v52 = vld [vmem:[%s11865_s9 + $0xfe0] sm:$0xff]  ;;  %v3833_v9 = vld [vmem:[%s11865_s9 + $0xf78] sm:$0xff] }
 0x477   :  { %7659 = vmatpush3.bf16.msra.mxu0 %v7658_v14  ;;  %7685 = vmatprep.subr.bf16.mxu1 %v7684_v51  ;;  %v7666_v33 = vpack.c.bf16 %v3795_v43, %v3794_v62  ;;  %v3847_v14 = vld [vmem:[%s11865_s9 + $0xfe8] sm:$0xff]  ;;  %v7702_v51 = vpack.c.bf16 %v3829_v18, %v3828_v37  ;;  %v4970_v62 = vld [vmem:[%s11864_s8] sm:$0xf] }
 0x478   :  { %7661 = vmatprep.subr.bf16.mxu0 %v7660_v34  ;;  %v7704_v21 = vpack.c.bf16 %v3847_v14, %v3846_v52  ;;  %v3831_v34 = vld [vmem:[%s11865_s9 + $0xf68] sm:$0xff] }
 0x47a   :  { %7687 = vmatpush3.bf16.msra.mxu1 %v7686_v50  ;;  %v7706_v50 = vpack.c.bf16 %v3831_v34, %v3830_v13  ;;  %v7735_v43 = vpop.eup %7734 }
 0x47b   :  { %7663 = vmatpush3.bf16.msra.mxu0 %v7662_v49  ;;  %7689 = vmatprep.subr.bf16.mxu1 %v7688_v53  ;;  %v7708_v49 = vpack.c.bf16 %v3849_v55, %v3848_v35  ;;  %v3832_v53 = vld [vmem:[%s11865_s9 + $0xf70] sm:$0xff] }
 0x47c   :  { %7665 = vmatprep.subr.bf16.mxu0 %v7664_v25  ;;  %v7710_v25 = vpack.c.bf16 %v3833_v9, %v3832_v53 }
 0x47e   :  { %7691 = vmatpush3.bf16.msra.mxu1 %v7690_v59 }
 0x47f   :  { %7667 = vmatpush3.bf16.msra.mxu0 %v7666_v33  ;;  %7693 = vmatprep.subr.bf16.mxu1 %v7692_v4 }
 0x480   :  { %7669 = vmatprep.subr.bf16.mxu0 %v7668_v63 }
 0x481   :  { %v5891_v27 = vpop.f32.mrb[30].mxu0 }
 0x482   :  { %v5892_v44 = vpop.f32.mrb[31].mxu0  ;;  %7695 = vmatpush3.bf16.msra.mxu1 %v7694_v24 }
 0x483   :  { %v5893_v7 = vadd.f32 %v5892_v44, %v5891_v27  ;;  %7671 = vmatpush3.bf16.msra.mxu0 %v7670_v46  ;;  %7697 = vmatprep.subr.bf16.mxu1 %v7696_v60  ;;  %v7716_v27 = vpack.c.bf16 %v5062_v11, %v5061_v26  ;;  %v5146_v44 = vld [vmem:[%s11869_s13 + $0x10] sm:$0xff] }
 0x484   :  { %7673 = vmatprep.subr.bf16.mxu0 %v7672_v58  ;;  %v7713_v58 = vpack.c.bf16 %v5060_v39, %v5059_v47 }
 0x486   :  { %7699 = vmatpush3.bf16.msra.mxu1 %v7698_v17  ;;  %v7719_v17 = vpack.c.bf16 %v5145_v32, %v5144_v40 }
 0x487   :  { %7675 = vmatpush3.bf16.msra.mxu0 %v7674_v57  ;;  %7701 = vmatprep.subr.bf16.mxu1 %v7700_v31  ;;  %v5148_v57 = vld [vmem:[%s11869_s13 + $0x20] sm:$0xff]  ;;  %v5149_v31 = vld [vmem:[%s11869_s13 + $0x28] sm:$0xff] }
 0x488   :  { %v5926_v38 = vpop.f32.mrb[38].mxu1  ;;  %7677 = vmatprep.subr.bf16.mxu0 %v7676_v8  ;;  %v7725_v37 = vpack.c.bf16 %v5149_v31, %v5148_v57 }
 0x489   :  { %v5927_v45 = vpop.f32.mrb[39].mxu1 }
 0x48a   :  { %v5928_v36 = vadd.f32 %v5927_v45, %v5926_v38  ;;  %7703 = vmatpush3.bf16.msra.mxu1 %v7702_v51 }
 0x48b   :  { %7679 = vmatpush3.bf16.msra.mxu0 %v7678_v2  ;;  %7705 = vmatprep.subr.bf16.mxu1 %v7704_v21 }
 0x48c   :  { %v3987_v28 = vadd.f32 %v5928_v36, %v5893_v7  ;;  %6489 = vmatprep.subr.mxu0 %v7764_v6  ;;  %v7722_v7 = vpack.c.bf16 %v5147_v15, %v5146_v44 }
 0x48e   :  { %4895 = vmatmul.mubr.f32.vlgmr.msra.gmra.mrb[44].mxu0 %v8957_v23  ;;  %7707 = vmatpush3.bf16.msra.mxu1 %v7706_v50 }
 0x48f   :  { %7709 = vmatprep.subr.bf16.mxu1 %v7708_v49  ;;  %6490 = vmatpush3.msk.msra.mxu0 %vm4975_vm3, %v4970_v62 }
 0x490   :  { %6491 = vmatprep.mubr.msk.f32.mxu0 %vm7763_vm0, %v7764_v6  ;;  %7718 = vmatprep.subr.bf16.mxu0 %v7762_v3 }
 0x492   :  { %7711 = vmatpush3.bf16.msra.mxu1 %v7710_v25  ;;  %6492 = vmatmul.mubr.msk.f32.vlgmr.msra.gmra.mrb[46].mxu0 %vm4971_vm4, %v7735_v43 }
 0x493   :  { %7712 = vmatprep.subr.bf16.mxu1 %v7762_v3  ;;  %6521 = vmatprep.mubr.msk.f32.mxu0 %vm7763_vm0, %v7764_v6 }
 0x494   :  { %7720 = vmatpush3.bf16.msra.mxu0 %v7719_v17 }
 0x495   :  { %4965 = vmatmul.mubr.f32.vlgmr.msra.gmra.mrb[52].mxu1 %v9204_v42  ;;  %7721 = vmatprep.subr.bf16.mxu0 %v7762_v3 }
 0x496   :  { %6502 = vmatprep.mubr.msk.f32.mxu1 %vm7763_vm0, %v7764_v6  ;;  %7714 = vmatpush3.bf16.msra.mxu1 %v7713_v58 }
 0x497   :  { %7715 = vmatprep.subr.bf16.mxu1 %v7762_v3 }
 0x498   :  { %7723 = vmatpush3.bf16.msra.mxu0 %v7722_v7 }
 0x499   :  { %7724 = vmatprep.subr.bf16.mxu0 %v7762_v3 }
 0x49a   :  { %7717 = vmatpush3.bf16.msra.mxu1 %v7716_v27 }
 0x49c   :  { %7726 = vmatpush3.bf16.msra.mxu0 %v7725_v37 }
 0x49d   :  { %7727 = vmatprep.subr.bf16.mxu0 %v7762_v3 }
 0x4a1   :  { %v5961_v23 = vpop.f32.mrb[32].mxu0 }
 0x4a2   :  { %v5962_v22 = vpop.f32.mrb[33].mxu0 }
 0x4a3   :  { %v5963_v1 = vadd.f32 %v5962_v22, %v5961_v23 }
 0x4a5   :  { %v4057_v61 = vadd.f32 %v5963_v1, %v3987_v28 }
 0x4a8   :  { %v5996_v30 = vpop.f32.mrb[40].mxu1 }
 0x4a9   :  { %v5997_v59 = vpop.f32.mrb[41].mxu1 }
 0x4aa   :  { %v5998_v33 = vadd.f32 %v5997_v59, %v5996_v30 }
 0x4ac   :  { %v4127_v4 = vadd.f32 %v5998_v33, %v4057_v61 }
 0x4c1   :  { %v6031_v56 = vpop.f32.mrb[34].mxu0 }
 0x4c2   :  { %v6032_v10 = vpop.f32.mrb[35].mxu0 }
 0x4c3   :  { %v6033_v20 = vadd.f32 %v6032_v10, %v6031_v56  ;;  %v5268_v10 = vld [vmem:[%s11866_s10] ss:$0 sm:$0xff] }
 0x4c5   :  { %v4197_v63 = vadd.f32 %v6033_v20, %v4127_v4 }
 0x4c8   :  { %v6066_v48 = vpop.f32.mrb[42].mxu1 }
 0x4c9   :  { %v6067_v5 = vpop.f32.mrb[43].mxu1 }
 0x4ca   :  { %v6068_v0 = vadd.f32 %v6067_v5, %v6066_v48  ;;  %v5150_v5 = vld [vmem:[%s11869_s13 + $0x30] sm:$0xff] }
 0x4cc   :  { %v4267_v19 = vadd.f32 %v6068_v0, %v4197_v63  ;;  %v5151_v0 = vld [vmem:[%s11869_s13 + $0x38] sm:$0xff]  ;;  %s7738_s13 = scalar_lea.vmem %s5240_s6, 128 }
 0x4cd   :  { %p7739_p0 = scmp.ne.s32.totalorder %s5240_s6, %s7738_s13  ;;  %p7744_p2 = scmp.lt.s32.totalorder %s7738_s13, %s7738_s13 }
 0x4cf   :  { %p7745_p3 = por %p7744_p2, %p7743_p1 }
 0x4d1   :  { %p7746_p4 = pnand %p7745_p3, %p7739_p0 }
 0x4e1   :  { %v6101_v42 = vpop.f32.mrb[36].mxu0 }
 0x4e2   :  { %v6102_v41 = vpop.f32.mrb[37].mxu0 }
 0x4e3   :  { %v6103_v24 = vadd.f32 %v6102_v41, %v6101_v42  ;;  %v5269_v42 = vld [vmem:[%s11868_s12] ss:$0 sm:$0xff] }
 0x4e5   :  { %v4337_v6 = vadd.f32 %v6103_v24, %v4267_v19  ;;  %v7728_v19 = vpack.c.bf16 %v5151_v0, %v5150_v5 }
 0x4e7   :  { %7729 = vmatpush3.bf16.msra.mxu0 %v7728_v19 }
 0x4e8   :  { %v6136_v46 = vpop.f32.mrb[44].mxu1 }
 0x4e9   :  { %v6137_v60 = vpop.f32.mrb[45].mxu1 }
 0x4ea   :  { %v6138_v29 = vadd.f32 %v6137_v60, %v6136_v46  ;;  %v5271_v60 = vld [vmem:[%s11870_s14] ss:$0 sm:$0xff] }
 0x4ec   :  { %v4407_v12 = vadd.f32 %v6138_v29, %v4337_v6 }
 0x501   :  { %v6171_v18 = vpop.f32.mrb[38].mxu0 }
 0x502   :  { %v6172_v54 = vpop.f32.mrb[39].mxu0 }
 0x503   :  { %v6173_v8 = vadd.f32 %v6172_v54, %v6171_v18 }
 0x505   :  { %v4477_v16 = vadd.f32 %v6173_v8, %v4407_v12 }
 0x508   :  { %v6206_v52 = vpop.f32.mrb[46].mxu1 }
 0x509   :  { %v6207_v14 = vpop.f32.mrb[47].mxu1 }
 0x50a   :  { %v6208_v51 = vadd.f32 %v6207_v14, %v6206_v52 }
 0x50c   :  { %v4547_v2 = vadd.f32 %v6208_v51, %v4477_v16 }
 0x521   :  { %v6241_v21 = vpop.f32.mrb[40].mxu0 }
 0x522   :  { %v6242_v13 = vpop.f32.mrb[41].mxu0 }
 0x523   :  { %v6243_v34 = vadd.f32 %v6242_v13, %v6241_v21 }
 0x525   :  { %v4617_v38 = vadd.f32 %v6243_v34, %v4547_v2 }
 0x528   :  { %v6276_v35 = vpop.f32.mrb[48].mxu1 }
 0x529   :  { %v6277_v55 = vpop.f32.mrb[49].mxu1 }
 0x52a   :  { %v6278_v45 = vadd.f32 %v6277_v55, %v6276_v35 }
 0x52c   :  { %v4687_v36 = vadd.f32 %v6278_v45, %v4617_v38 }
 0x541   :  { %v6311_v50 = vpop.f32.mrb[42].mxu0 }
 0x542   :  { %v6312_v49 = vpop.f32.mrb[43].mxu0 }
 0x543   :  { %v6313_v53 = vadd.f32 %v6312_v49, %v6311_v50 }
 0x545   :  { %v4757_v3 = vadd.f32 %v6313_v53, %v4687_v36 }
 0x548   :  { %v6346_v9 = vpop.f32.mrb[50].mxu1 }
 0x549   :  { %v6347_v28 = vpop.f32.mrb[51].mxu1 }
 0x54a   :  { %v6348_v62 = vadd.f32 %v6347_v28, %v6346_v9 }
 0x54c   :  { %v4827_v25 = vadd.f32 %v6348_v62, %v4757_v3 }
 0x561   :  { %v6381_v43 = vpop.f32.mrb[44].mxu0 }
 0x562   :  { %v6382_v23 = vpop.f32.mrb[45].mxu0 }
 0x563   :  { %v6383_v22 = vadd.f32 %v6382_v23, %v6381_v43 }
 0x565   :  { %v4897_v1 = vadd.f32 %v6383_v22, %v4827_v25  ;;  %v5045_v61 = vpop.f32.mrb[46].mxu0 }
 0x566   :  { %v6493_v30 = vpop.f32.mrb[47].mxu0 }
 0x568   :  { %v6416_v59 = vpop.f32.mrb[52].mxu1 }
 0x569   :  { %v6417_v33 = vpop.f32.mrb[53].mxu1 }
 0x56a   :  { %v6418_v4 = vadd.f32 %v6417_v33, %v6416_v59 }
 0x56c   :  { %v4967_v56 = vadd.f32 %v6418_v4, %v4897_v1 }
 0x56e   :  { %v5049_v20 = vmul.f32 %v5045_v61, %v4967_v56 }
 0x570   :  { %v5057_v63 = vadd.f32 %v5268_v10, %v5049_v20 }
 0x572   :  { %v5058_v48 = vmax.f32 %v5057_v63, 0.0 }
 0x574   :  { %6503 = vmatmul.mubr.msk.f32.vlgmr.msra.gmra.mrb[54].mxu1 %vm532_vm2, %v5058_v48 }
 0x647   :  { %v5139_v41 = vpop.f32.mrb[54].mxu1 }
 0x648   :  { %v5140_v24 = vadd.f32 %v5269_v42, %v5139_v41  ;;  %v6504_v6 = vpop.f32.mrb[55].mxu1 }
 0x64a   :  { %v5143_v46 = vmax.f32 %v5140_v24, 0.0 }
 0x64c   :  { %6522 = vmatmul.mubr.msk.f32.vlgmr.msra.gmra.mrb[48].mxu0 %vm161_vm1, %v5143_v46 }
 0x71f   :  { %v5228_v29 = vpop.f32.mrb[48].mxu0 }
 0x720   :  { %v5229_v47 = vadd.f32 %v5271_v60, %v5228_v29  ;;  %v6523_v39 = vpop.f32.mrb[49].mxu0 }
 0x722   :  { %5232 = vst [vmem:[#allocation2] sm:$0xff] %v5229_v47 }
 0x723   :  { %7749 = shalt.err (!%p7746_p4)
}
 0x724   :  { %s7750_s7 = scalar_lea.hbm %s11871_s15, 128 }
 0x725   :  { %p7751_p5 = scmp.ne.s32.totalorder %s11871_s15, %s7750_s7  ;;  %p7754_p6 = scmp.lt.u32.totalorder %s7750_s7, %s11871_s15 }
 0x727   :  { %p7756_p7 = pnand %p7754_p6, %p7751_p5 }
 0x729   :  { %7759 = shalt.err (!%p7756_p7)
}
 0x72a   :  { %5242 = dma.vmem_to_hbm [thread:$0]  %s5240_s6, 128, %s11871_s15, [#allocation3]  }
 0x72b   :  { %7760 = dma.done.wait [#allocation3], 128  }
 0x72c   :  { %7761 = vsyncadd [#allocation3], 4294967168 }
 0x72d   :  { %5246 = vsyncpa [#allocation3], 1 }

</bundles_post_ra>
